<compile_context>
chip_gen: v6e
topology: v6e:2x2x1
jax: 0.10.0
libtpu: 0.0.40
codegen_flags: <defaults>
</compile_context>

<pallas_src>
import functools

import jax
import jax.numpy as jnp
from jax.experimental import pallas as pl
from jax.experimental.pallas import tpu as pltpu

BN_EPS = 1e-5


# --------------------------------------------------------------------------- #
# Fused Pallas kernel
# --------------------------------------------------------------------------- #
def _pred_block2_kernel(xh_ref, w1_ref, b1_ref, w2_ref, b2_ref, w3_ref, b3_ref,
                        wd_ref, bd_ref, o_ref, *, H, W, TH):
    Cp = xh_ref.shape[-1]      # padded inplanes (multiple of 128)
    Pp = o_ref.shape[-1]       # padded planes   (multiple of 128)
    t = pl.program_id(1)       # row-tile index

    x = xh_ref[...]            # (TH+2, W+2, Cp) halo'd, zero-padded input tile

    # ---- conv1 (1x1) + bn1 + relu on the whole halo'd tile (one matmul) -----
    xf = x.reshape((TH + 2) * (W + 2), Cp)
    a1 = jnp.dot(xf, w1_ref[...], preferred_element_type=jnp.float32) + b1_ref[...]
    a1 = jnp.maximum(a1, 0.0).reshape(TH + 2, W + 2, Pp)

    # conv2 zero-pads *its own* input, so halo positions that fall inside the
    # original image's zero-padding ring must be exactly 0 (not relu(bn bias)).
    row = jax.lax.broadcasted_iota(jnp.int32, a1.shape, 0) + t * TH
    col = jax.lax.broadcasted_iota(jnp.int32, a1.shape, 1)
    inside = (row >= 1) & (row <= H) & (col >= 1) & (col <= W)
    a1 = jnp.where(inside, a1, 0.0)

    # ---- conv2 (3x3) + bn2 + relu: single matmul with K = 9*Pp --------------
    p2 = jnp.concatenate(
        [a1[kh:kh + TH, kw:kw + W, :] for kh in range(3) for kw in range(3)],
        axis=-1).reshape(TH * W, 9 * Pp)
    a2 = jnp.dot(p2, w2_ref[...], preferred_element_type=jnp.float32) + b2_ref[...]
    a2 = jnp.maximum(a2, 0.0)

    # ---- conv3 (1x1) + bn3 ---------------------------------------------------
    a3 = jnp.dot(a2, w3_ref[...], preferred_element_type=jnp.float32) + b3_ref[...]

    # ---- downsample branch: 3x3 conv + bn on the raw input tile --------------
    pd = jnp.concatenate(
        [x[kh:kh + TH, kw:kw + W, :] for kh in range(3) for kw in range(3)],
        axis=-1).reshape(TH * W, 9 * Cp)
    res = jnp.dot(pd, wd_ref[...], preferred_element_type=jnp.float32) + bd_ref[...]

    # ---- residual add + final relu -------------------------------------------
    out = jnp.maximum(a3 + res, 0.0)
    o_ref[...] = out.reshape(TH, W, Pp).astype(o_ref.dtype)


# --------------------------------------------------------------------------- #
# Parameter / layout prep (plain-JAX plumbing)
# --------------------------------------------------------------------------- #
def _round_up(n, m):
    return ((n + m - 1) // m) * m


def _bn_fold(gamma, beta, mean, var):
    scale = gamma / jnp.sqrt(var + BN_EPS)
    bias = beta - mean * scale
    return scale, bias


def _prep_1x1(w_oihw, scale, bias, cin_pad, cout_pad):
    # (Cout, Cin, 1, 1) -> (Cin_pad, Cout_pad) with BN scale folded into columns.
    cout, cin = w_oihw.shape[0], w_oihw.shape[1]
    w = jnp.transpose(w_oihw[:, :, 0, 0], (1, 0)) * scale[None, :]
    w = jnp.pad(w, ((0, cin_pad - cin), (0, cout_pad - cout)))
    b = jnp.pad(bias, (0, cout_pad - cout)).reshape(1, cout_pad)
    return w, b


def _prep_3x3(w_oihw, scale, bias, cin_pad, cout_pad):
    # (Cout, Cin, 3, 3) -> (9*Cin_pad, Cout_pad), taps kh-major/kw-minor (matches
    # the in-kernel patch concat order), BN scale folded into columns.
    cout, cin = w_oihw.shape[0], w_oihw.shape[1]
    w = jnp.transpose(w_oihw, (2, 3, 1, 0)) * scale[None, None, None, :]
    w = jnp.pad(w, ((0, 0), (0, 0), (0, cin_pad - cin), (0, cout_pad - cout)))
    w = w.reshape(9 * cin_pad, cout_pad)
    b = jnp.pad(bias, (0, cout_pad - cout)).reshape(1, cout_pad)
    return w, b


def _choose_tile_h(H, W, target_rows=512):
    th = 1
    for cand in range(1, H + 1):
        if H % cand == 0 and cand * W <= max(target_rows, W):
            th = cand
    return th


# --------------------------------------------------------------------------- #
# Forward pass
# --------------------------------------------------------------------------- #
def pred_block2_forward(x_nchw, params, tile_h=None):
    B, cin, H, W = x_nchw.shape
    planes = params["w1"].shape[0]
    Cp = _round_up(cin, 128)      # lane-dense padded inplanes
    Pp = _round_up(planes, 128)   # lane-dense padded planes
    TH = _choose_tile_h(H, W) if tile_h is None else tile_h
    if H % TH != 0:
        raise ValueError(f"tile_h={TH} must divide H={H}")
    n_tiles = H // TH

    # NCHW -> NHWC, spatial zero-pad (+1 halo ring), channel pad to Cp.
    x = jnp.transpose(x_nchw, (0, 2, 3, 1))
    xp = jnp.pad(x, ((0, 0), (1, 1), (1, 1), (0, Cp - cin)))
    # Halo-expand the row dimension into non-overlapping per-tile blocks
    # (duplicates only the 2 halo rows per tile; NOT a 9x im2col blob in HBM).
    xh = jnp.stack([xp[:, t * TH: t * TH + TH + 2] for t in range(n_tiles)],
                   axis=1)                      # (B, n_tiles, TH+2, W+2, Cp)

    s1, b1 = _bn_fold(*params["bn1"])
    s2, b2 = _bn_fold(*params["bn2"])
    s3, b3 = _bn_fold(*params["bn3"])
    sd, bd = _bn_fold(*params["bnd"])
    w1, bb1 = _prep_1x1(params["w1"], s1, b1, Cp, Pp)
    w2, bb2 = _prep_3x3(params["w2"], s2, b2, Pp, Pp)
    w3, bb3 = _prep_1x1(params["w3"], s3, b3, Pp, Pp)
    wd, bbd = _prep_3x3(params["wd"], sd, bd, Cp, Pp)

    kernel = functools.partial(_pred_block2_kernel, H=H, W=W, TH=TH)

    def const_spec(shape):  # weights / biases: one untiled block, reused every step
        return pl.BlockSpec(shape, lambda b, t: tuple(0 for _ in shape))

    out = pl.pallas_call(
        kernel,
        out_shape=jax.ShapeDtypeStruct((B, H, W, Pp), x.dtype),
        grid=(B, n_tiles),
        in_specs=[
            pl.BlockSpec((None, None, TH + 2, W + 2, Cp),
                         lambda b, t: (b, t, 0, 0, 0)),
            const_spec((Cp, Pp)), const_spec((1, Pp)),        # w1, b1
            const_spec((9 * Pp, Pp)), const_spec((1, Pp)),    # w2, b2
            const_spec((Pp, Pp)), const_spec((1, Pp)),        # w3, b3
            const_spec((9 * Cp, Pp)), const_spec((1, Pp)),    # wd, bd
        ],
        out_specs=pl.BlockSpec((None, TH, W, Pp), lambda b, t: (b, t, 0, 0)),
        compiler_params=pltpu.CompilerParams(
            dimension_semantics=("parallel", "parallel"),
            vmem_limit_bytes=64 * 1024 * 1024,
        ),
    )(xh, w1, bb1, w2, bb2, w3, bb3, wd, bbd)

    out = out[..., :planes]                      # drop channel padding
    return jnp.transpose(out, (0, 3, 1, 2))      # NHWC -> NCHW


# --------------------------------------------------------------------------- #
# Deterministic PyTorch-shaped parameters
# --------------------------------------------------------------------------- #
def init_params(key, inplanes, planes):
    ks = jax.random.split(key, 8)

    def conv_w(k, cout, cin, ksz):
        fan_in = cin * ksz * ksz
        return jax.random.normal(k, (cout, cin, ksz, ksz), jnp.float32) / jnp.sqrt(fan_in)

    def bn_p(k, c):
        k1, k2, k3, k4 = jax.random.split(k, 4)
        gamma = 1.0 + 0.1 * jax.random.normal(k1, (c,), jnp.float32)
        beta = 0.1 * jax.random.normal(k2, (c,), jnp.float32)
        mean = 0.1 * jax.random.normal(k3, (c,), jnp.float32)
        var = jnp.abs(jax.random.normal(k4, (c,), jnp.float32)) + 0.5
        return (gamma, beta, mean, var)

    return {
        "w1": conv_w(ks[0], planes, inplanes, 1), "bn1": bn_p(ks[1], planes),
        "w2": conv_w(ks[2], planes, planes, 3),   "bn2": bn_p(ks[3], planes),
        "w3": conv_w(ks[4], planes, planes, 1),   "bn3": bn_p(ks[5], planes),
        "wd": conv_w(ks[6], planes, inplanes, 3), "bnd": bn_p(ks[7], planes),
    }


# --------------------------------------------------------------------------- #
# Pure-JAX reference (correctness check only)
# --------------------------------------------------------------------------- #
def ref_forward(x_nchw, p):
    def conv(x, w, pad):
        return jax.lax.conv_general_dilated(
            x, w, (1, 1), [(pad, pad), (pad, pad)],
            dimension_numbers=("NCHW", "OIHW", "NCHW"))

    def bn(x, g, b, m, v):
        g, b, m, v = (t[None, :, None, None] for t in (g, b, m, v))
        return (x - m) / jnp.sqrt(v + BN_EPS) * g + b

    relu = lambda t: jnp.maximum(t, 0.0)
    out = relu(bn(conv(x_nchw, p["w1"], 0), *p["bn1"]))
    out = relu(bn(conv(out, p["w2"], 1), *p["bn2"]))
    out = bn(conv(out, p["w3"], 0), *p["bn3"])
    res = bn(conv(x_nchw, p["wd"], 1), *p["bnd"])
    return relu(out + res)


if __name__ == "__main__":
    B, inplanes, planes, HW = 2, 4, 8, 16
    key = jax.random.PRNGKey(0)
    kx, kp = jax.random.split(key)
    x = jax.random.normal(kx, (B, inplanes, HW, HW), jnp.float32)
    params = init_params(kp, inplanes, planes)

    fwd = jax.jit(pred_block2_forward, static_argnames=("tile_h",))
    out_tiled = jax.block_until_ready(fwd(x, params, tile_h=8))  # multi-tile halo path
    out_full = jax.block_until_ready(fwd(x, params))             # default tile heuristic

    ref = ref_forward(x, params)
    assert out_tiled.shape == (B, planes, HW, HW), out_tiled.shape
    err1 = float(jnp.max(jnp.abs(out_tiled - ref)))
    err2 = float(jnp.max(jnp.abs(out_full - ref)))
    assert err1 < 1e-3, f"tiled kernel mismatch vs reference: {err1}"
    assert err2 < 1e-3, f"kernel mismatch vs reference: {err2}"
    print("KERNEL_OK")
</pallas_src>

<mosaic_0001>
module attributes {stable_mosaic.version = 11 : i64} {
  func.func @_pred_block2_kernel(%arg0: i32, %arg1: i32, %arg2: memref<1x1x10x18x128xf32, #tpu.memory_space<vmem>>, %arg3: memref<128x128xf32, #tpu.memory_space<vmem>>, %arg4: memref<1x128xf32, #tpu.memory_space<vmem>>, %arg5: memref<1152x128xf32, #tpu.memory_space<vmem>>, %arg6: memref<1x128xf32, #tpu.memory_space<vmem>>, %arg7: memref<128x128xf32, #tpu.memory_space<vmem>>, %arg8: memref<1x128xf32, #tpu.memory_space<vmem>>, %arg9: memref<1152x128xf32, #tpu.memory_space<vmem>>, %arg10: memref<1x128xf32, #tpu.memory_space<vmem>>, %arg11: memref<1x8x16x128xf32, #tpu.memory_space<vmem>>) attributes {dimension_semantics = [#tpu.dimension_semantics<parallel>, #tpu.dimension_semantics<parallel>], iteration_bounds = array<i64: 2, 2>, scalar_prefetch = 0 : i64, scratch_operands = 0 : i64, tpu.core_type = #tpu.core_type<tc>, window_params = [{transform_indices = @transform_0, window_bounds = array<i64: 1, 1, 10, 18, 128>}, {pipeline_mode = #tpu.pipeline_mode<synchronous>, transform_indices = @transform_1, window_bounds = array<i64: 128, 128>}, {pipeline_mode = #tpu.pipeline_mode<synchronous>, transform_indices = @transform_2, window_bounds = array<i64: 1, 128>}, {pipeline_mode = #tpu.pipeline_mode<synchronous>, transform_indices = @transform_3, window_bounds = array<i64: 1152, 128>}, {pipeline_mode = #tpu.pipeline_mode<synchronous>, transform_indices = @transform_4, window_bounds = array<i64: 1, 128>}, {pipeline_mode = #tpu.pipeline_mode<synchronous>, transform_indices = @transform_5, window_bounds = array<i64: 128, 128>}, {pipeline_mode = #tpu.pipeline_mode<synchronous>, transform_indices = @transform_6, window_bounds = array<i64: 1, 128>}, {pipeline_mode = #tpu.pipeline_mode<synchronous>, transform_indices = @transform_7, window_bounds = array<i64: 1152, 128>}, {pipeline_mode = #tpu.pipeline_mode<synchronous>, transform_indices = @transform_8, window_bounds = array<i64: 1, 128>}, {transform_indices = @transform_9, window_bounds = array<i64: 1, 8, 16, 128>}]} {
    %c0 = arith.constant 0 : index
    %c0_0 = arith.constant 0 : index
    %c0_1 = arith.constant 0 : index
    %c0_2 = arith.constant 0 : index
    %c0_3 = arith.constant 0 : index
    %0 = vector.load %arg2[%c0, %c0_0, %c0_1, %c0_2, %c0_3] : memref<1x1x10x18x128xf32, #tpu.memory_space<vmem>>, vector<1x1x10x18x128xf32>
    %1 = vector.shape_cast %0 : vector<1x1x10x18x128xf32> to vector<10x18x128xf32>
    %2 = vector.shape_cast %1 : vector<10x18x128xf32> to vector<180x128xf32>
    %c0_4 = arith.constant 0 : index
    %c0_5 = arith.constant 0 : index
    %3 = vector.load %arg3[%c0_4, %c0_5] : memref<128x128xf32, #tpu.memory_space<vmem>>, vector<128x128xf32>
    %cst = arith.constant dense<0.000000e+00> : vector<180x128xf32>
    %4 = tpu.matmul %2, %3, %cst {dimension_numbers = #tpu.dot_dimension_numbers<[1], [0], [0], [1], [0, 0, 1, 1], [], []>} : vector<180x128xf32>, vector<128x128xf32>, vector<180x128xf32> -> vector<180x128xf32>
    %c0_6 = arith.constant 0 : index
    %c0_7 = arith.constant 0 : index
    %5 = vector.load %arg4[%c0_6, %c0_7] : memref<1x128xf32, #tpu.memory_space<vmem>>, vector<1x128xf32>
    %6 = vector.broadcast %5 : vector<1x128xf32> to vector<180x128xf32>
    %7 = arith.addf %4, %6 : vector<180x128xf32>
    %cst_8 = arith.constant 0.000000e+00 : f32
    %8 = vector.broadcast %cst_8 : f32 to vector<180x128xf32>
    %9 = arith.maximumf %7, %8 : vector<180x128xf32>
    %10 = vector.shape_cast %9 : vector<180x128xf32> to vector<10x18x128xf32>
    %11 = tpu.iota {dimensions = array<i32: 0>} : vector<10x18x128xi32>
    %c8_i32 = arith.constant 8 : i32
    %12 = arith.muli %arg1, %c8_i32 : i32
    %13 = vector.broadcast %12 : i32 to vector<10x18x128xi32>
    %14 = arith.addi %11, %13 : vector<10x18x128xi32>
    %15 = tpu.iota {dimensions = array<i32: 1>} : vector<10x18x128xi32>
    %c1_i32 = arith.constant 1 : i32
    %16 = vector.broadcast %c1_i32 : i32 to vector<10x18x128xi32>
    %17 = arith.cmpi sge, %14, %16 : vector<10x18x128xi32>
    %c16_i32 = arith.constant 16 : i32
    %18 = vector.broadcast %c16_i32 : i32 to vector<10x18x128xi32>
    %19 = arith.cmpi sle, %14, %18 : vector<10x18x128xi32>
    %20 = arith.andi %17, %19 : vector<10x18x128xi1>
    %c1_i32_9 = arith.constant 1 : i32
    %21 = vector.broadcast %c1_i32_9 : i32 to vector<10x18x128xi32>
    %22 = arith.cmpi sge, %15, %21 : vector<10x18x128xi32>
    %23 = arith.andi %20, %22 : vector<10x18x128xi1>
    %c16_i32_10 = arith.constant 16 : i32
    %24 = vector.broadcast %c16_i32_10 : i32 to vector<10x18x128xi32>
    %25 = arith.cmpi sle, %15, %24 : vector<10x18x128xi32>
    %26 = arith.andi %23, %25 : vector<10x18x128xi1>
    %cst_11 = arith.constant 0.000000e+00 : f32
    %27 = vector.broadcast %cst_11 : f32 to vector<10x18x128xf32>
    %28 = arith.select %26, %10, %27 : vector<10x18x128xi1>, vector<10x18x128xf32>
    %29 = vector.extract_strided_slice %28 {offsets = [0, 0, 0], sizes = [8, 16, 128], strides = [1, 1, 1]} : vector<10x18x128xf32> to vector<8x16x128xf32>
    %30 = vector.extract_strided_slice %28 {offsets = [0, 1, 0], sizes = [8, 16, 128], strides = [1, 1, 1]} : vector<10x18x128xf32> to vector<8x16x128xf32>
    %31 = vector.extract_strided_slice %28 {offsets = [0, 2, 0], sizes = [8, 16, 128], strides = [1, 1, 1]} : vector<10x18x128xf32> to vector<8x16x128xf32>
    %32 = vector.extract_strided_slice %28 {offsets = [1, 0, 0], sizes = [8, 16, 128], strides = [1, 1, 1]} : vector<10x18x128xf32> to vector<8x16x128xf32>
    %33 = vector.extract_strided_slice %28 {offsets = [1, 1, 0], sizes = [8, 16, 128], strides = [1, 1, 1]} : vector<10x18x128xf32> to vector<8x16x128xf32>
    %34 = vector.extract_strided_slice %28 {offsets = [1, 2, 0], sizes = [8, 16, 128], strides = [1, 1, 1]} : vector<10x18x128xf32> to vector<8x16x128xf32>
    %35 = vector.extract_strided_slice %28 {offsets = [2, 0, 0], sizes = [8, 16, 128], strides = [1, 1, 1]} : vector<10x18x128xf32> to vector<8x16x128xf32>
    %36 = vector.extract_strided_slice %28 {offsets = [2, 1, 0], sizes = [8, 16, 128], strides = [1, 1, 1]} : vector<10x18x128xf32> to vector<8x16x128xf32>
    %37 = vector.extract_strided_slice %28 {offsets = [2, 2, 0], sizes = [8, 16, 128], strides = [1, 1, 1]} : vector<10x18x128xf32> to vector<8x16x128xf32>
    %38 = tpu.concatenate %29, %30, %31, %32, %33, %34, %35, %36, %37 in 2 : vector<8x16x128xf32>, vector<8x16x128xf32>, vector<8x16x128xf32>, vector<8x16x128xf32>, vector<8x16x128xf32>, vector<8x16x128xf32>, vector<8x16x128xf32>, vector<8x16x128xf32>, vector<8x16x128xf32> -> vector<8x16x1152xf32>
    %39 = vector.shape_cast %38 : vector<8x16x1152xf32> to vector<128x1152xf32>
    %c0_12 = arith.constant 0 : index
    %c0_13 = arith.constant 0 : index
    %40 = vector.load %arg5[%c0_12, %c0_13] : memref<1152x128xf32, #tpu.memory_space<vmem>>, vector<1152x128xf32>
    %cst_14 = arith.constant dense<0.000000e+00> : vector<128x128xf32>
    %41 = tpu.matmul %39, %40, %cst_14 {dimension_numbers = #tpu.dot_dimension_numbers<[1], [0], [0], [1], [0, 0, 1, 1], [], []>} : vector<128x1152xf32>, vector<1152x128xf32>, vector<128x128xf32> -> vector<128x128xf32>
    %c0_15 = arith.constant 0 : index
    %c0_16 = arith.constant 0 : index
    %42 = vector.load %arg6[%c0_15, %c0_16] : memref<1x128xf32, #tpu.memory_space<vmem>>, vector<1x128xf32>
    %43 = vector.broadcast %42 : vector<1x128xf32> to vector<128x128xf32>
    %44 = arith.addf %41, %43 : vector<128x128xf32>
    %cst_17 = arith.constant 0.000000e+00 : f32
    %45 = vector.broadcast %cst_17 : f32 to vector<128x128xf32>
    %46 = arith.maximumf %44, %45 : vector<128x128xf32>
    %c0_18 = arith.constant 0 : index
    %c0_19 = arith.constant 0 : index
    %47 = vector.load %arg7[%c0_18, %c0_19] : memref<128x128xf32, #tpu.memory_space<vmem>>, vector<128x128xf32>
    %cst_20 = arith.constant dense<0.000000e+00> : vector<128x128xf32>
    %48 = tpu.matmul %46, %47, %cst_20 {dimension_numbers = #tpu.dot_dimension_numbers<[1], [0], [0], [1], [0, 0, 1, 1], [], []>} : vector<128x128xf32>, vector<128x128xf32>, vector<128x128xf32> -> vector<128x128xf32>
    %c0_21 = arith.constant 0 : index
    %c0_22 = arith.constant 0 : index
    %49 = vector.load %arg8[%c0_21, %c0_22] : memref<1x128xf32, #tpu.memory_space<vmem>>, vector<1x128xf32>
    %50 = vector.broadcast %49 : vector<1x128xf32> to vector<128x128xf32>
    %51 = arith.addf %48, %50 : vector<128x128xf32>
    %52 = vector.extract_strided_slice %1 {offsets = [0, 0, 0], sizes = [8, 16, 128], strides = [1, 1, 1]} : vector<10x18x128xf32> to vector<8x16x128xf32>
    %53 = vector.extract_strided_slice %1 {offsets = [0, 1, 0], sizes = [8, 16, 128], strides = [1, 1, 1]} : vector<10x18x128xf32> to vector<8x16x128xf32>
    %54 = vector.extract_strided_slice %1 {offsets = [0, 2, 0], sizes = [8, 16, 128], strides = [1, 1, 1]} : vector<10x18x128xf32> to vector<8x16x128xf32>
    %55 = vector.extract_strided_slice %1 {offsets = [1, 0, 0], sizes = [8, 16, 128], strides = [1, 1, 1]} : vector<10x18x128xf32> to vector<8x16x128xf32>
    %56 = vector.extract_strided_slice %1 {offsets = [1, 1, 0], sizes = [8, 16, 128], strides = [1, 1, 1]} : vector<10x18x128xf32> to vector<8x16x128xf32>
    %57 = vector.extract_strided_slice %1 {offsets = [1, 2, 0], sizes = [8, 16, 128], strides = [1, 1, 1]} : vector<10x18x128xf32> to vector<8x16x128xf32>
    %58 = vector.extract_strided_slice %1 {offsets = [2, 0, 0], sizes = [8, 16, 128], strides = [1, 1, 1]} : vector<10x18x128xf32> to vector<8x16x128xf32>
    %59 = vector.extract_strided_slice %1 {offsets = [2, 1, 0], sizes = [8, 16, 128], strides = [1, 1, 1]} : vector<10x18x128xf32> to vector<8x16x128xf32>
    %60 = vector.extract_strided_slice %1 {offsets = [2, 2, 0], sizes = [8, 16, 128], strides = [1, 1, 1]} : vector<10x18x128xf32> to vector<8x16x128xf32>
    %61 = tpu.concatenate %52, %53, %54, %55, %56, %57, %58, %59, %60 in 2 : vector<8x16x128xf32>, vector<8x16x128xf32>, vector<8x16x128xf32>, vector<8x16x128xf32>, vector<8x16x128xf32>, vector<8x16x128xf32>, vector<8x16x128xf32>, vector<8x16x128xf32>, vector<8x16x128xf32> -> vector<8x16x1152xf32>
    %62 = vector.shape_cast %61 : vector<8x16x1152xf32> to vector<128x1152xf32>
    %c0_23 = arith.constant 0 : index
    %c0_24 = arith.constant 0 : index
    %63 = vector.load %arg9[%c0_23, %c0_24] : memref<1152x128xf32, #tpu.memory_space<vmem>>, vector<1152x128xf32>
    %cst_25 = arith.constant dense<0.000000e+00> : vector<128x128xf32>
    %64 = tpu.matmul %62, %63, %cst_25 {dimension_numbers = #tpu.dot_dimension_numbers<[1], [0], [0], [1], [0, 0, 1, 1], [], []>} : vector<128x1152xf32>, vector<1152x128xf32>, vector<128x128xf32> -> vector<128x128xf32>
    %c0_26 = arith.constant 0 : index
    %c0_27 = arith.constant 0 : index
    %65 = vector.load %arg10[%c0_26, %c0_27] : memref<1x128xf32, #tpu.memory_space<vmem>>, vector<1x128xf32>
    %66 = vector.broadcast %65 : vector<1x128xf32> to vector<128x128xf32>
    %67 = arith.addf %64, %66 : vector<128x128xf32>
    %68 = arith.addf %51, %67 : vector<128x128xf32>
    %cst_28 = arith.constant 0.000000e+00 : f32
    %69 = vector.broadcast %cst_28 : f32 to vector<128x128xf32>
    %70 = arith.maximumf %68, %69 : vector<128x128xf32>
    %71 = vector.shape_cast %70 : vector<128x128xf32> to vector<8x16x128xf32>
    %c0_29 = arith.constant 0 : index
    %c0_30 = arith.constant 0 : index
    %c0_31 = arith.constant 0 : index
    %c0_32 = arith.constant 0 : index
    %72 = vector.load %arg11[%c0_29, %c0_30, %c0_31, %c0_32] : memref<1x8x16x128xf32, #tpu.memory_space<vmem>>, vector<1x8x16x128xf32>
    %73 = vector.shape_cast %72 : vector<1x8x16x128xf32> to vector<8x16x128xf32>
    %74 = vector.shape_cast %71 : vector<8x16x128xf32> to vector<1x8x16x128xf32>
    tpu.vector_store %arg11[%c0_29, %c0_30, %c0_31, %c0_32], %74 {strides = array<i32>} : memref<1x8x16x128xf32, #tpu.memory_space<vmem>>, vector<1x8x16x128xf32>,
    return
  }
  func.func @transform_0(%arg0: i32, %arg1: i32) -> (i32, i32, i32, i32, i32) {
    %c0_i32 = arith.constant 0 : i32
    %c0_i32_0 = arith.constant 0 : i32
    %c0_i32_1 = arith.constant 0 : i32
    %c0_i32_2 = arith.constant 0 : i32
    return %arg0, %arg1, %c0_i32, %c0_i32_0, %c0_i32_1 : i32, i32, i32, i32, i32
  }
  func.func @transform_1(%arg0: i32, %arg1: i32) -> (i32, i32) {
    %c0_i32 = arith.constant 0 : i32
    %c0_i32_0 = arith.constant 0 : i32
    %c0_i32_1 = arith.constant 0 : i32
    return %c0_i32, %c0_i32_0 : i32, i32
  }
  func.func @transform_2(%arg0: i32, %arg1: i32) -> (i32, i32) {
    %c0_i32 = arith.constant 0 : i32
    %c0_i32_0 = arith.constant 0 : i32
    %c0_i32_1 = arith.constant 0 : i32
    return %c0_i32, %c0_i32_0 : i32, i32
  }
  func.func @transform_3(%arg0: i32, %arg1: i32) -> (i32, i32) {
    %c0_i32 = arith.constant 0 : i32
    %c0_i32_0 = arith.constant 0 : i32
    %c0_i32_1 = arith.constant 0 : i32
    return %c0_i32, %c0_i32_0 : i32, i32
  }
  func.func @transform_4(%arg0: i32, %arg1: i32) -> (i32, i32) {
    %c0_i32 = arith.constant 0 : i32
    %c0_i32_0 = arith.constant 0 : i32
    %c0_i32_1 = arith.constant 0 : i32
    return %c0_i32, %c0_i32_0 : i32, i32
  }
  func.func @transform_5(%arg0: i32, %arg1: i32) -> (i32, i32) {
    %c0_i32 = arith.constant 0 : i32
    %c0_i32_0 = arith.constant 0 : i32
    %c0_i32_1 = arith.constant 0 : i32
    return %c0_i32, %c0_i32_0 : i32, i32
  }
  func.func @transform_6(%arg0: i32, %arg1: i32) -> (i32, i32) {
    %c0_i32 = arith.constant 0 : i32
    %c0_i32_0 = arith.constant 0 : i32
    %c0_i32_1 = arith.constant 0 : i32
    return %c0_i32, %c0_i32_0 : i32, i32
  }
  func.func @transform_7(%arg0: i32, %arg1: i32) -> (i32, i32) {
    %c0_i32 = arith.constant 0 : i32
    %c0_i32_0 = arith.constant 0 : i32
    %c0_i32_1 = arith.constant 0 : i32
    return %c0_i32, %c0_i32_0 : i32, i32
  }
  func.func @transform_8(%arg0: i32, %arg1: i32) -> (i32, i32) {
    %c0_i32 = arith.constant 0 : i32
    %c0_i32_0 = arith.constant 0 : i32
    %c0_i32_1 = arith.constant 0 : i32
    return %c0_i32, %c0_i32_0 : i32, i32
  }
  func.func @transform_9(%arg0: i32, %arg1: i32) -> (i32, i32, i32, i32) {
    %c0_i32 = arith.constant 0 : i32
    %c0_i32_0 = arith.constant 0 : i32
    %c0_i32_1 = arith.constant 0 : i32
    return %arg0, %arg1, %c0_i32, %c0_i32_0 : i32, i32, i32, i32
  }
}

</mosaic_0001>

<bundles_post_ra>
// kernel: pred_block2_forward.1
= control target key start
LH: loop header
LB: loop body
LE: loop exit
PB: predicated region body
PF: predicated region fallthrough
CT: control target
= control target key end

     0   :  { %s6179_s30 = smov 0   ;;  %s6181_s10 = smov 0   ;;  %s9331_s0 = inlined_call_operand.vmem [shape: f32[2,2,10,18,128], index: 0, kind: input, shape index: {}]   ;;  %s9332_s1 = inlined_call_operand.vmem [shape: f32[128,128], index: 1, kind: input, shape index: {}]   ;;  %s9333_s2 = inlined_call_operand.vmem [shape: f32[1,128], index: 2, kind: input, shape index: {}]   ;;  %s9334_s3 = inlined_call_operand.vmem [shape: f32[1152,128], index: 3, kind: input, shape index: {}]   ;;  %s9335_s4 = inlined_call_operand.vmem [shape: f32[1,128], index: 4, kind: input, shape index: {}]   ;;  %s9336_s5 = inlined_call_operand.vmem [shape: f32[128,128], index: 5, kind: input, shape index: {}]   ;;  %s9337_s6 = inlined_call_operand.vmem [shape: f32[1,128], index: 6, kind: input, shape index: {}]   ;;  %s9338_s7 = inlined_call_operand.vmem [shape: f32[1152,128], index: 7, kind: input, shape index: {}]   ;;  %s9339_s8 = inlined_call_operand.vmem [shape: f32[1,128], index: 8, kind: input, shape index: {}]   ;;  %s9340_s9 = inlined_call_operand.vmem [shape: f32[2,16,16,128], index: 9, kind: output, shape index: {}]  }
   0x1   :  { %s6183_s11 = smov 0   ;;  %s6185_s12 = smov 0  }
   0x2   :  { %s6187_s13 = smov 0  }
   0x3 LB: > { %s28_s14 = sadd.s32 1, %s6116_s11  ;;  %s31_s15 = sadd.s32 1, %s6120_s12  ;;  %s6124_s13 = sphi %s6187_s13, %s19_s13   ;;  %s6120_s12 = sphi %s6185_s12, %s9774_s12   ;;  %s6116_s11 = sphi %s6183_s11, %s9773_s11   ;;  %s6112_s10 = sphi %s6181_s10, %s9772_s10   ;;  %s6108_s30 = sphi %s6179_s30, %s9771_s30  }
   0x4   : > { %p29_p0 = scmp.ge.s32.totalorder %s28_s14, 2  ;;  %p4858_p1 = scmp.ge.s32.totalorder %s6124_s13, 1 }
   0x5   : > { %p307_p2 = scmp.lt.s32.totalorder %s6124_s13, 5 }
   0x6   : > { %s9776_s14 = smov (%p29_p0, %s28_s14), 0  ;;  %s9778_s15 = smov (!%p29_p0, %s31_s15), %s6120_s12 }
   0x7   : > { %p308_p3 = pnand %p4858_p1, %p307_p2  ;;  %p33_p4 = scmp.ge.s32.totalorder %s9778_s15, 2 }
   0x9   : > { %s9780_s15 = smov (%p33_p4, %s9778_s15), 0  ;;  %311 = sbr.rel (%p308_p3) target bundleno = 1013 (0x3f5), region = 56 }
   0xe   : > { %v857_v0 = vld [vmem:[%s9332_s1 + $0x78] sm:$0xff]  ;;  %p352_p5 = scmp.lt.s32.totalorder %s6112_s10, 1  ;;  %v6126_v1 = vmov 0.0   ;;  %v856_v2 = vld [vmem:[%s9332_s1 + $0x70] sm:$0xff]  ;;  %vm6127_vm0 = vmmov 0   ;;  %p354_p6 = scmp.lt.s32.totalorder %s6108_s30, 1  ;;  %v436_v3 = vlaneseq }
   0xf   : > { %5694 = vmatprep.subr.mxu0 %v6126_v1  ;;  %5726 = vmatprep.mubr.msk.f32.mxu0 %vm6127_vm0, %v6126_v1  ;;  %v6128_v4 = vmov 1983009808   ;;  %v855_v6 = vld [vmem:[%s9332_s1 + $0x68] sm:$0xff]  ;;  %v854_v7 = vld [vmem:[%s9332_s1 + $0x60] sm:$0xff]  ;;  %v2662_v10 = vld [vmem:[%s9334_s3 + $0xf8] sm:$0xff]  ;;  %vm9348_vm10 = vcmask 1046528  }
  0x10   : > { %5695 = vmatpush3.msra.mxu0 %v857_v0  ;;  %s9782_s10 = smov (!%p352_p5, %s6112_s10), 1  ;;  %v434_v5 = vunpack.c.l.s4 %v6128_v4  ;;  %v6233_v9 = vshrl.u32 %v436_v3, 7  ;;  %v2646_v11 = vld [vmem:[%s9334_s3 + $0x78] sm:$0xff]  ;;  %4958 = vmatprep.subr.mxu1 %v2662_v10  ;;  %v2661_v12 = vld [vmem:[%s9334_s3 + $0xf0] sm:$0xff]  ;;  %v2660_v15 = vld [vmem:[%s9334_s3 + $0xe8] sm:$0xff]  ;;  %vm9349_vm15 = vcmask 1045504  }
  0x11   : > { %5696 = vmatprep.subr.mxu0 %v6126_v1  ;;  %s355_s22 = scalar_select %p354_p6, %s6108_s30, 1  ;;  %v2645_v13 = vld [vmem:[%s9334_s3 + $0x70] sm:$0xff]  ;;  %v853_v14 = vld [vmem:[%s9332_s1 + $0x58] sm:$0xff]  ;;  %4959 = vmatpush3.msra.mxu1 %v2646_v11  ;;  %v851_v20 = vld [vmem:[%s9332_s1 + $0x48] sm:$0xff] }
  0x12   : > { %5697 = vmatpush3.msra.mxu0 %v856_v2  ;;  %s5964_s23 = smul.u32 60, %s9782_s10  ;;  %v435_v8 = vunpack.c.0.s8 %v434_v5  ;;  %4960 = vmatprep.subr.mxu1 %v2661_v12  ;;  %v852_v16 = vld [vmem:[%s9332_s1 + $0x50] sm:$0xff]  ;;  %v850_v22 = vld [vmem:[%s9332_s1 + $0x40] sm:$0xff]  ;;  %v849_v26 = vld [vmem:[%s9332_s1 + $0x38] sm:$0xff]  ;;  %vm9351_vm4 = vcmp.ge.s32.totalorder %v6233_v9, 1  ;;  %s4862_s20 = sshll.u32 %s9782_s10, 5 }
  0x13   : > { %5698 = vmatprep.subr.mxu0 %v6126_v1  ;;  %s5963_s26 = smul.u32 30, %s355_s22  ;;  %4961 = vmatpush3.msra.mxu1 %v2645_v13  ;;  %v848_v29 = vld [vmem:[%s9332_s1 + $0x30] sm:$0xff]  ;;  %v847_v33 = vld [vmem:[%s9332_s1 + $0x28] sm:$0xff]  ;;  %v846_v38 = vld [vmem:[%s9332_s1 + $0x20] sm:$0xff] }
  0x14   : > { %5699 = vmatpush3.msra.mxu0 %v855_v6  ;;  %v6264_v17 = vsub.s32 %v435_v8, %v6233_v9  ;;  %4962 = vmatprep.subr.mxu1 %v2660_v15  ;;  %v845_v43 = vld [vmem:[%s9332_s1 + $0x18] sm:$0xff]  ;;  %v844_v48 = vld [vmem:[%s9332_s1 + $0x10] sm:$0xff]  ;;  %v843_v54 = vld [vmem:[%s9332_s1 + $0x8] sm:$0xff] }
  0x15   : > { %5700 = vmatprep.subr.mxu0 %v6126_v1  ;;  %s358_s24 = sadd.s32 %s5964_s23, %s5963_s26  ;;  %v842_v61 = vld [vmem:[%s9332_s1] sm:$0xff]  ;;  %v2644_v12 = vld [vmem:[%s9334_s3 + $0x68] sm:$0xff]  ;;  %s6659_s26 = sshll.u32 %s6108_s30, 3 }
  0x16   : > { %5701 = vmatpush3.msra.mxu0 %v854_v7  ;;  %s4859_s28 = sshll.u32 %s358_s24, 3  ;;  %4963 = vmatpush3.msra.mxu1 %v2644_v12  ;;  %p364_p7 = scmp.lt.s32.totalorder %s6659_s26, 15 }
  0x17   : > { %5702 = vmatprep.subr.mxu0 %v6126_v1  ;;  %s6261_s19 = scalar_lea.vmem %s9331_s0, %s4859_s28 }
  0x18   : > { %5703 = vmatpush3.msra.mxu0 %v853_v14  ;;  %v372_v18 = vld [vmem:[%s6261_s19] sm:$0xff]  ;;  %v373_v19 = vld [vmem:[%s6261_s19 + $0x8] sm:$0xff]  ;;  %v375_v28 = vld [vmem:[%s6261_s19 + $0x18] sm:$0xff] }
  0x19   : > { %5704 = vmatprep.subr.mxu0 %v6126_v1  ;;  %v432_v21 = vcombine.high %v372_v18, %v372_v18  ;;  %v439_v23 = vrot.slane %v372_v18, %v6264_v17  ;;  %v449_v25 = vcombine.high %v373_v19, %v373_v19  ;;  %v456_v27 = vrot.slane %v373_v19, %v6264_v17  ;;  %v6076_v37 = vld.sshfl [vmem:[%s6261_s19 + $0x10] sm:$0x3 pattern:$0x76325410]  ;;  %v376_v42 = vld [vmem:[%s6261_s19 + $0x20] sm:$0xff]  ;;  %v379_v4 = vld [vmem:[%s6261_s19 + $0x38] sm:$0xff] }
  0x1a   : > { %5705 = vmatpush3.msra.mxu0 %v852_v16  ;;  %v473_v34 = vcombine.high %v375_v28, %v375_v28  ;;  %v480_v35 = vrot.slane %v375_v28, %v6264_v17  ;;  %v490_v47 = vcombine.high %v376_v42, %v376_v42  ;;  %v497_v52 = vrot.slane %v376_v42, %v6264_v17  ;;  %v378_v53 = vld [vmem:[%s6261_s19 + $0x30] sm:$0xff]  ;;  %v6077_v2 = vld.sshfl [vmem:[%s6261_s19 + $0x28] sm:$0x3 pattern:$0x76325410] }
  0x1b   : > { %5706 = vmatprep.subr.mxu0 %v6126_v1  ;;  %v446_v24 = vrot.slane %v432_v21, %v6264_v17  ;;  %v447_v30 = vcombine.high %v439_v23, %v439_v23  ;;  %v463_v32 = vrot.slane %v449_v25, %v6264_v17  ;;  %v464_v36 = vcombine.high %v456_v27, %v456_v27  ;;  %v381_v18 = vld [vmem:[%s6261_s19 + $0x48] sm:$0xff] }
  0x1c   : > { %5707 = vmatpush3.msra.mxu0 %v851_v20  ;;  %v487_v44 = vrot.slane %v473_v34, %v6264_v17  ;;  %v488_v45 = vcombine.high %v480_v35, %v480_v35  ;;  %v899_v55 = vcombine.low %v6076_v37, %v480_v35  ;;  %v504_v59 = vrot.slane %v490_v47, %v6264_v17 }
  0x1d   : > { %5708 = vmatprep.subr.mxu0 %v6126_v1  ;;  %v448_v31 = vcombine.high %v446_v24, %v446_v24  ;;  %v865_v39 = vcombine.low %v439_v23, %v447_v30  ;;  %v465_v41 = vcombine.high %v463_v32, %v463_v32  ;;  %v882_v46 = vcombine.low %v456_v27, %v464_v36  ;;  %v6078_v23 = vld.sshfl [vmem:[%s6261_s19 + $0x40] sm:$0x3 pattern:$0x76325410] }
  0x1e   : > { %5709 = vmatpush3.msra.mxu0 %v850_v22  ;;  %v900_v56 = vcombine.low %v488_v45, %v487_v44  ;;  %v489_v58 = vcombine.high %v487_v44, %v487_v44  ;;  %v514_v60 = vcombine.high %v378_v53, %v378_v53  ;;  %v505_v0 = vcombine.high %v497_v52, %v497_v52 }
  0x1f   : > { %5710 = vmatprep.subr.mxu0 %v6126_v1  ;;  %v866_v40 = vcombine.low %v446_v24, %v448_v31  ;;  %v873_v49 = vrot.slane %v865_v39, %v6264_v17  ;;  %v883_v51 = vcombine.low %v463_v32, %v465_v41  ;;  %v890_v57 = vrot.slane %v882_v46, %v6264_v17  ;;  %v384_v39 = vld [vmem:[%s6261_s19 + $0x60] sm:$0xff] }
  0x20   : > { %5711 = vmatpush3.msra.mxu0 %v849_v26  ;;  %v521_v3 = vrot.slane %v378_v53, %v6264_v17  ;;  %v907_v5 = vrot.slane %v899_v55, %v6264_v17  ;;  %v914_v6 = vrot.slane %v900_v56, %v6264_v17  ;;  %v506_v7 = vcombine.high %v504_v59, %v504_v59 }
  0x21   : > { %5712 = vmatprep.subr.mxu0 %v6126_v1  ;;  %v880_v50 = vrot.slane %v866_v40, %v6264_v17  ;;  %v897_v63 = vrot.slane %v883_v51, %v6264_v17  ;;  %v528_v8 = vrot.slane %v514_v60, %v6264_v17  ;;  %v538_v10 = vrot.slane %v379_v4, %v6264_v17  ;;  %v385_v51 = vld [vmem:[%s6261_s19 + $0x68] sm:$0xff] }
  0x22   : > { %5713 = vmatpush3.msra.mxu0 %v848_v29  ;;  %v531_v11 = vcombine.high %v379_v4, %v379_v4  ;;  %v916_v14 = vcombine.low %v489_v58, %v497_v52  ;;  %v917_v15 = vcombine.low %v505_v0, %v504_v59  ;;  %v529_v16 = vcombine.high %v521_v3, %v521_v3  ;;  %v382_v29 = vld [vmem:[%s6261_s19 + $0x50] sm:$0xff] }
  0x23   : > { %5714 = vmatprep.subr.mxu0 %v6126_v1  ;;  %v881_v62 = vcombine.low %v873_v49, %v880_v50  ;;  %v898_v13 = vcombine.low %v890_v57, %v897_v63  ;;  %v915_v19 = vcombine.low %v907_v5, %v914_v6  ;;  %v933_v20 = vcombine.low %v506_v7, %v6077_v2 }
  0x24   : > { %5715 = vmatpush3.msra.mxu0 %v847_v33  ;;  %v530_v21 = vcombine.high %v528_v8, %v528_v8  ;;  %v546_v22 = vcombine.high %v538_v10, %v538_v10  ;;  %v545_v24 = vrot.slane %v531_v11, %v6264_v17  ;;  %v924_v25 = vrot.slane %v916_v14, %v6264_v17 }
  0x25   : > { %5716 = vmatprep.subr.mxu0 %v6126_v1  ;;  %v931_v26 = vrot.slane %v917_v15, %v6264_v17  ;;  %v934_v27 = vcombine.low %v521_v3, %v529_v16  ;;  %v555_v28 = vcombine.high %v381_v18, %v381_v18  ;;  %v562_v30 = vrot.slane %v381_v18, %v6264_v17 }
  0x26   : > { %5717 = vmatpush3.msra.mxu0 %v846_v38  ;;  %v941_v31 = vrot.slane %v933_v20, %v6264_v17  ;;  %v950_v32 = vcombine.low %v528_v8, %v530_v21  ;;  %v951_v33 = vcombine.low %v538_v10, %v546_v22  ;;  %v547_v34 = vcombine.high %v545_v24, %v545_v24  ;;  %v387_v8 = vld [vmem:[%s6261_s19 + $0x78] sm:$0xff]  ;;  %v388_v21 = vld [vmem:[%s6261_s19 + $0x80] sm:$0xff] }
  0x27   : > { %5718 = vmatprep.subr.mxu0 %v6126_v1  ;;  %v932_v35 = vcombine.low %v924_v25, %v931_v26  ;;  %v948_v36 = vrot.slane %v934_v27, %v6264_v17  ;;  %v569_v37 = vrot.slane %v555_v28, %v6264_v17  ;;  %v572_v38 = vcombine.high %v382_v29, %v382_v29 }
  0x28   : > { %5719 = vmatpush3.msra.mxu0 %v845_v43  ;;  %v968_v40 = vcombine.low %v6078_v23, %v562_v30  ;;  %v570_v41 = vcombine.high %v562_v30, %v562_v30  ;;  %v958_v42 = vrot.slane %v950_v32, %v6264_v17  ;;  %v965_v43 = vrot.slane %v951_v33, %v6264_v17 }
  0x29   : > { %5720 = vmatprep.subr.mxu0 %v6126_v1  ;;  %v967_v44 = vcombine.low %v545_v24, %v547_v34  ;;  %v579_v45 = vrot.slane %v382_v29, %v6264_v17  ;;  %v949_v46 = vcombine.low %v941_v31, %v948_v36  ;;  %v571_v47 = vcombine.high %v569_v37, %v569_v37  ;;  %v390_v31 = vld [vmem:[%s6261_s19 + $0x90] sm:$0xff] }
  0x2a   : > { %5721 = vmatpush3.msra.mxu0 %v844_v48  ;;  %v6079_v48 = vld.sshfl [vmem:[%s6261_s19 + $0x58] sm:$0x3 pattern:$0x76325410]  ;;  %v586_v49 = vrot.slane %v572_v38, %v6264_v17  ;;  %v596_v50 = vcombine.high %v384_v39, %v384_v39  ;;  %v982_v52 = vrot.slane %v968_v40, %v6264_v17  ;;  %v984_v53 = vcombine.low %v570_v41, %v569_v37 }
  0x2b   : > { %5722 = vmatprep.subr.mxu0 %v6126_v1  ;;  %v966_v55 = vcombine.low %v958_v42, %v965_v43  ;;  %v975_v56 = vrot.slane %v967_v44, %v6264_v17  ;;  %v603_v57 = vrot.slane %v384_v39, %v6264_v17  ;;  %v985_v58 = vcombine.low %v571_v47, %v579_v45  ;;  %v6081_v38 = vld.sshfl [vmem:[%s6261_s19 + $0x88] sm:$0x3 pattern:$0x76325410]  ;;  %v391_v42 = vld [vmem:[%s6261_s19 + $0x98] sm:$0xff] }
  0x2c   : > { %5723 = vmatpush3.msra.mxu0 %v843_v54  ;;  %v587_v54 = vcombine.high %v579_v45, %v579_v45  ;;  %v588_v59 = vcombine.high %v586_v49, %v586_v49  ;;  %v610_v60 = vrot.slane %v596_v50, %v6264_v17  ;;  %v992_v0 = vrot.slane %v984_v53, %v6264_v17 }
  0x2d   : > { %5724 = vmatprep.subr.mxu0 %v6126_v1  ;;  %v983_v63 = vcombine.low %v975_v56, %v982_v52  ;;  %v611_v3 = vcombine.high %v603_v57, %v603_v57  ;;  %v999_v4 = vrot.slane %v985_v58, %v6264_v17  ;;  %v637_v14 = vcombine.high %v387_v8, %v387_v8 }
  0x2e   : > { %5725 = vmatpush3.msra.mxu0 %v842_v61  ;;  %v613_v61 = vcombine.high %v385_v51, %v385_v51  ;;  %v1001_v2 = vcombine.low %v587_v54, %v586_v49  ;;  %v1002_v5 = vcombine.low %v588_v59, %v6079_v48  ;;  %v612_v6 = vcombine.high %v610_v60, %v610_v60  ;;  %v393_v54 = vld [vmem:[%s6261_s19 + $0xa8] sm:$0xff] }
  0x2f   : > { %5727 = vmatmul.mubr.f32.vlgmr.msra.gmra.mxu0 %v881_v62  ;;  %v620_v62 = vrot.slane %v385_v51, %v6264_v17  ;;  %v1018_v12 = vcombine.low %v603_v57, %v611_v3  ;;  %v644_v15 = vrot.slane %v387_v8, %v6264_v17  ;;  %v1000_v16 = vcombine.low %v992_v0, %v999_v4 }
  0x30   : > { %5729 = vmatprep.mubr.msk.f32.mxu0 %vm6127_vm0, %v6126_v1  ;;  %v627_v7 = vrot.slane %v613_v61, %v6264_v17  ;;  %v1009_v11 = vrot.slane %v1001_v2, %v6264_v17  ;;  %v1016_v18 = vrot.slane %v1002_v5, %v6264_v17  ;;  %v651_v23 = vrot.slane %v637_v14, %v6264_v17 }
  0x31   : > { %v628_v10 = vcombine.high %v620_v62, %v620_v62  ;;  %v652_v24 = vcombine.high %v644_v15, %v644_v15  ;;  %v654_v25 = vcombine.high %v388_v21, %v388_v21  ;;  %v661_v26 = vrot.slane %v388_v21, %v6264_v17 }
  0x32   : > { %v629_v20 = vcombine.high %v627_v7, %v627_v7  ;;  %v1017_v27 = vcombine.low %v1009_v11, %v1016_v18  ;;  %v1026_v28 = vrot.slane %v1018_v12, %v6264_v17  ;;  %v685_v41 = vrot.slane %v390_v31, %v6264_v17 }
  0x33   : > { %5730 = vmatmul.mubr.f32.gmra.mxu0 %v898_v13  ;;  %v6080_v13 = vld.sshfl [vmem:[%s6261_s19 + $0x70] sm:$0x3 pattern:$0x76325410]  ;;  %v1035_v22 = vcombine.low %v620_v62, %v628_v10  ;;  %v1053_v34 = vcombine.low %v652_v24, %v651_v23  ;;  %v668_v36 = vrot.slane %v654_v25, %v6264_v17  ;;  %v669_v37 = vcombine.high %v661_v26, %v661_v26 }
  0x34   : > { %5732 = vmatprep.mubr.msk.f32.mxu0 %vm6127_vm0, %v6126_v1  ;;  %v1036_v30 = vcombine.low %v627_v7, %v629_v20  ;;  %v1052_v33 = vcombine.low %v6080_v13, %v644_v15  ;;  %v678_v43 = vcombine.high %v390_v31, %v390_v31  ;;  %v702_v49 = vrot.slane %v391_v42, %v6264_v17  ;;  %v396_v13 = vld [vmem:[%s6261_s19 + $0xc0] sm:$0xff]  ;;  %v6083_v20 = vld.sshfl [vmem:[%s6261_s19 + $0xb8] sm:$0x3 pattern:$0x76325410] }
  0x35   : > { %v1043_v32 = vrot.slane %v1035_v22, %v6264_v17  ;;  %v670_v45 = vcombine.high %v668_v36, %v668_v36  ;;  %v1070_v48 = vcombine.low %v669_v37, %v668_v36  ;;  %v693_v51 = vcombine.high %v685_v41, %v685_v41 }
  0x36   : > { %v1050_v40 = vrot.slane %v1036_v30, %v6264_v17  ;;  %v1060_v44 = vrot.slane %v1052_v33, %v6264_v17  ;;  %v692_v52 = vrot.slane %v678_v43, %v6264_v17  ;;  %v695_v53 = vcombine.high %v391_v42, %v391_v42 }
  0x37   : > { %5733 = vmatmul.mubr.f32.gmra.mxu0 %v915_v19  ;;  %v1019_v19 = vcombine.low %v610_v60, %v612_v6  ;;  %v1084_v58 = vrot.slane %v1070_v48, %v6264_v17  ;;  %v710_v59 = vcombine.high %v702_v49, %v702_v49  ;;  %v394_v60 = vld [vmem:[%s6261_s19 + $0xb0] sm:$0xff]  ;;  %v1087_v61 = vcombine.low %v685_v41, %v693_v51 }
  0x38   : > { %5735 = vmatprep.mubr.msk.f32.mxu0 %vm6127_vm0, %v6126_v1  ;;  %v1051_v50 = vcombine.low %v1043_v32, %v1050_v40  ;;  %v694_v62 = vcombine.high %v692_v52, %v692_v52  ;;  %v709_v0 = vrot.slane %v695_v53, %v6264_v17  ;;  %v719_v2 = vcombine.high %v393_v54, %v393_v54  ;;  %v6084_v53 = vld.sshfl [vmem:[%s6261_s19 + $0xd0] sm:$0x3 pattern:$0x76325410] }
  0x39   : > { %v1033_v29 = vrot.slane %v1019_v19, %v6264_v17  ;;  %v736_v4 = vcombine.high %v394_v60, %v394_v60  ;;  %v1104_v6 = vcombine.low %v702_v49, %v710_v59  ;;  %v726_v7 = vrot.slane %v393_v54, %v6264_v17 }
  0x3a   : > { %v1101_v8 = vrot.slane %v1087_v61, %v6264_v17  ;;  %v1103_v10 = vcombine.low %v692_v52, %v694_v62  ;;  %v711_v11 = vcombine.high %v709_v0, %v709_v0  ;;  %v733_v12 = vrot.slane %v719_v2, %v6264_v17 }
  0x3b   : > { %5736 = vmatmul.mubr.f32.gmra.mxu0 %v932_v35  ;;  %v653_v35 = vcombine.high %v651_v23, %v651_v23  ;;  %v1034_v39 = vcombine.low %v1026_v28, %v1033_v29  ;;  %v743_v14 = vrot.slane %v394_v60, %v6264_v17  ;;  %v750_v15 = vrot.slane %v736_v4, %v6264_v17 }
  0x3c   : > { %5738 = vmatprep.mubr.msk.f32.mxu0 %vm6127_vm0, %v6126_v1  ;;  %v734_v19 = vcombine.high %v726_v7, %v726_v7  ;;  %v760_v21 = vcombine.high %v396_v13, %v396_v13  ;;  %v1111_v23 = vrot.slane %v1103_v10, %v6264_v17  ;;  %v1120_v24 = vcombine.low %v709_v0, %v711_v11  ;;  %v2659_v0 = vld [vmem:[%s9334_s3 + $0xe0] sm:$0xff]  ;;  %v2642_v11 = vld [vmem:[%s9334_s3 + $0x58] sm:$0xff] }
  0x3d   : > { %v1069_v47 = vcombine.low %v653_v35, %v661_v26  ;;  %v735_v25 = vcombine.high %v733_v12, %v733_v12  ;;  %v397_v26 = vld [vmem:[%s6261_s19 + $0xc8] sm:$0xff]  ;;  %v752_v28 = vcombine.high %v750_v15, %v750_v15  ;;  %v767_v30 = vrot.slane %v396_v13, %v6264_v17  ;;  %4964 = vmatprep.subr.mxu1 %v2659_v0  ;;  %v2702_v0 = vld [vmem:[%s9334_s3 + $0x238] sm:$0xff] }
  0x3e   : > { %v774_v31 = vrot.slane %v760_v21, %v6264_v17  ;;  %v777_v32 = vcombine.high %v397_v26, %v397_v26  ;;  %v1137_v35 = vcombine.low %v734_v19, %v733_v12  ;;  %v2710_v12 = vld [vmem:[%s9334_s3 + $0x278] sm:$0xff] }
  0x3f   : > { %5739 = vmatmul.mubr.f32.gmra.mxu0 %v949_v46  ;;  %v1067_v46 = vrot.slane %v1053_v34, %v6264_v17  ;;  %v1077_v57 = vrot.slane %v1069_v47, %v6264_v17  ;;  %v1128_v34 = vrot.slane %v1120_v24, %v6264_v17  ;;  %v1138_v36 = vcombine.low %v735_v25, %v743_v14  ;;  %v2656_v24 = vld [vmem:[%s9334_s3 + $0xc8] sm:$0xff] }
  0x40   : > { %5741 = vmatprep.mubr.msk.f32.mxu0 %vm6127_vm0, %v6126_v1  ;;  %v775_v40 = vcombine.high %v767_v30, %v767_v30  ;;  %v776_v41 = vcombine.high %v774_v31, %v774_v31  ;;  %v791_v42 = vrot.slane %v777_v32, %v6264_v17  ;;  %v2724_v25 = vld [vmem:[%s9334_s3 + $0x2e8] sm:$0xff] }
  0x41   : > { %v1068_v56 = vcombine.low %v1060_v44, %v1067_v46  ;;  %v1085_v5 = vcombine.low %v1077_v57, %v1084_v58  ;;  %v1145_v44 = vrot.slane %v1137_v35, %v6264_v17  ;;  %v399_v46 = vld [vmem:[%s6261_s19 + $0xd8] sm:$0xff]  ;;  %v400_v57 = vld [vmem:[%s6261_s19 + $0xe0] sm:$0xff] }
  0x42   : > { %v1172_v51 = vcombine.low %v774_v31, %v776_v41  ;;  %v793_v52 = vcombine.high %v791_v42, %v791_v42  ;;  %v801_v54 = vcombine.high %v399_v46, %v399_v46  ;;  %v825_v4 = vrot.slane %v400_v57, %v6264_v17  ;;  %v2723_v35 = vld [vmem:[%s9334_s3 + $0x2e0] sm:$0xff]  ;;  %v2638_v41 = vld [vmem:[%s9334_s3 + $0x38] sm:$0xff] }
  0x43   : > { %5742 = vmatmul.mubr.f32.gmra.mxu0 %v966_v55  ;;  %v1086_v55 = vcombine.low %v670_v45, %v6081_v38  ;;  %v1155_v38 = vcombine.low %v752_v28, %v6083_v20  ;;  %v1152_v45 = vrot.slane %v1138_v36, %v6264_v17  ;;  %v2639_v36 = vld [vmem:[%s9334_s3 + $0x40] sm:$0xff] }
  0x44   : > { %5744 = vmatprep.mubr.msk.f32.mxu0 %vm6127_vm0, %v6126_v1  ;;  %v1186_v61 = vrot.slane %v1172_v51, %v6264_v17  ;;  %v1189_v62 = vcombine.low %v791_v42, %v793_v52  ;;  %v833_v21 = vcombine.high %v825_v4, %v825_v4  ;;  %v2706_v42 = vld [vmem:[%s9334_s3 + $0x258] sm:$0xff]  ;;  %v2720_v51 = vld [vmem:[%s9334_s3 + $0x2c8] sm:$0xff] }
  0x45   : > { %v1094_v3 = vrot.slane %v1086_v55, %v6264_v17  ;;  %v1169_v48 = vrot.slane %v1155_v38, %v6264_v17  ;;  %v1153_v55 = vcombine.low %v1145_v44, %v1152_v45  ;;  %v2654_v38 = vld [vmem:[%s9334_s3 + $0xb8] sm:$0xff] }
  0x47   : > { %5745 = vmatmul.mubr.f32.gmra.mxu0 %v983_v63  ;;  %v6082_v63 = vld.sshfl [vmem:[%s6261_s19 + $0xa0] sm:$0x3 pattern:$0x76325410]  ;;  %v1102_v22 = vcombine.low %v1094_v3, %v1101_v8  ;;  %v818_v3 = vcombine.high %v400_v57, %v400_v57 }
  0x48   : > { %5747 = vmatprep.mubr.msk.f32.mxu0 %vm6127_vm0, %v6126_v1  ;;  %v1121_v18 = vcombine.low %v6082_v63, %v726_v7  ;;  %v815_v63 = vrot.slane %v801_v54, %v6264_v17  ;;  %v2726_v7 = vld [vmem:[%s9334_s3 + $0x2f8] sm:$0xff]  ;;  %v2636_v54 = vld [vmem:[%s9334_s3 + $0x28] sm:$0xff]  ;;  %v2719_v57 = vld [vmem:[%s9334_s3 + $0x2c0] sm:$0xff] }
  0x49   : > { %5118 = vmatprep.subr.mxu0 %v2726_v7  ;;  %v832_v20 = vrot.slane %v818_v3, %v6264_v17  ;;  %v2633_v3 = vld [vmem:[%s9334_s3 + $0x10] sm:$0xff]  ;;  %v2632_v7 = vld [vmem:[%s9334_s3 + $0x8] sm:$0xff] }
  0x4a   : > { %v1135_v29 = vrot.slane %v1121_v18, %v6264_v17  ;;  %5119 = vmatpush3.msra.mxu0 %v2710_v12  ;;  %v2725_v18 = vld [vmem:[%s9334_s3 + $0x2f0] sm:$0xff]  ;;  %v2631_v12 = vld [vmem:[%s9334_s3] sm:$0xff] }
  0x4b   : > { %5748 = vmatmul.mubr.f32.gmra.mxu0 %v1000_v16  ;;  %v1118_v16 = vrot.slane %v1104_v6, %v6264_v17  ;;  %v2658_v6 = vld [vmem:[%s9334_s3 + $0xd8] sm:$0xff]  ;;  %5120 = vmatprep.subr.mxu0 %v2725_v18  ;;  %v1223_v32 = vcombine.low %v833_v21, %v832_v20  ;;  %v2697_v18 = vld [vmem:[%s9334_s3 + $0x210] sm:$0xff]  ;;  %v2711_v21 = vld [vmem:[%s9334_s3 + $0x280] sm:$0xff] }
  0x4c   : > { %5750 = vmatprep.mubr.msk.f32.mxu0 %vm6127_vm0, %v6126_v1  ;;  %v1136_v43 = vcombine.low %v1128_v34, %v1135_v29  ;;  %v2655_v34 = vld [vmem:[%s9334_s3 + $0xc0] sm:$0xff] }
  0x4d   : > { %v1119_v33 = vcombine.low %v1111_v23, %v1118_v16  ;;  %v2657_v16 = vld [vmem:[%s9334_s3 + $0xd0] sm:$0xff]  ;;  %v1237_v45 = vrot.slane %v1223_v32, %v6264_v17 }
  0x4e   : > { %v2709_v23 = vld [vmem:[%s9334_s3 + $0x270] sm:$0xff] }
  0x4f   : > { %5751 = vmatmul.mubr.f32.gmra.mxu0 %v1017_v27  ;;  %v751_v27 = vcombine.high %v743_v14, %v743_v14  ;;  %v1203_v14 = vrot.slane %v1189_v62, %v6264_v17  ;;  %v2718_v62 = vld [vmem:[%s9334_s3 + $0x2b8] sm:$0xff] }
  0x50   : > { %5753 = vmatprep.mubr.msk.f32.mxu0 %vm6127_vm0, %v6126_v1  ;;  %5121 = vmatpush3.msra.mxu0 %v2709_v23  ;;  %v2694_v23 = vld [vmem:[%s9334_s3 + $0x1f8] sm:$0xff] }
  0x51   : > { %v1154_v37 = vcombine.low %v751_v27, %v750_v15  ;;  %v817_v15 = vcombine.high %v815_v63, %v815_v63  ;;  %v2708_v27 = vld [vmem:[%s9334_s3 + $0x268] sm:$0xff]  ;;  %5122 = vmatprep.subr.mxu0 %v2724_v25  ;;  %v6655_v25 = vld [vmem:[%s9333_s2] ss:$0 sm:$0xff] }
  0x52   : > { %5123 = vmatpush3.msra.mxu0 %v2708_v27 }
  0x53   : > { %5754 = vmatmul.mubr.f32.gmra.mxu0 %v1034_v39  ;;  %v784_v39 = vrot.slane %v397_v26, %v6264_v17  ;;  %v1162_v47 = vrot.slane %v1154_v37, %v6264_v17  ;;  %v2640_v26 = vld [vmem:[%s9334_s3 + $0x48] sm:$0xff]  ;;  %v1222_v29 = vcombine.low %v817_v15, %v825_v4  ;;  %v2707_v37 = vld [vmem:[%s9334_s3 + $0x260] sm:$0xff]  ;;  %5124 = vmatprep.subr.mxu0 %v2723_v35  ;;  %v2701_v4 = vld [vmem:[%s9334_s3 + $0x230] sm:$0xff]  ;;  %v6667_v35 = vstv %s6659_s26  ;;  %s9784_s26 = smov (!%p364_p7, %s6659_s26), 15 }
  0x54   : > { %5756 = vmatprep.mubr.msk.f32.mxu0 %vm6127_vm0, %v6126_v1  ;;  %5125 = vmatpush3.msra.mxu0 %v2707_v37  ;;  %v2698_v15 = vld [vmem:[%s9334_s3 + $0x218] sm:$0xff]  ;;  %v6670_v37 = vadd.s32 1, %v6667_v35  ;;  %vm1893_vm1 = vcmp.ge.s32.totalorder %v6667_v35, 1  ;;  %vm1903_vm2 = vcmp.le.s32.totalorder %v6667_v35, 16  ;;  %s4861_s30 = sshll.u32 %s9784_s26, 1 }
  0x55   : > { %v792_v49 = vcombine.high %v784_v39, %v784_v39  ;;  %v1170_v58 = vcombine.low %v1162_v47, %v1169_v48  ;;  %v1230_v44 = vrot.slane %v1222_v29, %v6264_v17  ;;  %v2721_v47 = vld [vmem:[%s9334_s3 + $0x2d0] sm:$0xff]  ;;  %vm6689_vm7 = vmand %vm1893_vm1, %vm1903_vm2  ;;  %s368_s21 = sadd.s32 %s4862_s20, %s4861_s30 }
  0x56   : > { %v2637_v48 = vld [vmem:[%s9334_s3 + $0x30] sm:$0xff]  ;;  %vm1894_vm5 = vcmp.ge.s32.totalorder %v6670_v37, 1  ;;  %vm1904_vm6 = vcmp.le.s32.totalorder %v6670_v37, 16  ;;  %vm6724_vm9 = vmand %vm6689_vm7, %vm9351_vm4  ;;  %s4863_s10 = sshll.u32 %s368_s21, 3 }
  0x57   : > { %5757 = vmatmul.mubr.f32.gmra.mxu0 %v1051_v50  ;;  %v1171_v50 = vcombine.low %v767_v30, %v775_v40  ;;  %v1188_v59 = vcombine.low %v784_v39, %v792_v49  ;;  %v2722_v39 = vld [vmem:[%s9334_s3 + $0x2d8] sm:$0xff]  ;;  %v834_v40 = vcombine.high %v832_v20, %v832_v20  ;;  %v2705_v49 = vld [vmem:[%s9334_s3 + $0x250] sm:$0xff]  ;;  %v1238_v52 = vcombine.low %v1230_v44, %v1237_v45  ;;  %v2696_v20 = vld [vmem:[%s9334_s3 + $0x208] sm:$0xff]  ;;  %s9194_s27 = scalar_lea.vmem %s9340_s9, %s4863_s10 }
  0x58   : > { %5759 = vmatprep.mubr.msk.f32.mxu0 %vm6127_vm0, %v6126_v1  ;;  %5126 = vmatprep.subr.mxu0 %v2722_v39  ;;  %vm6759_vm11 = vmand %vm1894_vm5, %vm1904_vm6 }
  0x59   : > { %v1179_v60 = vrot.slane %v1171_v50, %v6264_v17  ;;  %v1196_v8 = vrot.slane %v1188_v59, %v6264_v17  ;;  %5127 = vmatpush3.msra.mxu0 %v2706_v42  ;;  %v2652_v50 = vld [vmem:[%s9334_s3 + $0xa8] sm:$0xff]  ;;  %v2703_v59 = vld [vmem:[%s9334_s3 + $0x240] sm:$0xff]  ;;  %vm6783_vm14 = vmand %vm6759_vm11, %vm9351_vm4 }
  0x5a   : > { %5128 = vmatprep.subr.mxu0 %v2721_v47 }
  0x5b   : > { %5760 = vmatmul.mubr.f32.gmra.mxu0 %v1068_v56  ;;  %v808_v56 = vrot.slane %v399_v46, %v6264_v17  ;;  %v1187_v13 = vcombine.low %v1179_v60, %v1186_v61  ;;  %v1204_v30 = vcombine.low %v1196_v8, %v1203_v14  ;;  %v2653_v46 = vld [vmem:[%s9334_s3 + $0xb0] sm:$0xff]  ;;  %v2650_v61 = vld [vmem:[%s9334_s3 + $0x98] sm:$0xff]  ;;  %v2700_v8 = vld [vmem:[%s9334_s3 + $0x228] sm:$0xff] }
  0x5c   : > { %5762 = vmatprep.mubr.msk.f32.mxu0 %vm6127_vm0, %v6126_v1  ;;  %5129 = vmatpush3.msra.mxu0 %v2705_v49  ;;  %v2714_v14 = vld [vmem:[%s9334_s3 + $0x298] sm:$0xff] }
  0x5d   : > { %v816_v2 = vcombine.high %v808_v56, %v808_v56  ;;  %v1205_v10 = vcombine.low %v6084_v53, %v808_v56  ;;  %v2651_v56 = vld [vmem:[%s9334_s3 + $0xa0] sm:$0xff]  ;;  %5130 = vmatprep.subr.mxu0 %v2720_v51 }
  0x5f   : > { %5763 = vmatmul.mubr.f32.gmra.mxu0 %v1085_v5  ;;  %v2643_v5 = vld [vmem:[%s9334_s3 + $0x60] sm:$0xff]  ;;  %v1206_v19 = vcombine.low %v816_v2, %v815_v63  ;;  %v1213_v28 = vrot.slane %v1205_v10, %v6264_v17  ;;  %v2634_v63 = vld [vmem:[%s9334_s3 + $0x18] sm:$0xff]  ;;  %v2649_v2 = vld [vmem:[%s9334_s3 + $0x90] sm:$0xff] }
  0x60   : > { %5765 = vmatprep.mubr.msk.f32.mxu0 %vm6127_vm0, %v6126_v1  ;;  %4965 = vmatpush3.msra.mxu1 %v2643_v5  ;;  %v2648_v5 = vld [vmem:[%s9334_s3 + $0x88] sm:$0xff]  ;;  %v2647_v10 = vld [vmem:[%s9334_s3 + $0x80] sm:$0xff] }
  0x61   : > { %4966 = vmatprep.subr.mxu1 %v2658_v6  ;;  %v1220_v31 = vrot.slane %v1206_v19, %v6264_v17  ;;  %v2716_v6 = vld [vmem:[%s9334_s3 + $0x2a8] sm:$0xff] }
  0x62   : > { %4967 = vmatpush3.msra.mxu1 %v2642_v11  ;;  %v2715_v11 = vld [vmem:[%s9334_s3 + $0x2a0] sm:$0xff]  ;;  %v2712_v19 = vld [vmem:[%s9334_s3 + $0x288] sm:$0xff] }
  0x63   : > { %5766 = vmatmul.mubr.f32.gmra.mxu0 %v1102_v22  ;;  %4968 = vmatprep.subr.mxu1 %v2657_v16  ;;  %v2641_v22 = vld [vmem:[%s9334_s3 + $0x50] sm:$0xff] }
  0x64   : > { %5768 = vmatprep.mubr.msk.f32.mxu0 %vm6127_vm0, %v6126_v1  ;;  %4969 = vmatpush3.msra.mxu1 %v2641_v22  ;;  %v2713_v16 = vld [vmem:[%s9334_s3 + $0x290] sm:$0xff]  ;;  %v2695_v22 = vld [vmem:[%s9334_s3 + $0x200] sm:$0xff] }
  0x65   : > { %4970 = vmatprep.subr.mxu1 %v2656_v24  ;;  %v6649_v24 = vld [vmem:[%s9334_s3 + $0x478] sm:$0xff] }
  0x66   : > { %4971 = vmatpush3.msra.mxu1 %v2640_v26 }
  0x67   : > { %5769 = vmatmul.mubr.f32.gmra.mxu0 %v1119_v33  ;;  %v6085_v33 = vld.sshfl [vmem:[%s6261_s19 + $0xe8] sm:$0x3 pattern:$0x76325410]  ;;  %4972 = vmatprep.subr.mxu1 %v2655_v34 }
  0x68   : > { %5771 = vmatprep.mubr.msk.f32.mxu0 %vm6127_vm0, %v6126_v1  ;;  %4973 = vmatpush3.msra.mxu1 %v2639_v36  ;;  %v1239_v53 = vcombine.low %v834_v40, %v6085_v33 }
  0x69   : > { %4974 = vmatprep.subr.mxu1 %v2654_v38 }
  0x6a   : > { %4975 = vmatpush3.msra.mxu1 %v2638_v41  ;;  %v1246_v60 = vrot.slane %v1239_v53, %v6264_v17  ;;  %v6694_v53 = vadd.s32 3, %v6667_v35 }
  0x6b   : > { %5772 = vmatmul.mubr.f32.gmra.mxu0 %v1136_v43  ;;  %v1221_v43 = vcombine.low %v1213_v28, %v1220_v31  ;;  %4976 = vmatprep.subr.mxu1 %v2653_v46  ;;  %v6662_v31 = vadd.s32 16, %v6233_v9 }
  0x6c   : > { %5774 = vmatprep.mubr.msk.f32.mxu0 %vm6127_vm0, %v6126_v1  ;;  %4977 = vmatpush3.msra.mxu1 %v2637_v48  ;;  %v6682_v48 = vadd.s32 2, %v6667_v35  ;;  %vm1896_vm1 = vcmp.ge.s32.totalorder %v6694_v53, 1  ;;  %vm1906_vm2 = vcmp.le.s32.totalorder %v6694_v53, 16 }
  0x6d   : > { %4978 = vmatprep.subr.mxu1 %v2652_v50  ;;  %vm9341_vm3 = vcmp.le.s32.totalorder %v6662_v31, 16 }
  0x6e   : > { %4979 = vmatpush3.msra.mxu1 %v2636_v54  ;;  %vm6710_vm8 = vmand %vm6689_vm7, %vm9341_vm3  ;;  %vm1895_vm12 = vcmp.ge.s32.totalorder %v6682_v48, 1  ;;  %vm1905_vm13 = vcmp.le.s32.totalorder %v6682_v48, 16 }
  0x6f   : > { %5775 = vmatmul.mubr.f32.gmra.mxu0 %v1153_v55  ;;  %v2704_v55 = vld [vmem:[%s9334_s3 + $0x248] sm:$0xff]  ;;  %4980 = vmatprep.subr.mxu1 %v2651_v56  ;;  %vm6850_vm5 = vmand %vm1895_vm12, %vm1905_vm13 }
  0x70   : > { %5777 = vmatprep.mubr.msk.f32.mxu0 %vm6127_vm0, %v6126_v1  ;;  %5131 = vmatpush3.msra.mxu0 %v2704_v55  ;;  %vm6871_vm6 = vmand %vm6850_vm5, %vm9351_vm4 }
  0x71   : > { %5132 = vmatprep.subr.mxu0 %v2719_v57  ;;  %v6698_v57 = vadd.s32 4, %v6667_v35  ;;  %vm6948_vm12 = vmand %vm6850_vm5, %vm9341_vm3 }
  0x72   : > { %5133 = vmatpush3.msra.mxu0 %v2703_v59 }
  0x73   : > { %5778 = vmatmul.mubr.f32.gmra.mxu0 %v1170_v58  ;;  %v2635_v58 = vld [vmem:[%s9334_s3 + $0x20] sm:$0xff]  ;;  %5134 = vmatprep.subr.mxu0 %v2718_v62 }
  0x74   : > { %5780 = vmatprep.mubr.msk.f32.mxu0 %vm6127_vm0, %v6126_v1  ;;  %4981 = vmatpush3.msra.mxu1 %v2635_v58  ;;  %v6701_v58 = vadd.s32 5, %v6667_v35 }
  0x75   : > { %4982 = vmatprep.subr.mxu1 %v2650_v61  ;;  %5135 = vmatpush3.msra.mxu0 %v2702_v0 }
  0x76   : > { %4983 = vmatpush3.msra.mxu1 %v2634_v63 }
  0x77   : > { %5781 = vmatmul.mubr.f32.gmra.mxu0 %v1187_v13  ;;  %4984 = vmatprep.subr.mxu1 %v2649_v2  ;;  %v2699_v13 = vld [vmem:[%s9334_s3 + $0x220] sm:$0xff] }
  0x78   : > { %5783 = vmatprep.mubr.msk.f32.mxu0 %vm6127_vm0, %v6126_v1  ;;  %4985 = vmatpush3.msra.mxu1 %v2633_v3  ;;  %v6715_v3 = vadd.s32 6, %v6667_v35 }
  0x79   : > { %4986 = vmatprep.subr.mxu1 %v2648_v5 }
  0x7a   : > { %4987 = vmatpush3.msra.mxu1 %v2632_v7 }
  0x7b   : > { %5784 = vmatmul.mubr.f32.gmra.mxu0 %v1204_v30  ;;  %4988 = vmatprep.subr.mxu1 %v2647_v10  ;;  %v6731_v10 = vadd.s32 8, %v6667_v35 }
  0x7c   : > { %5786 = vmatprep.mubr.msk.f32.mxu0 %vm6127_vm0, %v6126_v1  ;;  %4989 = vmatpush3.msra.mxu1 %v2631_v12 }
  0x7d   : > { %5038 = vmatprep.subr.mxu1 %v2694_v23 }
  0x7f   : > { %5787 = vmatmul.mubr.f32.gmra.mxu0 %v1221_v43 }
  0x80   : > { %5789 = vmatprep.mubr.msk.f32.mxu0 %vm6127_vm0, %v6126_v1 }
  0x83   : > { %5790 = vmatmul.mubr.f32.gmra.mxu0 %v1238_v52 }
  0x84   : > { %5792 = vmatprep.mubr.msk.f32.mxu0 %vm6127_vm0, %v6126_v1  ;;  %v2717_v1 = vld [vmem:[%s9334_s3 + $0x2b0] sm:$0xff]  ;;  %vm6805_vm0 = vmand %vm6759_vm11, %vm9341_vm3 }
  0x85   : > { %5136 = vmatprep.subr.mxu0 %v2717_v1 }
  0x86   : > { %5137 = vmatpush3.msra.mxu0 %v2701_v4  ;;  %v6718_v4 = vadd.s32 7, %v6667_v35 }
  0x87   : > { %5793 = vmatmul.mubr.f32.gmra.mxu0 %v1246_v60  ;;  %5138 = vmatprep.subr.mxu0 %v2716_v6 }
  0x88   : > { %5139 = vmatpush3.msra.mxu0 %v2700_v8 }
  0x89   : > { %5140 = vmatprep.subr.mxu0 %v2715_v11 }
  0x8a   : > { %5141 = vmatpush3.msra.mxu0 %v2699_v13 }
  0x8b   : > { %5142 = vmatprep.subr.mxu0 %v2714_v14 }
  0x8c   : > { %5143 = vmatpush3.msra.mxu0 %v2698_v15 }
  0x8d   : > { %5144 = vmatprep.subr.mxu0 %v2713_v16 }
  0x8e   : > { %5145 = vmatpush3.msra.mxu0 %v2697_v18 }
  0x8f   : > { %5146 = vmatprep.subr.mxu0 %v2712_v19 }
  0x90   : > { %5147 = vmatpush3.msra.mxu0 %v2696_v20 }
  0x91   : > { %5148 = vmatprep.subr.mxu0 %v2711_v21 }
  0x92   : > { %5149 = vmatpush3.msra.mxu0 %v2695_v22 }
  0x93   : > { %5795 = vmatprep.subr.mxu0 %v6649_v24 }
  0xef   : > { %v1336_v26 = vpop.f32.mrf.mxu0 }
  0xf0   : > { %v1337_v27 = vadd.f32 %v6655_v25, %v1336_v26 }
  0xf1   : > { %v5728_v28 = vpop.f32.mrf.mxu0 }
  0xf2   : > { %v1450_v29 = vmax.f32 %v1337_v27, 0.0 }
  0xf3   : > { %v1341_v30 = vpop.f32.mrf.mxu0 }
  0xf4   : > { %v1496_v32 = vcombine.high %v1450_v29, %v1450_v29  ;;  %v1503_v33 = vrot.slane %v1450_v29, %v6264_v17  ;;  %v1342_v34 = vadd.f32 %v6655_v25, %v1341_v30 }
  0xf5   : > { %v5731_v36 = vpop.f32.mrf.mxu0 }
  0xf6   : > { %v1510_v38 = vrot.slane %v1496_v32, %v6264_v17  ;;  %v1511_v39 = vcombine.high %v1503_v33, %v1503_v33  ;;  %v1451_v40 = vmax.f32 %v1342_v34, 0.0 }
  0xf7   : > { %v1346_v41 = vpop.f32.mrf.mxu0 }
  0xf8   : > { %v1512_v42 = vcombine.high %v1510_v38, %v1510_v38  ;;  %v1989_v43 = vcombine.low %v1503_v33, %v1511_v39  ;;  %v1513_v44 = vcombine.high %v1451_v40, %v1451_v40  ;;  %v1520_v45 = vrot.slane %v1451_v40, %v6264_v17 }
  0xf9   : > { %v1347_v46 = vadd.f32 %v6655_v25, %v1346_v41  ;;  %v5734_v47 = vpop.f32.mrf.mxu0 }
  0xfa   : > { %v1990_v49 = vcombine.low %v1510_v38, %v1512_v42  ;;  %v1527_v50 = vrot.slane %v1513_v44, %v6264_v17  ;;  %v1528_v51 = vcombine.high %v1520_v45, %v1520_v45  ;;  %v1997_v54 = vrot.slane %v1989_v43, %v6264_v17 }
  0xfb   : > { %v1452_v55 = vmax.f32 %v1347_v46, 0.0  ;;  %v1351_v56 = vpop.f32.mrf.mxu0 }
  0xfc   : > { %v2004_v59 = vrot.slane %v1990_v49, %v6264_v17  ;;  %v1529_v60 = vcombine.high %v1527_v50, %v1527_v50  ;;  %v2006_v61 = vcombine.low %v1520_v45, %v1528_v51  ;;  %v1352_v62 = vadd.f32 %v6655_v25, %v1351_v56 }
  0xfd   : > { %v1530_v63 = vcombine.high %v1452_v55, %v1452_v55  ;;  %v1537_v0 = vrot.slane %v1452_v55, %v6264_v17  ;;  %v5737_v1 = vpop.f32.mrf.mxu0 }
  0xfe   : > { %v2007_v5 = vcombine.low %v1527_v50, %v1529_v60  ;;  %v1453_v6 = vmax.f32 %v1352_v62, 0.0  ;;  %v6728_v8 = vcombine.low %v1997_v54, %v2004_v59  ;;  %v2014_v11 = vrot.slane %v2006_v61, %v6264_v17 }
  0xff   : > { %v1544_v12 = vrot.slane %v1530_v63, %v6264_v17  ;;  %v1545_v13 = vcombine.high %v1537_v0, %v1537_v0  ;;  %v2029_v14 = vrot.slane %v1537_v0, %v6264_v17  ;;  %v1356_v15 = vpop.f32.mrf.mxu0  ;;  %v1888_v63 = vadd.s32 9, %v6667_v35 }
 0x100   : > { %v2021_v16 = vrot.slane %v2007_v5, %v6264_v17  ;;  %v1547_v18 = vcombine.high %v1453_v6, %v1453_v6  ;;  %v1554_v19 = vrot.slane %v1453_v6, %v6264_v17  ;;  %v1357_v20 = vadd.f32 %v6655_v25, %v1356_v15 }
 0x101   : > { %v2030_v21 = vcombine.low %v1545_v13, %v1544_v12  ;;  %v6741_v22 = vsel %vm6710_vm8, %v2029_v14, 0.0  ;;  %v1546_v23 = vcombine.high %v1544_v12, %v1544_v12  ;;  %v5740_v26 = vpop.f32.mrf.mxu0  ;;  %v6746_v27 = vsel %vm6724_vm9, %v6728_v8, 0.0 }
 0x102   : > { %v1561_v28 = vrot.slane %v1547_v18, %v6264_v17  ;;  %v1562_v29 = vcombine.high %v1554_v19, %v1554_v19  ;;  %v1454_v30 = vmax.f32 %v1357_v20, 0.0  ;;  %v6749_v32 = vcombine.low %v2014_v11, %v2021_v16 }
 0x103   : > { %v2038_v33 = vrot.slane %v2030_v21, %v6264_v17  ;;  %v2031_v34 = vcombine.low %v1546_v23, %v1554_v19  ;;  %v1361_v36 = vpop.f32.mrf.mxu0  ;;  %v2484_v38 = vrot.slane %v6746_v27, 1  ;;  %v2487_v50 = vrot.slane %v6741_v22, 1  ;;  %v2678_v19 = vld [vmem:[%s9334_s3 + $0x178] sm:$0xff] }
 0x104   : > { %v2047_v40 = vcombine.low %v1562_v29, %v1561_v28  ;;  %v1563_v41 = vcombine.high %v1561_v28, %v1561_v28  ;;  %v1564_v42 = vcombine.high %v1454_v30, %v1454_v30  ;;  %v1571_v43 = vrot.slane %v1454_v30, %v6264_v17 }
 0x105   : > { %v2045_v45 = vrot.slane %v2031_v34, %v6264_v17  ;;  %v1362_v46 = vadd.f32 %v6655_v25, %v1361_v36  ;;  %v5743_v47 = vpop.f32.mrf.mxu0  ;;  %v6768_v49 = vsel %vm6689_vm7, %v6749_v32, 0.0  ;;  %vm1907_vm8 = vcmp.le.s32.totalorder %v6698_v57, 16 }
 0x106   : > { %v2055_v37 = vrot.slane %v2047_v40, %v6264_v17  ;;  %v1578_v51 = vrot.slane %v1564_v42, %v6264_v17  ;;  %v1579_v54 = vcombine.high %v1571_v43, %v1571_v43  ;;  %v2048_v55 = vcombine.low %v1563_v41, %v1571_v43 }
 0x107   : > { %v6775_v56 = vcombine.low %v2038_v33, %v2045_v45  ;;  %v1455_v59 = vmax.f32 %v1362_v46, 0.0  ;;  %v1366_v60 = vpop.f32.mrf.mxu0  ;;  %v2485_v61 = vrot.slane %v6768_v49, 1  ;;  %v2693_v33 = vld [vmem:[%s9334_s3 + $0x1f0] sm:$0xff]  ;;  %v9505_v44 = vrot.slane %v6768_v49, 2 }
 0x108   : > { %v1580_v0 = vcombine.high %v1578_v51, %v1578_v51  ;;  %v2062_v2 = vrot.slane %v2048_v55, %v6264_v17  ;;  %v2070_v1 = vrot.slane %v1579_v54, %v6264_v17  ;;  %v1367_v5 = vadd.f32 %v6655_v25, %v1366_v60  ;;  %v2677_v45 = vld [vmem:[%s9334_s3 + $0x170] sm:$0xff] }
 0x109   : > { %v1581_v6 = vcombine.high %v1455_v59, %v1455_v59  ;;  %v1588_v11 = vrot.slane %v1455_v59, %v6264_v17  ;;  %v2486_v12 = vsel %vm9348_vm10, %v2484_v38, %v2485_v61  ;;  %v5746_v13 = vpop.f32.mrf.mxu0  ;;  %v2488_v14 = vsel %vm9348_vm10, %v2485_v61, %v2487_v50 }
 0x10a   : > { %v6793_v15 = vcombine.low %v2055_v37, %v2062_v2  ;;  %v2071_v16 = vcombine.low %v1578_v51, %v1580_v0  ;;  %v1456_v18 = vmax.f32 %v1367_v5, 0.0  ;;  %2846 = vmatprep.mubr.f32.mxu1 %v2486_v12  ;;  %v2432_v20 = vsel %vm6783_vm14, %v6775_v56, 0.0  ;;  %v2692_v51 = vld [vmem:[%s9334_s3 + $0x1e8] sm:$0xff] }
 0x10b   : > { %v1595_v23 = vrot.slane %v1581_v6, %v6264_v17  ;;  %v1596_v26 = vcombine.high %v1588_v11, %v1588_v11  ;;  %4867 = vmatmul.mubr.msk.f32.vlgmr.msra.gmra.mxu1 %vm6724_vm9, %v6728_v8  ;;  %v1371_v28 = vpop.f32.mrf.mxu0  ;;  %v2489_v29 = vrot.slane %v2432_v20, 1  ;;  %v2546_v30 = vrot.slane %v2432_v20, 2  ;;  %v2676_v0 = vld [vmem:[%s9334_s3 + $0x168] sm:$0xff]  ;;  %vm6927_vm9 = vmand %vm1896_vm1, %vm1906_vm2 }
 0x10c   : > { %v2079_v34 = vrot.slane %v2071_v16, %v6264_v17  ;;  %v1598_v36 = vcombine.high %v1456_v18, %v1456_v18  ;;  %v1605_v38 = vrot.slane %v1456_v18, %v6264_v17  ;;  %2851 = vmatprep.mubr.f32.mxu1 %v2488_v14  ;;  %v1372_v40 = vadd.f32 %v6655_v25, %v1371_v28  ;;  %vm6957_vm13 = vmand %vm6927_vm9, %vm9351_vm4 }
 0x10d   : > { %v1597_v41 = vcombine.high %v1595_v23, %v1595_v23  ;;  %v2072_v42 = vcombine.low %v1588_v11, %v1596_v26  ;;  %v5749_v43 = vpop.f32.mrf.mxu0  ;;  %5039 = vmatpush3.msra.mxu1 %v2678_v19  ;;  %v2433_v7 = vsel %vm6759_vm11, %v6793_v15, 0.0  ;;  %v2434_v8 = vsel %vm6805_vm0, %v2070_v1, 0.0  ;;  %vm7056_vm2 = vmand %vm6927_vm9, %vm9341_vm3 }
 0x10e   : > { %v6828_v46 = vrot.slane %v1598_v36, %v6264_v17  ;;  %v1613_v47 = vcombine.high %v1605_v38, %v1605_v38  ;;  %v1457_v50 = vmax.f32 %v1372_v40, 0.0  ;;  %v2490_v37 = vrot.slane %v2433_v7, 1  ;;  %5040 = vmatprep.subr.mxu1 %v2693_v33 }
 0x10f   : > { %v2086_v54 = vrot.slane %v2072_v42, %v6264_v17  ;;  %v2088_v55 = vcombine.low %v1595_v23, %v1597_v41  ;;  %4868 = vmatmul.mubr.msk.f32.gmra.mxu1 %vm6689_vm7, %v6749_v32  ;;  %v1376_v59 = vpop.f32.mrf.mxu0  ;;  %v2547_v60 = vrot.slane %v2433_v7, 2  ;;  %v2492_v61 = vrot.slane %v2434_v8, 1 }
 0x110   : > { %v2089_v2 = vcombine.low %v1605_v38, %v1613_v47  ;;  %v2111_v1 = vrot.slane %v6828_v46, %v6264_v17  ;;  %v1614_v5 = vcombine.high %v6828_v46, %v6828_v46  ;;  %v1615_v6 = vcombine.high %v1457_v50, %v1457_v50  ;;  %5041 = vmatpush3.msra.mxu1 %v2677_v45 }
 0x111   : > { %v6854_v32 = vcombine.low %v2079_v34, %v2086_v54  ;;  %v2096_v11 = vrot.slane %v2088_v55, %v6264_v17  ;;  %v1622_v12 = vrot.slane %v1457_v50, %v6264_v17  ;;  %v1377_v13 = vadd.f32 %v6655_v25, %v1376_v59  ;;  %v5752_v14 = vpop.f32.mrf.mxu0  ;;  %5042 = vmatprep.subr.mxu1 %v2692_v51 }
 0x112   : > { %v2103_v16 = vrot.slane %v2089_v2, %v6264_v17  ;;  %v1629_v18 = vrot.slane %v1615_v6, %v6264_v17  ;;  %v2491_v48 = vsel %vm9348_vm10, %v2489_v29, %v2490_v37  ;;  %v6863_v19 = vsel %vm9349_vm15, %v2546_v30, %v2547_v60  ;;  %5043 = vmatpush3.msra.mxu1 %v2676_v0  ;;  %v2691_v29 = vld [vmem:[%s9334_s3 + $0x1e0] sm:$0xff]  ;;  %v2773_v0 = vld [vmem:[%s9334_s3 + $0x470] sm:$0xff] }
 0x113   : > { %v1630_v20 = vcombine.high %v1622_v12, %v1622_v12  ;;  %v2112_v21 = vcombine.low %v1614_v5, %v1622_v12  ;;  %v1458_v23 = vmax.f32 %v1377_v13, 0.0  ;;  %2856 = vmatprep.mubr.f32.mxu1 %v2491_v48  ;;  %3136 = vmatprep.mubr.f32.mxu0 %v6863_v19  ;;  %v2493_v26 = vsel %vm9348_vm10, %v2490_v37, %v2492_v61  ;;  %v1381_v28 = vpop.f32.mrf.mxu0  ;;  %v2675_v37 = vld [vmem:[%s9334_s3 + $0x160] sm:$0xff]  ;;  %v2690_v61 = vld [vmem:[%s9334_s3 + $0x1d8] sm:$0xff] }
 0x114   : > { %v6878_v30 = vcombine.low %v2096_v11, %v2103_v16  ;;  %v1631_v34 = vcombine.high %v1629_v18, %v1629_v18  ;;  %4869 = vmatmul.mubr.msk.f32.gmra.mxu1 %vm6783_vm14, %v6775_v56  ;;  %3137 = vmatmul.mubr.f32.vlgmr.msra.gmra.mxu0 %v2491_v48  ;;  %v2549_v36 = vrot.slane %v2434_v8, 2  ;;  %v1382_v38 = vadd.f32 %v6655_v25, %v1381_v28  ;;  %v2674_v11 = vld [vmem:[%s9334_s3 + $0x158] sm:$0xff] }
 0x115   : > { %vm1897_vm7 = vcmp.ge.s32.totalorder %v6698_v57, 1  ;;  %v2113_v40 = vcombine.low %v1630_v20, %v1629_v18  ;;  %v2120_v41 = vrot.slane %v2112_v21, %v6264_v17  ;;  %v1632_v42 = vcombine.high %v1458_v23, %v1458_v23  ;;  %2861 = vmatprep.mubr.f32.mxu1 %v2493_v26  ;;  %v5755_v7 = vpop.f32.mrf.mxu0  ;;  %5044 = vmatprep.subr.mxu1 %v2691_v29  ;;  %v2689_v20 = vld [vmem:[%s9334_s3 + $0x1d0] sm:$0xff] }
 0x116   : > { %v1639_v43 = vrot.slane %v1458_v23, %v6264_v17  ;;  %v6889_v45 = vsel %vm9349_vm15, %v2547_v60, %v2549_v36  ;;  %v1459_v47 = vmax.f32 %v1382_v38, 0.0  ;;  %v2435_v8 = vsel %vm6871_vm6, %v6854_v32, 0.0  ;;  %5796 = vmatpush3.msra.mxu0 %v6649_v24  ;;  %5045 = vmatpush3.msra.mxu1 %v2675_v37  ;;  %v2673_v29 = vld [vmem:[%s9334_s3 + $0x150] sm:$0xff]  ;;  %vm6989_vm0 = vmand %vm1897_vm7, %vm1907_vm8 }
 0x117   : > { %v6897_v50 = vsel %vm6850_vm5, %v6878_v30, 0.0  ;;  %v2127_v51 = vrot.slane %v2113_v40, %v6264_v17  ;;  %v1646_v54 = vrot.slane %v1632_v42, %v6264_v17  ;;  %3141 = vmatprep.mubr.f32.mxu0 %v6889_v45  ;;  %v1386_v60 = vpop.f32.mrf.mxu0  ;;  %v2494_v6 = vrot.slane %v2435_v8, 1  ;;  %5046 = vmatprep.subr.mxu1 %v2690_v61  ;;  %vm7026_vm1 = vmand %vm6989_vm0, %vm9341_vm3 }
 0x118   : > { %v1647_v55 = vcombine.high %v1639_v43, %v1639_v43  ;;  %v2129_v59 = vcombine.low %v1631_v34, %v1639_v43  ;;  %v1649_v2 = vcombine.high %v1459_v47, %v1459_v47  ;;  %v1656_v24 = vrot.slane %v1459_v47, %v6264_v17  ;;  %4870 = vmatmul.mubr.msk.f32.gmra.mxu1 %vm6759_vm11, %v6793_v15 }
 0x119   : > { %3142 = vmatmul.mubr.f32.gmra.mxu0 %v2493_v26  ;;  %v1387_v5 = vadd.f32 %v6655_v25, %v1386_v60  ;;  %v6920_v12 = vcombine.low %v2120_v41, %v2127_v51  ;;  %v1648_v13 = vcombine.high %v1646_v54, %v1646_v54  ;;  %v5758_v18 = vpop.f32.mrf.mxu0  ;;  %v9415_v48 = vmov 0  ;;  %5797 = vmatprep.subr.mxu0 %v2773_v0 }
 0x11a   : > { %v2130_v14 = vcombine.low %v1647_v55, %v1646_v54  ;;  %v2137_v16 = vrot.slane %v2129_v59, %v6264_v17  ;;  %v9416_v48 = vsel %vm6927_vm9, 4294967295, %v9415_v48  ;;  %v1663_v21 = vrot.slane %v1649_v2, %v6264_v17  ;;  %5047 = vmatpush3.msra.mxu1 %v2674_v11  ;;  %5798 = vmatpush3.msra.mxu0 %v2773_v0  ;;  %v2688_v59 = vld [vmem:[%s9334_s3 + $0x1c8] sm:$0xff]  ;;  %v2687_v18 = vld [vmem:[%s9334_s3 + $0x1c0] sm:$0xff] }
 0x11b   : > { %9417 = vst [vmem:[#allocation2_spill] sm:$0xff] %v9416_v48  ;;  %v1664_v23 = vcombine.high %v1656_v24, %v1656_v24  ;;  %v1460_v26 = vmax.f32 %v1387_v5, 0.0  ;;  %v2495_v28 = vrot.slane %v6897_v50, 1  ;;  %v6941_v34 = vrot.slane %v1648_v13, %v6264_v17  ;;  %v1391_v40 = vpop.f32.mrf.mxu0  ;;  %5048 = vmatprep.subr.mxu1 %v2689_v20  ;;  %v6982_v5 = vld [vmem:[%s9334_s3 + $0x468] sm:$0xff] }
 0x11c   : > { %v2144_v53 = vrot.slane %v2130_v14, %v6264_v17  ;;  %v2551_v36 = vrot.slane %v2435_v8, 2  ;;  %v2552_v38 = vrot.slane %v6897_v50, 2  ;;  %v1665_v42 = vcombine.high %v1663_v21, %v1663_v21  ;;  %5049 = vmatpush3.msra.mxu1 %v2673_v29  ;;  %5799 = vmatprep.subr.mxu0 %v6982_v5  ;;  %v3862_v8 = vld [vmem:[%s9338_s7 + $0xf8] sm:$0xff] }
 0x11d   : > { %v2153_v43 = vcombine.low %v1656_v24, %v1664_v23  ;;  %v1666_v7 = vcombine.high %v1460_v26, %v1460_v26  ;;  %v1673_v47 = vrot.slane %v1460_v26, %v6264_v17  ;;  %v6964_v37 = vsel %vm9348_vm10, %v2494_v6, %v2495_v28  ;;  %v5761_v55 = vpop.f32.mrf.mxu0  ;;  %v2672_v24 = vld [vmem:[%s9334_s3 + $0x148] sm:$0xff]  ;;  %5050 = vmatprep.subr.mxu1 %v2688_v59 }
 0x11e   : > { %v6961_v50 = vcombine.low %v2137_v16, %v2144_v53  ;;  %9422 = vst [vmem:[#allocation3_spill] sm:$0xff] %v6964_v37  ;;  %v6967_v51 = vsel %vm9349_vm15, %v2551_v36, %v2552_v38  ;;  %v1392_v54 = vadd.f32 %v6655_v25, %v1391_v40  ;;  %v2154_v60 = vcombine.low %v1663_v21, %v1665_v42 }
 0x11f   : > { %v2161_v61 = vrot.slane %v2153_v43, %v6264_v17  ;;  %v1680_v0 = vrot.slane %v1666_v7, %v6264_v17  ;;  %v1681_v2 = vcombine.high %v1673_v47, %v1673_v47  ;;  %2866 = vmatprep.mubr.f32.mxu1 %v6964_v37  ;;  %3146 = vmatprep.mubr.f32.mxu0 %v6967_v51  ;;  %v9423_v11 = vmov 0  ;;  %v1396_v14 = vpop.f32.mrf.mxu0 }
 0x120   : > { %v1461_v6 = vmax.f32 %v1392_v54, 0.0  ;;  %v9424_v11 = vsel %vm6989_vm0, 4294967295, %v9423_v11  ;;  %4871 = vmatmul.mubr.msk.f32.gmra.mxu1 %vm6871_vm6, %v6854_v32  ;;  %v2437_v13 = vsel %vm6948_vm12, %v2111_v1, 0.0  ;;  %v7004_v16 = vsel %vm6957_vm13, %v6920_v12, 0.0  ;;  %3147 = vmatmul.mubr.f32.gmra.mxu0 %v6964_v37  ;;  %vm7102_vm12 = vmand %vm6989_vm0, %vm9351_vm4 }
 0x121   : > { %9425 = vst [vmem:[#allocation4_spill] sm:$0xff] %v9424_v11  ;;  %v7009_v57 = vsel %vm6927_vm9, %v6961_v50, 0.0  ;;  %v2168_v46 = vrot.slane %v2154_v60, %v6264_v17  ;;  %v1682_v20 = vcombine.high %v1680_v0, %v1680_v0  ;;  %v2170_v21 = vcombine.low %v1673_v47, %v1681_v2  ;;  %v5764_v36 = vpop.f32.mrf.mxu0  ;;  %5051 = vmatpush3.msra.mxu1 %v2672_v24  ;;  %v2671_v47 = vld [vmem:[%s9334_s3 + $0x140] sm:$0xff] }
 0x122   : > { %v2497_v1 = vrot.slane %v2437_v13, 1  ;;  %v1683_v23 = vcombine.high %v1461_v6, %v1461_v6  ;;  %v1690_v26 = vrot.slane %v1461_v6, %v6264_v17  ;;  %v2554_v29 = vrot.slane %v2437_v13, 2  ;;  %5052 = vmatprep.subr.mxu1 %v2687_v18  ;;  %v2670_v13 = vld [vmem:[%s9334_s3 + $0x138] sm:$0xff]  ;;  %5800 = vmatpush3.msra.mxu0 %v6982_v5 }
 0x123   : > { %v1397_v53 = vadd.f32 %v6655_v25, %v1396_v14  ;;  %v7019_v40 = vcombine.low %v2161_v61, %v2168_v46  ;;  %v2171_v41 = vcombine.low %v1680_v0, %v1682_v20  ;;  %v2178_v42 = vrot.slane %v2170_v21, %v6264_v17  ;;  %v1401_v61 = vpop.f32.mrf.mxu0  ;;  %5053 = vmatpush3.msra.mxu1 %v2671_v47 }
 0x124   : > { %v7031_v7 = vsel %vm9348_vm10, %v2495_v28, %v2497_v1  ;;  %v1697_v54 = vrot.slane %v1683_v23, %v6264_v17  ;;  %v1698_v55 = vcombine.high %v1690_v26, %v1690_v26  ;;  %v2193_v59 = vrot.slane %v1690_v26, %v6264_v17  ;;  %v2686_v28 = vld [vmem:[%s9334_s3 + $0x1b8] sm:$0xff]  ;;  %v2685_v1 = vld [vmem:[%s9334_s3 + $0x1b0] sm:$0xff] }
 0x125   : > { %9428 = vst [vmem:[#allocation5_spill] sm:$0xff] %v7031_v7  ;;  %2871 = vmatprep.mubr.f32.mxu1 %v7031_v7  ;;  %v7040_v60 = vsel %vm9349_vm15, %v2552_v38, %v2554_v29  ;;  %v2185_v0 = vrot.slane %v2171_v41, %v6264_v17  ;;  %v1462_v2 = vmax.f32 %v1397_v53, 0.0  ;;  %v2499_v24 = vrot.slane %v7004_v16, 1  ;;  %v5767_v21 = vpop.f32.mrf.mxu0  ;;  %5054 = vmatprep.subr.mxu1 %v2686_v28 }
 0x126   : > { %3151 = vmatprep.mubr.f32.mxu0 %v7040_v60  ;;  %4872 = vmatmul.mubr.msk.f32.gmra.mxu1 %vm6850_vm5, %v6878_v30  ;;  %v2500_v6 = vrot.slane %v7009_v57, 1  ;;  %v2194_v14 = vcombine.low %v1698_v55, %v1697_v54  ;;  %v7065_v18 = vsel %vm7026_vm1, %v2193_v59, 0.0  ;;  %v1699_v46 = vcombine.high %v1697_v54, %v1697_v54 }
 0x127   : > { %3152 = vmatmul.mubr.f32.gmra.mxu0 %v7031_v7  ;;  %v2556_v20 = vrot.slane %v7004_v16, 2  ;;  %vm1898_vm7 = vcmp.ge.s32.totalorder %v6701_v58, 1  ;;  %vm1908_vm8 = vcmp.le.s32.totalorder %v6701_v58, 16  ;;  %v7074_v23 = vcombine.low %v2178_v42, %v2185_v0  ;;  %v2669_v16 = vld [vmem:[%s9334_s3 + $0x130] sm:$0xff]  ;;  %v1406_v47 = vpop.f32.mrf.mxu0  ;;  %5055 = vmatpush3.msra.mxu1 %v2670_v13 }
 0x128   : > { %v1700_v26 = vcombine.high %v1462_v2, %v1462_v2  ;;  %v1707_v29 = vrot.slane %v1462_v2, %v6264_v17  ;;  %v7078_v53 = vsel %vm9348_vm10, %v2499_v24, %v2500_v6  ;;  %v2202_v36 = vrot.slane %v2194_v14, %v6264_v17  ;;  %5056 = vmatprep.subr.mxu1 %v2685_v1  ;;  %vm7171_vm3 = vmand %vm1898_vm7, %vm1908_vm8  ;;  %v2681_v58 = vld [vmem:[%s9334_s3 + $0x190] sm:$0xff] }
 0x129   : > { %9431 = vst [vmem:[#allocation6_spill] sm:$0xff] %v7074_v23  ;;  %9432 = vst [vmem:[#allocation7_spill] sm:$0xff] %v7078_v53  ;;  %2876 = vmatprep.mubr.f32.mxu1 %v7078_v53  ;;  %v2557_v41 = vrot.slane %v7009_v57, 2  ;;  %v1402_v42 = vadd.f32 %v6655_v25, %v1401_v61  ;;  %v2440_v43 = vsel %vm7056_vm2, %v6941_v34, 0.0  ;;  %v1407_v2 = vadd.f32 %v6655_v25, %v1406_v47  ;;  %v5770_v34 = vpop.f32.mrf.mxu0 }
 0x12a   : > { %v1714_v54 = vrot.slane %v1700_v26, %v6264_v17  ;;  %v1715_v55 = vcombine.high %v1707_v29, %v1707_v29  ;;  %v2195_v59 = vcombine.low %v1699_v46, %v1707_v29  ;;  %4873 = vmatmul.mubr.msk.f32.gmra.mxu1 %vm6957_vm13, %v6920_v12  ;;  %v2502_v28 = vrot.slane %v2440_v43, 1  ;;  %vm7197_vm7 = vmand %vm7171_vm3, %vm9351_vm4 }
 0x12b   : > { %v7095_v57 = vsel %vm9349_vm15, %v2556_v20, %v2557_v41  ;;  %v1463_v61 = vmax.f32 %v1402_v42, 0.0  ;;  %v2559_v0 = vrot.slane %v2440_v43, 2  ;;  %v9433_v24 = vmov 0  ;;  %5057 = vmatpush3.msra.mxu1 %v2669_v16  ;;  %v2684_v20 = vld [vmem:[%s9334_s3 + $0x1a8] sm:$0xff]  ;;  %v1411_v29 = vpop.f32.mrf.mxu0  ;;  %v2771_v16 = vld [vmem:[%s9334_s3 + $0x460] sm:$0xff] }
 0x12c   : > { %v9434_v24 = vsel %vm7102_vm12, 4294967295, %v9433_v24  ;;  %vm1899_vm1 = vcmp.ge.s32.totalorder %v6715_v3, 1  ;;  %vm1909_vm2 = vcmp.le.s32.totalorder %v6715_v3, 16  ;;  %v2209_v38 = vrot.slane %v2195_v59, %v6264_v17  ;;  %3156 = vmatprep.mubr.f32.mxu0 %v7095_v57  ;;  %5058 = vmatprep.subr.mxu1 %v2684_v20 }
 0x12d   : > { %9435 = vst [vmem:[#allocation8_spill] sm:$0xff] %v9434_v24  ;;  %v2211_v13 = vcombine.low %v1715_v55, %v1714_v54  ;;  %v1716_v14 = vcombine.high %v1714_v54, %v1714_v54  ;;  %v7112_v46 = vsel %vm9348_vm10, %v2500_v6, %v2502_v28  ;;  %v1717_v21 = vcombine.high %v1463_v61, %v1463_v61  ;;  %v2668_v6 = vld [vmem:[%s9334_s3 + $0x128] sm:$0xff]  ;;  %v5773_v28 = vpop.f32.mrf.mxu0  ;;  %vm7212_vm8 = vmand %vm1899_vm1, %vm1909_vm2 }
 0x12e   : > { %9436 = vst [vmem:[#allocation9_spill] sm:$0xff] %v7112_v46  ;;  %v1724_v1 = vrot.slane %v1463_v61, %v6264_v17  ;;  %3157 = vmatmul.mubr.f32.gmra.mxu0 %v7078_v53  ;;  %2881 = vmatprep.mubr.f32.mxu1 %v7112_v46  ;;  %v7121_v5 = vsel %vm9349_vm15, %v2557_v41, %v2559_v0  ;;  %v1464_v26 = vmax.f32 %v1407_v2, 0.0  ;;  %v7140_v47 = vsel %vm7102_vm12, %v7019_v40, 0.0  ;;  %v2683_v61 = vld [vmem:[%s9334_s3 + $0x1a0] sm:$0xff] }
 0x12f   : > { %v7129_v42 = vcombine.low %v2202_v36, %v2209_v38  ;;  %v2219_v43 = vrot.slane %v2211_v13, %v6264_v17  ;;  %3161 = vmatprep.mubr.f32.mxu0 %v7121_v5  ;;  %4874 = vmatmul.mubr.msk.f32.gmra.mxu1 %vm6927_vm9, %v6961_v50  ;;  %v1412_v41 = vadd.f32 %v6655_v25, %v1411_v29  ;;  %v2442_v34 = vsel %vm6989_vm0, %v7074_v23, 0.0  ;;  %v2667_v13 = vld [vmem:[%s9334_s3 + $0x120] sm:$0xff]  ;;  %v1416_v29 = vpop.f32.mrf.mxu0 }
 0x130   : > { %v1731_v54 = vrot.slane %v1717_v21, %v6264_v17  ;;  %v1732_v55 = vcombine.high %v1724_v1, %v1724_v1  ;;  %v2212_v36 = vcombine.low %v1716_v14, %v1724_v1  ;;  %v1734_v59 = vcombine.high %v1464_v26, %v1464_v26  ;;  %5059 = vmatpush3.msra.mxu1 %v2668_v6  ;;  %v2770_v14 = vld [vmem:[%s9334_s3 + $0x458] sm:$0xff] }
 0x131   : > { %9437 = vst [vmem:[#allocation10_spill] sm:$0xff] %v7129_v42  ;;  %v1741_v0 = vrot.slane %v1464_v26, %v6264_v17  ;;  %v1465_v2 = vmax.f32 %v1412_v41, 0.0  ;;  %v2504_v38 = vrot.slane %v7140_v47, 1  ;;  %5801 = vmatprep.subr.mxu0 %v2771_v16  ;;  %v2682_v6 = vld [vmem:[%s9334_s3 + $0x198] sm:$0xff]  ;;  %v2505_v62 = vrot.slane %v2442_v34, 1  ;;  %5060 = vmatprep.subr.mxu1 %v2683_v61  ;;  %v5776_v7 = vpop.f32.mrf.mxu0 }
 0x132   : > { %v1733_v20 = vcombine.high %v1731_v54, %v1731_v54  ;;  %v2226_v21 = vrot.slane %v2212_v36, %v6264_v17  ;;  %v7159_v1 = vrot.slane %v1732_v55, %v6264_v17  ;;  %v1748_v26 = vrot.slane %v1734_v59, %v6264_v17  ;;  %3162 = vmatmul.mubr.f32.gmra.mxu0 %v7112_v46  ;;  %v2666_v36 = vld [vmem:[%s9334_s3 + $0x118] sm:$0xff] }
 0x133   : > { %v1749_v41 = vcombine.high %v1741_v0, %v1741_v0  ;;  %v1751_v28 = vcombine.high %v1465_v2, %v1465_v2  ;;  %v1758_v39 = vrot.slane %v1465_v2, %v6264_v17  ;;  %v9438_v55 = vmov 0  ;;  %5802 = vmatpush3.msra.mxu0 %v2771_v16  ;;  %5061 = vmatpush3.msra.mxu1 %v2667_v13  ;;  %v1421_v13 = vpop.f32.mrf.mxu0 }
 0x134   : > { %v9439_v55 = vsel %vm7171_vm3, 4294967295, %v9438_v55  ;;  %v7178_v59 = vcombine.low %v2219_v43, %v2226_v21  ;;  %v2235_v46 = vcombine.low %v1731_v54, %v1733_v20  ;;  %v1750_v53 = vcombine.high %v1748_v26, %v1748_v26  ;;  %5803 = vmatprep.subr.mxu0 %v2770_v14  ;;  %5062 = vmatprep.subr.mxu1 %v2682_v6 }
 0x135   : > { %9440 = vst [vmem:[#allocation11_spill] sm:$0xff] %v9439_v55  ;;  %v2561_v2 = vrot.slane %v7140_v47, 2  ;;  %v2236_v37 = vcombine.low %v1741_v0, %v1749_v41  ;;  %v7185_v61 = vrot.slane %v1751_v28, %v6264_v17  ;;  %v1766_v48 = vcombine.high %v1758_v39, %v1758_v39  ;;  %5063 = vmatpush3.msra.mxu1 %v2666_v36  ;;  %v5779_v3 = vpop.f32.mrf.mxu0  ;;  %v2680_v28 = vld [vmem:[%s9334_s3 + $0x188] sm:$0xff] }
 0x136   : > { %9441 = vst [vmem:[#allocation12_spill] sm:$0xff] %v7178_v59  ;;  %v7188_v16 = vsel %vm9348_vm10, %v2504_v38, %v2505_v62  ;;  %v2243_v43 = vrot.slane %v2235_v46, %v6264_v17  ;;  %v2252_v54 = vcombine.low %v1748_v26, %v1750_v53  ;;  %v2562_v7 = vrot.slane %v2442_v34, 2  ;;  %5064 = vmatprep.subr.mxu1 %v2681_v58  ;;  %v3845_v34 = vld [vmem:[%s9338_s7 + $0x70] sm:$0xff] }
 0x137   : > { %9442 = vst [vmem:[#allocation13_spill] sm:$0xff] %v7188_v16  ;;  %2886 = vmatprep.mubr.f32.mxu1 %v7188_v16  ;;  %v2507_v47 = vrot.slane %v7065_v18, 1  ;;  %v9443_v0 = vmov 0  ;;  %v2250_v38 = vrot.slane %v2236_v37, %v6264_v17  ;;  %v2253_v20 = vcombine.low %v1758_v39, %v1766_v48  ;;  %v2665_v39 = vld [vmem:[%s9334_s3 + $0x110] sm:$0xff]  ;;  %5804 = vmatpush3.msra.mxu0 %v2770_v14 }
 0x138   : > { %v9444_v0 = vsel %vm7197_vm7, 4294967295, %v9443_v0  ;;  %4875 = vmatmul.mubr.msk.f32.gmra.mxu1 %vm7102_vm12, %v7019_v40  ;;  %v2564_v46 = vrot.slane %v7065_v18, 2  ;;  %v2260_v48 = vrot.slane %v2252_v54, %v6264_v17  ;;  %v7221_v37 = vsel %vm9349_vm15, %v2561_v2, %v2562_v7  ;;  %v1426_v54 = vpop.f32.mrf.mxu0 }
 0x139   : > { %9445 = vst [vmem:[#allocation14_spill] sm:$0xff] %v9444_v0  ;;  %v7224_v18 = vsel %vm9348_vm10, %v2505_v62, %v2507_v47  ;;  %v1417_v21 = vadd.f32 %v6655_v25, %v1416_v29  ;;  %v7227_v26 = vcombine.low %v2243_v43, %v2250_v38  ;;  %v2267_v6 = vrot.slane %v2253_v20, %v6264_v17  ;;  %v2769_v29 = vld [vmem:[%s9334_s3 + $0x450] sm:$0xff]  ;;  %v2664_v47 = vld [vmem:[%s9334_s3 + $0x108] sm:$0xff] }
 0x13a   : > { %9448 = vst [vmem:[#allocation15_spill] sm:$0xff] %v7224_v18  ;;  %3166 = vmatprep.mubr.f32.mxu0 %v7221_v37  ;;  %2891 = vmatprep.mubr.f32.mxu1 %v7224_v18  ;;  %v7233_v41 = vsel %vm9349_vm15, %v2562_v7, %v2564_v46  ;;  %v2444_v62 = vsel %vm7197_vm7, %v7129_v42, 0.0  ;;  %vm9450_vm1 = vcmp.le.s32.totalorder %v6662_v31, 16  ;;  %vm1910_vm15 = vcmp.le.s32.totalorder %v6718_v4, 16 }
 0x13b   : > { %9449 = vst [vmem:[#allocation16_spill] sm:$0xff] %v7227_v26  ;;  %vm7242_vm2 = vmand %vm7171_vm3, %vm9450_vm1  ;;  %3167 = vmatmul.mubr.f32.gmra.mxu0 %v7188_v16  ;;  %v1466_v36 = vmax.f32 %v1417_v21, 0.0  ;;  %v1767_v2 = vcombine.high %v7185_v61, %v7185_v61  ;;  %v1422_v58 = vadd.f32 %v6655_v25, %v1421_v13  ;;  %v2445_v43 = vsel %vm7171_vm3, %v7178_v59, 0.0  ;;  %5065 = vmatpush3.msra.mxu1 %v2665_v39  ;;  %v5782_v16 = vpop.f32.mrf.mxu0 }
 0x13c   : > { %vm7265_vm1 = vmand %vm7212_vm8, %vm9351_vm4  ;;  %v9453_v7 = vmov 0  ;;  %v7272_v38 = vcombine.low %v2260_v48, %v2267_v6  ;;  %3171 = vmatprep.mubr.f32.mxu0 %v7233_v41  ;;  %4876 = vmatmul.mubr.msk.f32.gmra.mxu1 %vm6989_vm0, %v7074_v23  ;;  %v2509_v13 = vrot.slane %v2444_v62, 1  ;;  %v2510_v20 = vrot.slane %v2445_v43, 1  ;;  %v2768_v48 = vld [vmem:[%s9334_s3 + $0x448] sm:$0xff] }
 0x13d   : > { %v9454_v7 = vsel %vm7265_vm1, 4294967295, %v9453_v7  ;;  %v2566_v46 = vrot.slane %v2444_v62, 2  ;;  %v1768_v21 = vcombine.high %v1466_v36, %v1466_v36  ;;  %v1775_v3 = vrot.slane %v1466_v36, %v6264_v17  ;;  %5805 = vmatprep.subr.mxu0 %v2769_v29  ;;  %5066 = vmatprep.subr.mxu1 %v2680_v28 }
 0x13e   : > { %9455 = vst [vmem:[#allocation17_spill] sm:$0xff] %v9454_v7  ;;  %v1467_v53 = vmax.f32 %v1422_v58, 0.0  ;;  %v2567_v39 = vrot.slane %v2445_v43, 2  ;;  %vm9456_vm4 = vcmask 1046528   ;;  %v2446_v11 = vsel %vm7242_vm2, %v7159_v1, 0.0  ;;  %5806 = vmatpush3.msra.mxu0 %v2769_v29  ;;  %5067 = vmatpush3.msra.mxu1 %v2664_v47  ;;  %v9531_v33 = vld [vmem:[#allocation13_spill] sm:$0xff] }
 0x13f   : > { %v7283_v6 = vsel %vm9456_vm4, %v2509_v13, %v2510_v20  ;;  %v1427_v62 = vadd.f32 %v6655_v25, %v1426_v54  ;;  %v7292_v36 = vsel %vm7265_vm1, %v7227_v26, 0.0  ;;  %v1782_v16 = vrot.slane %v1768_v21, %v6264_v17  ;;  %3172 = vmatmul.mubr.f32.gmra.mxu0 %v7224_v18  ;;  %v1431_v13 = vpop.f32.mrf.mxu0  ;;  %5807 = vmatprep.subr.mxu0 %v2768_v48 }
 0x140   : > { %9457 = vst [vmem:[#allocation18_spill] sm:$0xff] %v7283_v6  ;;  %v1783_v58 = vcombine.high %v1775_v3, %v1775_v3  ;;  %v2276_v28 = vcombine.low %v1767_v2, %v1775_v3  ;;  %v1785_v43 = vcombine.high %v1467_v53, %v1467_v53  ;;  %v1792_v14 = vrot.slane %v1467_v53, %v6264_v17 }
 0x141   : > { %2896 = vmatprep.mubr.f32.mxu1 %v7283_v6  ;;  %vm9458_vm4 = vcmask 1045504   ;;  %v2512_v54 = vrot.slane %v2446_v11, 1  ;;  %v2569_v23 = vrot.slane %v2446_v11, 2  ;;  %v1784_v47 = vcombine.high %v1782_v16, %v1782_v16  ;;  %v5785_v53 = vpop.f32.mrf.mxu0  ;;  %5808 = vmatpush3.msra.mxu0 %v2768_v48  ;;  %v9532_v52 = vld [vmem:[#allocation15_spill] sm:$0xff] }
 0x142   : > { %v7299_v1 = vsel %vm9458_vm4, %v2566_v46, %v2567_v39  ;;  %v2277_v29 = vcombine.low %v1783_v58, %v1782_v16  ;;  %v2284_v2 = vrot.slane %v2276_v28, %v6264_v17  ;;  %v1799_v21 = vrot.slane %v1785_v43, %v6264_v17  ;;  %4877 = vmatmul.mubr.msk.f32.gmra.mxu1 %vm7197_vm7, %v7129_v42  ;;  %v2767_v16 = vld [vmem:[%s9334_s3 + $0x440] sm:$0xff] }
 0x143   : > { %3176 = vmatprep.mubr.f32.mxu0 %v7299_v1  ;;  %v1800_v3 = vcombine.high %v1792_v14, %v1792_v14  ;;  %vm9459_vm4 = vcmask 1046528   ;;  %vm9461_vm2 = vcmask 1045504   ;;  %v1468_v58 = vmax.f32 %v1427_v62, 0.0  ;;  %v2679_v28 = vld [vmem:[%s9334_s3 + $0x180] sm:$0xff]  ;;  %5809 = vmatprep.subr.mxu0 %v2767_v16 }
 0x144   : > { %v7310_v11 = vsel %vm9459_vm4, %v2510_v20, %v2512_v54  ;;  %v7313_v46 = vsel %vm9461_vm2, %v2567_v39, %v2569_v23  ;;  %v2291_v43 = vrot.slane %v2277_v29, %v6264_v17  ;;  %v1801_v53 = vcombine.high %v1799_v21, %v1799_v21  ;;  %3177 = vmatmul.mubr.f32.gmra.mxu0 %v7283_v6  ;;  %v7329_v20 = vpop.f32.mrf.mxu0  ;;  %v2766_v29 = vld [vmem:[%s9334_s3 + $0x438] sm:$0xff] }
 0x145   : > { %9460 = vst [vmem:[#allocation19_spill] sm:$0xff] %v7310_v11  ;;  %9462 = vst [vmem:[#allocation20_spill] sm:$0xff] %v7313_v46  ;;  %v2293_v18 = vcombine.low %v1784_v47, %v1792_v14  ;;  %2901 = vmatprep.mubr.f32.mxu1 %v7310_v11  ;;  %v7327_v23 = vsel %vm7212_vm8, %v7272_v38, 0.0  ;;  %v2294_v39 = vcombine.low %v1800_v3, %v1799_v21  ;;  %3181 = vmatprep.mubr.f32.mxu0 %v7313_v46 }
 0x146   : > { %v1802_v48 = vcombine.high %v1468_v58, %v1468_v58  ;;  %v1809_v62 = vrot.slane %v1468_v58, %v6264_v17  ;;  %v1432_v54 = vadd.f32 %v6655_v25, %v1431_v13  ;;  %vm9463_vm2 = vcmp.le.s32.totalorder %v6662_v31, 16  ;;  %5068 = vmatprep.subr.mxu1 %v2679_v28  ;;  %v5788_v58 = vpop.f32.mrf.mxu0  ;;  %4878 = vmatmul.mubr.msk.f32.gmra.mxu1 %vm7171_vm3, %v7178_v59  ;;  %v2765_v28 = vld [vmem:[%s9334_s3 + $0x430] sm:$0xff]  ;;  %v3844_v13 = vld [vmem:[%s9338_s7 + $0x68] sm:$0xff] }
 0x147   : > { %vm7338_vm4 = vmand %vm7212_vm8, %vm9463_vm2  ;;  %v7345_v47 = vcombine.low %v2284_v2, %v2291_v43  ;;  %v2301_v21 = vrot.slane %v2293_v18, %v6264_v17  ;;  %v7349_v3 = vrot.slane %v1801_v53, %v6264_v17  ;;  %v2514_v25 = vrot.slane %v7292_v36, 1  ;;  %5810 = vmatpush3.msra.mxu0 %v2767_v16 }
 0x148   : > { %vm9466_vm2 = vcmp.ge.s32.totalorder %v6718_v4, 1  ;;  %v2308_v2 = vrot.slane %v2294_v39, %v6264_v17  ;;  %v1816_v18 = vrot.slane %v1802_v48, %v6264_v17  ;;  %v1817_v43 = vcombine.high %v1809_v62, %v1809_v62  ;;  %v2663_v4 = vld [vmem:[%s9334_s3 + $0x100] sm:$0xff]  ;;  %3182 = vmatmul.mubr.f32.gmra.mxu0 %v7310_v11  ;;  %5811 = vmatprep.subr.mxu0 %v2766_v29  ;;  %v7380_v6 = vpop.f32.mrf.mxu0 }
 0x149   : > { %vm7356_vm10 = vmand %vm9466_vm2, %vm1910_vm15  ;;  %v1469_v53 = vmax.f32 %v1432_v54, 0.0  ;;  %v2515_v39 = vrot.slane %v7327_v23, 1  ;;  %v2571_v48 = vrot.slane %v7292_v36, 2  ;;  %v2572_v58 = vrot.slane %v7327_v23, 2  ;;  %5812 = vmatpush3.msra.mxu0 %v2766_v29  ;;  %5069 = vmatpush3.msra.mxu1 %v2663_v4  ;;  %v3536_v36 = vld [vmem:[%s9336_s5 + $0x68] sm:$0xff] }
 0x14a   : > { %v9469_v54 = vrot.slane %v7185_v61, %v6264_v17  ;;  %v7382_v55 = vcombine.low %v2301_v21, %v2308_v2  ;;  %v1818_v59 = vcombine.high %v1816_v18, %v1816_v18  ;;  %v2317_v0 = vcombine.low %v1809_v62, %v1817_v43  ;;  %5813 = vmatprep.subr.mxu0 %v2765_v28  ;;  %v5791_v62 = vpop.f32.mrf.mxu0 }
 0x14b   : > { %v1819_v11 = vcombine.high %v1469_v53, %v1469_v53  ;;  %vm9470_vm15 = vcmp.ge.s32.totalorder %v6233_v9, 1  ;;  %v1826_v61 = vrot.slane %v1469_v53, %v6264_v17  ;;  %vm9475_vm3 = vcmask 1045504   ;;  %5814 = vmatpush3.msra.mxu0 %v2765_v28 }
 0x14c   : > { %v2449_v16 = vsel %vm7338_vm4, %v9469_v54, 0.0  ;;  %vm7388_vm2 = vmand %vm7356_vm10, %vm9470_vm15  ;;  %vm9473_vm4 = vcmask 1046528   ;;  %v7397_v14 = vsel %vm9475_vm3, %v2571_v48, %v2572_v58  ;;  %v2318_v2 = vcombine.low %v1816_v18, %v1818_v59  ;;  %v2764_v59 = vld [vmem:[%s9334_s3 + $0x428] sm:$0xff]  ;;  %v7438_v48 = vpop.f32.mrf.mxu0 }
 0x14d   : > { %v7394_v23 = vsel %vm9473_vm4, %v2514_v25, %v2515_v39  ;;  %9476 = vst [vmem:[#allocation22_spill] sm:$0xff] %v7397_v14  ;;  %v2517_v21 = vrot.slane %v2449_v16, 1  ;;  %v2325_v43 = vrot.slane %v2317_v0, %v6264_v17  ;;  %v1833_v54 = vrot.slane %v1819_v11, %v6264_v17  ;;  %3186 = vmatprep.mubr.f32.mxu0 %v7397_v14 }
 0x14e   : > { %9474 = vst [vmem:[#allocation21_spill] sm:$0xff] %v7394_v23  ;;  %2906 = vmatprep.mubr.f32.mxu1 %v7394_v23  ;;  %v2574_v29 = vrot.slane %v2449_v16, 2  ;;  %vm9477_vm15 = vcmp.le.s32.totalorder %v6662_v31, 16  ;;  %v1834_v0 = vcombine.high %v1826_v61, %v1826_v61  ;;  %3187 = vmatmul.mubr.f32.gmra.mxu0 %v7394_v23  ;;  %v2450_v18 = vsel %vm7388_vm2, %v7345_v47, 0.0  ;;  %v5794_v14 = vpop.f32.mrf.mxu0 }
 0x14f   : > { %vm7407_vm3 = vmand %vm7356_vm10, %vm9477_vm15  ;;  %4879 = vmatmul.mubr.msk.f32.gmra.mxu1 %vm7265_vm1, %v7227_v26  ;;  %v7419_v11 = vsel %vm9473_vm4, %v2515_v39, %v2517_v21  ;;  %v2451_v53 = vsel %vm7356_vm10, %v7382_v55, 0.0  ;;  %vm9480_vm15 = vcmp.le.s32.totalorder %v6731_v10, 16  ;;  %vm9481_vm7 = vcmp.ge.s32.totalorder %v6731_v10, 1  ;;  %v2758_v39 = vld [vmem:[%s9334_s3 + $0x3f8] sm:$0xff]  ;;  %5815 = vmatprep.subr.mxu0 %v2764_v59 }
 0x150   : > { %vm7431_vm0 = vmand %vm9481_vm7, %vm9480_vm15  ;;  %v9482_v4 = vmov 0  ;;  %v2332_v16 = vrot.slane %v2318_v2, %v6264_v17  ;;  %v1835_v21 = vcombine.high %v1833_v54, %v1833_v54  ;;  %2911 = vmatprep.mubr.f32.mxu1 %v7419_v11  ;;  %vm9484_vm4 = vcmask 1045504   ;;  %v6028_v2 = vld [vmem:[%s9333_s2] ss:$0 sm:$0xff]  ;;  %5198 = vmatprep.subr.mxu1 %v2758_v39 }
 0x151   : > { %v9483_v4 = vsel %vm7431_vm0, 4294967295, %v9482_v4  ;;  %v7443_v62 = vsel %vm9484_vm4, %v2572_v58, %v2574_v29  ;;  %v2519_v23 = vrot.slane %v2450_v18, 1  ;;  %v2334_v10 = vcombine.low %v1826_v61, %v1834_v0  ;;  %5816 = vmatpush3.msra.mxu0 %v2764_v59  ;;  %v2763_v61 = vld [vmem:[%s9334_s3 + $0x420] sm:$0xff] }
 0x152   : > { %3191 = vmatprep.mubr.f32.mxu0 %v7443_v62  ;;  %v2520_v7 = vrot.slane %v2451_v53, 1  ;;  %v2576_v26 = vrot.slane %v2450_v18, 2  ;;  %v2577_v42 = vrot.slane %v2451_v53, 2  ;;  %v7446_v46 = vcombine.low %v2325_v43, %v2332_v16  ;;  %5817 = vmatprep.subr.mxu0 %v2763_v61 }
 0x153   : > { %v2335_v24 = vcombine.low %v1833_v54, %v1835_v21  ;;  %v1437_v58 = vadd.f32 %v6028_v2, %v7329_v20  ;;  %v2452_v28 = vsel %vm7407_vm3, %v7349_v3, 0.0  ;;  %vm9485_vm7 = vcmp.ge.s32.totalorder %v6233_v9, 1  ;;  %4880 = vmatmul.mubr.msk.f32.gmra.mxu1 %vm7212_vm8, %v7272_v38  ;;  %3192 = vmatmul.mubr.f32.gmra.mxu0 %v7419_v11 }
 0x154   : > { %vm7462_vm15 = vmand %vm7431_vm0, %vm9485_vm7  ;;  %v2342_v20 = vrot.slane %v2334_v10, %v6264_v17  ;;  %vm9488_vm3 = vcmask 1046528   ;;  %v7475_v43 = vsel %vm9484_vm4, %v2576_v26, %v2577_v42  ;;  %v2522_v25 = vrot.slane %v2452_v28, 1  ;;  %5818 = vmatpush3.msra.mxu0 %v2763_v61 }
 0x155   : > { %v7472_v3 = vsel %vm9488_vm3, %v2519_v23, %v2520_v7  ;;  %v2349_v54 = vrot.slane %v2335_v24, %v6264_v17  ;;  %3196 = vmatprep.mubr.f32.mxu0 %v7475_v43  ;;  %v1470_v29 = vmax.f32 %v1437_v58, 0.0  ;;  %v9489_v59 = vrot.slane %v6768_v49, 2  ;;  %vm9491_vm7 = vmmov %vm9484_vm4  ;;  %v2759_v49 = vld [vmem:[%s9334_s3 + $0x400] sm:$0xff] }
 0x156   : > { %2916 = vmatprep.mubr.f32.mxu1 %v7472_v3  ;;  %v9490_v0 = vrot.slane %v6746_v27, 2  ;;  %v2579_v53 = vrot.slane %v2452_v28, 2  ;;  %v2453_v26 = vsel %vm7462_vm15, %v7446_v46, 0.0  ;;  %v1442_v24 = vadd.f32 %v6028_v2, %v7380_v6  ;;  %v2762_v27 = vld [vmem:[%s9334_s3 + $0x418] sm:$0xff] }
 0x157   : > { %v7489_v23 = vcombine.low %v2342_v20, %v2349_v54  ;;  %v1836_v39 = vcombine.high %v1470_v29, %v1470_v29  ;;  %v1843_v16 = vrot.slane %v1470_v29, %v6264_v17  ;;  %v7493_v21 = vsel %vm9488_vm3, %v2520_v7, %v2522_v25  ;;  %4881 = vmatmul.mubr.msk.f32.gmra.mxu1 %vm7388_vm2, %v7345_v47 }
 0x158   : > { %v2543_v18 = vsel %vm9491_vm7, %v9490_v0, %v9489_v59  ;;  %vm9492_vm4 = vcmp.le.s32.totalorder %v6662_v31, 16  ;;  %3197 = vmatmul.mubr.f32.gmra.mxu0 %v7472_v3  ;;  %vm9495_vm3 = vcmask 1045504   ;;  %v2607_v6 = vrot.slane %v2453_v26, 2  ;;  %2921 = vmatprep.mubr.f32.mxu1 %v7493_v21 }
 0x159   : > { %vm7502_vm7 = vmand %vm7431_vm0, %vm9492_vm4  ;;  %v7511_v7 = vsel %vm9495_vm3, %v2577_v42, %v2579_v53  ;;  %v2600_v58 = vrot.slane %v2453_v26, 1  ;;  %v1471_v28 = vmax.f32 %v1442_v24, 0.0  ;;  %v1850_v61 = vrot.slane %v1836_v39, %v6264_v17  ;;  %5819 = vmatprep.subr.mxu0 %v2762_v27  ;;  %v2761_v24 = vld [vmem:[%s9334_s3 + $0x410] sm:$0xff] }
 0x15a   : > { %v1851_v20 = vcombine.high %v1843_v16, %v1843_v16  ;;  %v2357_v54 = vrot.slane %v1843_v16, %v6264_v17  ;;  %3201 = vmatprep.mubr.f32.mxu0 %v7511_v7  ;;  %v2454_v29 = vsel %vm7431_vm0, %v7489_v23, 0.0  ;;  %5820 = vmatpush3.msra.mxu0 %v2762_v27  ;;  %v1447_v16 = vadd.f32 %v6028_v2, %v7438_v48  ;;  %vm9496_vm4 = vmmov %vm9495_vm3 }
 0x15b   : > { %v2608_v25 = vrot.slane %v2454_v29, 2  ;;  %v2601_v59 = vrot.slane %v2454_v29, 1  ;;  %v1853_v42 = vcombine.high %v1471_v28, %v1471_v28  ;;  %v1860_v0 = vrot.slane %v1471_v28, %v6264_v17  ;;  %4882 = vmatmul.mubr.msk.f32.gmra.mxu1 %vm7356_vm10, %v7382_v55  ;;  %5821 = vmatprep.subr.mxu0 %v2761_v24 }
 0x15c   : > { %v2358_v53 = vcombine.low %v1851_v20, %v1850_v61  ;;  %v2455_v26 = vsel %vm7502_vm7, %v2357_v54, 0.0  ;;  %v1852_v39 = vcombine.high %v1850_v61, %v1850_v61  ;;  %3202 = vmatmul.mubr.f32.gmra.mxu0 %v7493_v21  ;;  %4883 = vmatprep.mubr.msk.f32.mxu1 %vm6783_vm14, %v6775_v56  ;;  %vm9497_vm7 = vcmask 1046528   ;;  %v2757_v56 = vld [vmem:[%s9334_s3 + $0x3f0] sm:$0xff]  ;;  %vm9498_vm14 = vmmov %vm9495_vm3 }
 0x15d   : > { %v7532_v28 = vsel %vm9496_vm4, %v2607_v6, %v2608_v25  ;;  %v2610_v20 = vrot.slane %v2455_v26, 2  ;;  %v2603_v10 = vrot.slane %v2455_v26, 1  ;;  %v7539_v27 = vsel %vm9497_vm7, %v2600_v58, %v2601_v59  ;;  %v2742_v6 = vld [vmem:[%s9334_s3 + $0x378] sm:$0xff]  ;;  %5822 = vmatpush3.msra.mxu0 %v2761_v24  ;;  %vm9499_vm3 = vmmov %vm9497_vm7 }
 0x15e   : > { %3206 = vmatprep.mubr.f32.mxu0 %v7532_v28  ;;  %v1867_v48 = vrot.slane %v1853_v42, %v6264_v17  ;;  %v1868_v2 = vcombine.high %v1860_v0, %v1860_v0  ;;  %v1472_v61 = vmax.f32 %v1447_v16, 0.0  ;;  %v2366_v54 = vrot.slane %v2358_v53, %v6264_v17 }
 0x15f   : > { %v2359_v29 = vcombine.low %v1852_v39, %v1860_v0  ;;  %v7551_v58 = vsel %vm9498_vm14, %v2608_v25, %v2610_v20  ;;  %2992 = vmatmul.mubr.f32.vlgmr.msra.gmra.mxu1 %v2543_v18  ;;  %v2741_v0 = vld [vmem:[%s9334_s3 + $0x370] sm:$0xff]  ;;  %v7559_v35 = vsel %vm9499_vm3, %v2601_v59, %v2603_v10  ;;  %v2760_v25 = vld [vmem:[%s9334_s3 + $0x408] sm:$0xff]  ;;  %vm1902_vm4 = vcmp.ge.s32.totalorder %v1888_v63, 1 }
 0x160   : > { %v2375_v42 = vcombine.low %v1868_v2, %v1867_v48  ;;  %v1869_v26 = vcombine.high %v1867_v48, %v1867_v48  ;;  %v1876_v53 = vrot.slane %v1472_v61, %v6264_v17  ;;  %3207 = vmatmul.mubr.f32.gmra.mxu0 %v7539_v27  ;;  %vm1912_vm7 = vcmp.le.s32.totalorder %v1888_v63, 16  ;;  %5199 = vmatpush3.msra.mxu1 %v2742_v6  ;;  %v2756_v10 = vld [vmem:[%s9334_s3 + $0x3e8] sm:$0xff] }
 0x161   : > { %v2373_v24 = vrot.slane %v2359_v29, %v6264_v17  ;;  %4884 = vmatprep.mubr.msk.f32.mxu1 %vm6759_vm11, %v6793_v15  ;;  %v2544_v18 = vrot.slane %v6741_v22, 2  ;;  %vm7570_vm14 = vmand %vm1902_vm4, %vm1912_vm7  ;;  %5200 = vmatprep.subr.mxu1 %v2757_v56  ;;  %vm9502_vm11 = vcmp.ge.s32.totalorder %v6233_v9, 1  ;;  %vm9506_vm4 = vcmask 1045504   ;;  %v2740_v9 = vld [vmem:[%s9334_s3 + $0x368] sm:$0xff]  ;;  %v2755_v29 = vld [vmem:[%s9334_s3 + $0x3e0] sm:$0xff] }
 0x162   : > { %v2383_v39 = vrot.slane %v2375_v42, %v6264_v17  ;;  %v1877_v16 = vcombine.high %v1876_v53, %v1876_v53  ;;  %v2376_v59 = vcombine.low %v1869_v26, %v1876_v53  ;;  %3211 = vmatprep.mubr.f32.mxu0 %v7551_v58  ;;  %vm7584_vm3 = vmand %vm7570_vm14, %vm9502_vm11  ;;  %5201 = vmatpush3.msra.mxu1 %v2741_v0  ;;  %vm9507_vm7 = vcmp.le.s32.totalorder %v6662_v31, 16  ;;  %v2739_v42 = vld [vmem:[%s9334_s3 + $0x360] sm:$0xff]  ;;  %v2754_v53 = vld [vmem:[%s9334_s3 + $0x3d8] sm:$0xff] }
 0x163   : > { %v7578_v48 = vcombine.low %v2366_v54, %v2373_v24  ;;  %v2545_v15 = vsel %vm9506_vm4, %v9505_v44, %v2544_v18  ;;  %5823 = vmatprep.subr.mxu0 %v2760_v25  ;;  %vm1988_vm0 = vmand %vm7570_vm14, %vm9507_vm7  ;;  %5202 = vmatprep.subr.mxu1 %v2756_v10  ;;  %v2738_v0 = vld [vmem:[%s9334_s3 + $0x358] sm:$0xff]  ;;  %v2753_v24 = vld [vmem:[%s9334_s3 + $0x3d0] sm:$0xff] }
 0x164   : > { %v2390_v2 = vrot.slane %v2376_v59, %v6264_v17  ;;  %v2398_v61 = vrot.slane %v1877_v16, %v6264_v17  ;;  %2997 = vmatmul.mubr.f32.gmra.mxu1 %v2545_v15  ;;  %3212 = vmatmul.mubr.f32.gmra.mxu0 %v7559_v35  ;;  %v2737_v18 = vld [vmem:[%s9334_s3 + $0x350] sm:$0xff]  ;;  %v2736_v16 = vld [vmem:[%s9334_s3 + $0x348] sm:$0xff]  ;;  %v9513_v44 = vld [vmem:[#allocation22_spill] sm:$0xff] }
 0x165   : > { %v7607_v17 = vsel %vm7584_vm3, %v7578_v48, 0.0  ;;  %4885 = vmatprep.mubr.msk.f32.mxu1 %vm6871_vm6, %v6854_v32  ;;  %5824 = vmatpush3.msra.mxu0 %v2760_v25  ;;  %v9512_v10 = vld [vmem:[#allocation20_spill] sm:$0xff]  ;;  %v2735_v15 = vld [vmem:[%s9334_s3 + $0x340] sm:$0xff]  ;;  %v3840_v20 = vld [vmem:[%s9338_s7 + $0x48] sm:$0xff] }
 0x166   : > { %v7612_v31 = vcombine.low %v2383_v39, %v2390_v2  ;;  %5827 = vmatprep.mubr.f32.mxu0 %v6967_v51  ;;  %v7615_v54 = vsel %vm1988_vm0, %v2398_v61, 0.0  ;;  %v2617_v6 = vrot.slane %v7607_v17, 1  ;;  %5203 = vmatpush3.msra.mxu1 %v2740_v9  ;;  %vm9508_vm0 = vcmask 1046528   ;;  %v9514_v2 = vld [vmem:[#allocation6_spill] sm:$0xff]  ;;  %v9515_v61 = vld [vmem:[#allocation4_spill] sm:$0xff]  ;;  %v2734_v9 = vld [vmem:[%s9334_s3 + $0x338] sm:$0xff] }
 0x167   : > { %5825 = vmatprep.subr.mxu0 %v2759_v49  ;;  %v2620_v56 = vrot.slane %v7615_v54, 1  ;;  %5204 = vmatprep.subr.mxu1 %v2755_v29  ;;  %vm9509_vm11 = vmmov %vm9508_vm0  ;;  %vm9516_vm4 = vnez %v9515_v61  ;;  %v9517_v29 = vld [vmem:[#allocation10_spill] sm:$0xff]  ;;  %v3841_v39 = vld [vmem:[%s9338_s7 + $0x50] sm:$0xff] }
 0x168   : > { %v7624_v63 = vsel %vm7570_vm14, %v7612_v31, 0.0  ;;  %3002 = vmatmul.mubr.f32.gmra.mxu1 %v6863_v19  ;;  %5826 = vmatpush3.msra.mxu0 %v2759_v49  ;;  %v2624_v49 = vrot.slane %v7607_v17, 2  ;;  %v2627_v17 = vrot.slane %v7615_v54, 2  ;;  %v2746_v54 = vld [vmem:[%s9334_s3 + $0x398] sm:$0xff]  ;;  %v3855_v61 = vld [vmem:[%s9338_s7 + $0xc0] sm:$0xff] }
 0x169   : > { %v2618_v26 = vrot.slane %v7624_v63, 1  ;;  %4886 = vmatprep.mubr.msk.f32.mxu1 %vm6850_vm5, %v6878_v30  ;;  %5828 = vmatmul.mubr.f32.vlgmr.msra.gmra.mxu0 %v7040_v60 }
 0x16a   : > { %5830 = vmatprep.mubr.f32.mxu0 %v7095_v57  ;;  %5205 = vmatpush3.msra.mxu1 %v2739_v42  ;;  %v2733_v42 = vld [vmem:[%s9334_s3 + $0x330] sm:$0xff] }
 0x16b   : > { %v7641_v19 = vsel %vm9508_vm0, %v2617_v6, %v2618_v26  ;;  %v7647_v25 = vsel %vm9509_vm11, %v2618_v26, %v2620_v56  ;;  %5206 = vmatprep.subr.mxu1 %v2754_v53  ;;  %v2625_v6 = vrot.slane %v7624_v63, 2  ;;  %v9518_v56 = vld [vmem:[#allocation14_spill] sm:$0xff]  ;;  %v2732_v63 = vld [vmem:[%s9334_s3 + $0x328] sm:$0xff]  ;;  %vm9520_vm0 = vcmask 1045504   ;;  %v9521_v53 = vld [vmem:[#allocation12_spill] sm:$0xff] }
 0x16c   : > { %3007 = vmatmul.mubr.f32.gmra.mxu1 %v6889_v45  ;;  %v2752_v45 = vld [vmem:[%s9334_s3 + $0x3c8] sm:$0xff]  ;;  %vm9519_vm7 = vnez %v9518_v56  ;;  %v3854_v56 = vld [vmem:[%s9338_s7 + $0xb8] sm:$0xff] }
 0x16d   : > { %4887 = vmatprep.mubr.msk.f32.mxu1 %vm6957_vm13, %v6920_v12  ;;  %5831 = vmatmul.mubr.f32.gmra.mxu0 %v7121_v5  ;;  %v2626_v26 = vsel %vm9520_vm0, %v2624_v49, %v2625_v6 }
 0x16e   : > { %5833 = vmatprep.mubr.f32.mxu0 %v7221_v37  ;;  %5207 = vmatpush3.msra.mxu1 %v2738_v0  ;;  %v9522_v0 = vld [vmem:[#allocation11_spill] sm:$0xff] }
 0x16f   : > { %5208 = vmatprep.subr.mxu1 %v2753_v24  ;;  %vm9523_vm11 = vnez %v9522_v0  ;;  %v2628_v24 = vsel %vm9520_vm0, %v2625_v6, %v2627_v17  ;;  %vm9526_vm0 = vnez %v9483_v4  ;;  %v3839_v6 = vld [vmem:[%s9338_s7 + $0x40] sm:$0xff]  ;;  %v3837_v0 = vld [vmem:[%s9338_s7 + $0x30] sm:$0xff] }
 0x170   : > { %3012 = vmatmul.mubr.f32.gmra.mxu1 %v6967_v51  ;;  %v2751_v51 = vld [vmem:[%s9334_s3 + $0x3c0] sm:$0xff] }
 0x171   : > { %4888 = vmatprep.mubr.msk.f32.mxu1 %vm6927_vm9, %v6961_v50  ;;  %5834 = vmatmul.mubr.f32.gmra.mxu0 %v7233_v41 }
 0x172   : > { %5836 = vmatprep.mubr.f32.mxu0 %v7299_v1  ;;  %5209 = vmatpush3.msra.mxu1 %v2737_v18  ;;  %v2730_v18 = vld [vmem:[%s9334_s3 + $0x318] sm:$0xff] }
 0x173   : > { %5210 = vmatprep.subr.mxu1 %v2752_v45  ;;  %v9524_v45 = vld [vmem:[#allocation16_spill] sm:$0xff] }
 0x174   : > { %3017 = vmatmul.mubr.f32.gmra.mxu1 %v7040_v60  ;;  %v2750_v60 = vld [vmem:[%s9334_s3 + $0x3b8] sm:$0xff] }
 0x175   : > { %4889 = vmatprep.mubr.msk.f32.mxu1 %vm7102_vm12, %v7019_v40  ;;  %5837 = vmatmul.mubr.f32.gmra.mxu0 %v9512_v10 }
 0x176   : > { %5839 = vmatprep.mubr.f32.mxu0 %v9513_v44  ;;  %5211 = vmatpush3.msra.mxu1 %v2736_v16  ;;  %v3835_v16 = vld [vmem:[%s9338_s7 + $0x20] sm:$0xff] }
 0x177   : > { %5212 = vmatprep.subr.mxu1 %v2751_v51  ;;  %v2729_v51 = vld [vmem:[%s9334_s3 + $0x310] sm:$0xff] }
 0x178   : > { %3022 = vmatmul.mubr.f32.gmra.mxu1 %v7095_v57  ;;  %v2749_v57 = vld [vmem:[%s9334_s3 + $0x3b0] sm:$0xff] }
 0x179   : > { %4890 = vmatprep.mubr.msk.f32.mxu1 %vm9516_vm4, %v9514_v2  ;;  %5840 = vmatmul.mubr.f32.gmra.mxu0 %v7443_v62 }
 0x17a   : > { %5842 = vmatprep.mubr.f32.mxu0 %v7475_v43  ;;  %5213 = vmatpush3.msra.mxu1 %v2735_v15  ;;  %v2728_v15 = vld [vmem:[%s9334_s3 + $0x308] sm:$0xff] }
 0x17b   : > { %5214 = vmatprep.subr.mxu1 %v2750_v60  ;;  %v2743_v60 = vld [vmem:[%s9334_s3 + $0x380] sm:$0xff] }
 0x17c   : > { %3027 = vmatmul.mubr.f32.gmra.mxu1 %v7121_v5  ;;  %v2748_v5 = vld [vmem:[%s9334_s3 + $0x3a8] sm:$0xff] }
 0x17d   : > { %4891 = vmatprep.mubr.msk.f32.mxu1 %vm9519_vm7, %v9517_v29  ;;  %5843 = vmatmul.mubr.f32.gmra.mxu0 %v7511_v7 }
 0x17e   : > { %5215 = vmatpush3.msra.mxu1 %v2734_v9  ;;  %5845 = vmatprep.mubr.f32.mxu0 %v7532_v28  ;;  %v2747_v28 = vld [vmem:[%s9334_s3 + $0x3a0] sm:$0xff] }
 0x17f   : > { %5216 = vmatprep.subr.mxu1 %v2749_v57  ;;  %v2727_v9 = vld [vmem:[%s9334_s3 + $0x300] sm:$0xff] }
 0x180   : > { %3032 = vmatmul.mubr.f32.gmra.mxu1 %v7221_v37  ;;  %v2731_v37 = vld [vmem:[%s9334_s3 + $0x320] sm:$0xff] }
 0x181   : > { %4892 = vmatprep.mubr.msk.f32.mxu1 %vm9523_vm11, %v9521_v53  ;;  %5217 = vmatpush3.msra.mxu1 %v2733_v42  ;;  %v3531_v57 = vld [vmem:[%s9336_s5 + $0x40] sm:$0xff]  ;;  %v3530_v42 = vld [vmem:[%s9336_s5 + $0x38] sm:$0xff] }
 0x182   : > { %5218 = vmatprep.subr.mxu1 %v2748_v5  ;;  %5846 = vmatmul.mubr.f32.gmra.mxu0 %v7551_v58  ;;  %v2745_v58 = vld [vmem:[%s9334_s3 + $0x390] sm:$0xff]  ;;  %v3838_v5 = vld [vmem:[%s9338_s7 + $0x38] sm:$0xff] }
 0x183   : > { %5219 = vmatpush3.msra.mxu1 %v2732_v63  ;;  %5848 = vmatprep.mubr.f32.mxu0 %v2626_v26  ;;  %v3853_v63 = vld [vmem:[%s9338_s7 + $0xb0] sm:$0xff] }
 0x184   : > { %3037 = vmatmul.mubr.f32.gmra.mxu1 %v7233_v41  ;;  %5220 = vmatprep.subr.mxu1 %v2747_v28  ;;  %v2744_v41 = vld [vmem:[%s9334_s3 + $0x388] sm:$0xff]  ;;  %v3529_v26 = vld [vmem:[%s9336_s5 + $0x30] sm:$0xff] }
 0x185   : > { %4893 = vmatprep.mubr.msk.f32.mxu1 %vm7265_vm1, %v9524_v45  ;;  %5221 = vmatpush3.msra.mxu1 %v2731_v37  ;;  %v3852_v28 = vld [vmem:[%s9338_s7 + $0xa8] sm:$0xff] }
 0x186   : > { %5222 = vmatprep.subr.mxu1 %v2746_v54  ;;  %5849 = vmatmul.mubr.f32.gmra.mxu0 %v2628_v24  ;;  %v3528_v37 = vld [vmem:[%s9336_s5 + $0x28] sm:$0xff]  ;;  %v3851_v24 = vld [vmem:[%s9338_s7 + $0xa0] sm:$0xff] }
 0x187   : > { %5223 = vmatpush3.msra.mxu1 %v2730_v18  ;;  %v3836_v54 = vld [vmem:[%s9338_s7 + $0x28] sm:$0xff]  ;;  %v3527_v18 = vld [vmem:[%s9336_s5 + $0x20] sm:$0xff] }
 0x188   : > { %3042 = vmatmul.mubr.f32.gmra.mxu1 %v7299_v1  ;;  %5224 = vmatprep.subr.mxu1 %v2745_v58  ;;  %v9527_v1 = vld [vmem:[#allocation3_spill] sm:$0xff]  ;;  %v3850_v58 = vld [vmem:[%s9338_s7 + $0x98] sm:$0xff] }
 0x189   : > { %4894 = vmatprep.mubr.msk.f32.mxu1 %vm7212_vm8, %v7272_v38  ;;  %5225 = vmatpush3.msra.mxu1 %v2729_v51 }
 0x18a   : > { %5226 = vmatprep.subr.mxu1 %v2744_v41 }
 0x18b   : > { %5227 = vmatpush3.msra.mxu1 %v2728_v15 }
 0x18c   : > { %3047 = vmatmul.mubr.f32.gmra.mxu1 %v9512_v10  ;;  %5228 = vmatprep.subr.mxu1 %v2743_v60  ;;  %v9528_v10 = vld [vmem:[#allocation5_spill] sm:$0xff] }
 0x18d   : > { %4895 = vmatprep.mubr.msk.f32.mxu1 %vm7388_vm2, %v7345_v47  ;;  %5229 = vmatpush3.msra.mxu1 %v2727_v9  ;;  %v3834_v9 = vld [vmem:[%s9338_s7 + $0x18] sm:$0xff] }
 0x18e   : > { %5342 = vmatprep.subr.mxu1 %v3862_v8  ;;  %v3848_v8 = vld [vmem:[%s9338_s7 + $0x88] sm:$0xff] }
 0x190   : > { %3052 = vmatmul.mubr.f32.gmra.mxu1 %v9513_v44  ;;  %v3856_v44 = vld [vmem:[%s9338_s7 + $0xc8] sm:$0xff] }
 0x191   : > { %4896 = vmatprep.mubr.msk.f32.mxu1 %vm7356_vm10, %v7382_v55 }
 0x194   : > { %3057 = vmatmul.mubr.f32.gmra.mxu1 %v7443_v62  ;;  %v9529_v62 = vld [vmem:[#allocation7_spill] sm:$0xff] }
 0x195   : > { %4897 = vmatprep.mubr.msk.f32.mxu1 %vm7462_vm15, %v7446_v46 }
 0x198   : > { %3062 = vmatmul.mubr.f32.gmra.mxu1 %v7475_v43  ;;  %v9530_v43 = vld [vmem:[#allocation9_spill] sm:$0xff] }
 0x199   : > { %4898 = vmatprep.mubr.msk.f32.mxu1 %vm9526_vm0, %v7489_v23 }
 0x19c   : > { %3067 = vmatmul.mubr.f32.gmra.mxu1 %v7511_v7  ;;  %v3858_v7 = vld [vmem:[%s9338_s7 + $0xd8] sm:$0xff] }
 0x19d   : > { %3281 = vmatprep.mubr.f32.mxu1 %v9527_v1  ;;  %v3526_v1 = vld [vmem:[%s9336_s5 + $0x18] sm:$0xff] }
 0x1a0   : > { %4899 = vmatmul.mubr.msk.f32.vlgmr.msra.gmra.mxu1 %vm6871_vm6, %v6854_v32  ;;  %v9533_v32 = vld [vmem:[#allocation18_spill] sm:$0xff] }
 0x1a1   : > { %3286 = vmatprep.mubr.f32.mxu1 %v9528_v10  ;;  %v3849_v10 = vld [vmem:[%s9338_s7 + $0x90] sm:$0xff] }
 0x1a4   : > { %4900 = vmatmul.mubr.msk.f32.gmra.mxu1 %vm6850_vm5, %v6878_v30  ;;  %v9534_v30 = vld [vmem:[#allocation19_spill] sm:$0xff] }
 0x1a5   : > { %3291 = vmatprep.mubr.f32.mxu1 %v9529_v62  ;;  %v6029_v62 = vld [vmem:[%s6261_s19] sm:$0xff] }
 0x1a8   : > { %4901 = vmatmul.mubr.msk.f32.gmra.mxu1 %vm6957_vm13, %v6920_v12  ;;  %v9535_v12 = vld [vmem:[#allocation21_spill] sm:$0xff] }
 0x1a9   : > { %3296 = vmatprep.mubr.f32.mxu1 %v9530_v43  ;;  %v3691_v43 = vrot.slane %v6029_v62, 1 }
 0x1ac   : > { %4902 = vmatmul.mubr.msk.f32.gmra.mxu1 %vm6927_vm9, %v6961_v50  ;;  %v3846_v50 = vld [vmem:[%s9338_s7 + $0x78] sm:$0xff] }
 0x1ad   : > { %3301 = vmatprep.mubr.f32.mxu1 %v9531_v33  ;;  %5343 = vmatpush3.msra.mxu1 %v3846_v50  ;;  %v6030_v33 = vld [vmem:[%s6261_s19 + $0x8] sm:$0xff] }
 0x1b0   : > { %4903 = vmatmul.mubr.msk.f32.gmra.mxu1 %vm7102_vm12, %v7019_v40  ;;  %v3538_v40 = vld [vmem:[%s9336_s5 + $0x78] sm:$0xff] }
 0x1b1   : > { %3306 = vmatprep.mubr.f32.mxu1 %v9532_v52  ;;  %5851 = vmatprep.subr.mxu0 %v3538_v40  ;;  %v3692_v52 = vrot.slane %v6030_v33, 1 }
 0x1b2   : > { %5852 = vmatpush3.msra.mxu0 %v3538_v40  ;;  %v3832_v40 = vld [vmem:[%s9338_s7 + $0x8] sm:$0xff] }
 0x1b4   : > { %4904 = vmatmul.mubr.msk.f32.gmra.mxu1 %vm9516_vm4, %v9514_v2  ;;  %v3532_v2 = vld [vmem:[%s9336_s5 + $0x48] sm:$0xff] }
 0x1b5   : > { %3311 = vmatprep.mubr.f32.mxu1 %v9533_v32 }
 0x1b8   : > { %4905 = vmatmul.mubr.msk.f32.gmra.mxu1 %vm9519_vm7, %v9517_v29 }
 0x1b9   : > { %3316 = vmatprep.mubr.f32.mxu1 %v9534_v30  ;;  %v3833_v30 = vld [vmem:[%s9338_s7 + $0x10] sm:$0xff] }
 0x1bc   : > { %4906 = vmatmul.mubr.msk.f32.gmra.mxu1 %vm9523_vm11, %v9521_v53 }
 0x1bd   : > { %3321 = vmatprep.mubr.f32.mxu1 %v9535_v12  ;;  %v3525_v12 = vld [vmem:[%s9336_s5 + $0x10] sm:$0xff] }
 0x1c0   : > { %4907 = vmatmul.mubr.msk.f32.gmra.mxu1 %vm7265_vm1, %v9524_v45 }
 0x1c1   : > { %3326 = vmatprep.mubr.f32.mxu1 %v7419_v11  ;;  %v3859_v11 = vld [vmem:[%s9338_s7 + $0xe0] sm:$0xff] }
 0x1c4   : > { %4908 = vmatmul.mubr.msk.f32.gmra.mxu1 %vm7212_vm8, %v7272_v38  ;;  %v3537_v38 = vld [vmem:[%s9336_s5 + $0x70] sm:$0xff] }
 0x1c5   : > { %3331 = vmatprep.mubr.f32.mxu1 %v7472_v3  ;;  %5853 = vmatprep.subr.mxu0 %v3537_v38  ;;  %v3843_v3 = vld [vmem:[%s9338_s7 + $0x60] sm:$0xff] }
 0x1c6   : > { %5854 = vmatpush3.msra.mxu0 %v3537_v38  ;;  %v3847_v38 = vld [vmem:[%s9338_s7 + $0x80] sm:$0xff] }
 0x1c7   : > { %5855 = vmatprep.subr.mxu0 %v3536_v36 }
 0x1c8   : > { %4909 = vmatmul.mubr.msk.f32.gmra.mxu1 %vm7388_vm2, %v7345_v47  ;;  %5856 = vmatpush3.msra.mxu0 %v3536_v36  ;;  %v6031_v36 = vld [vmem:[%s6261_s19 + $0x10] sm:$0x3] }
 0x1c9   : > { %3336 = vmatprep.mubr.f32.mxu1 %v7493_v21 }
 0x1cb   : > { %v4990_v47 = vpop.f32.mrf.mxu1 }
 0x1cc   : > { %4910 = vmatmul.mubr.msk.f32.gmra.mxu1 %vm7356_vm10, %v7382_v55  ;;  %v3861_v55 = vld [vmem:[%s9338_s7 + $0xf0] sm:$0xff]  ;;  %vm9537_vm10 = vcmask 1046528  }
 0x1cd   : > { %3341 = vmatprep.mubr.f32.mxu1 %v7539_v27  ;;  %5344 = vmatprep.subr.mxu1 %v3861_v55  ;;  %v4991_v14 = vpop.f32.mrf.mxu1  ;;  %v3534_v27 = vld [vmem:[%s9336_s5 + $0x58] sm:$0xff]  ;;  %v3524_v55 = vld [vmem:[%s9336_s5 + $0x8] sm:$0xff]  ;;  %vm9538_vm5 = vmmov %vm9537_vm10 }
 0x1ce   : > { %5345 = vmatpush3.msra.mxu1 %v3845_v34  ;;  %v7867_v4 = vadd.f32 %v4991_v14, %v4990_v47  ;;  %v3831_v47 = vld [vmem:[%s9338_s7] sm:$0xff]  ;;  %vm9540_vm6 = vmmov %vm9538_vm5 }
 0x1cf   : > { %v4993_v21 = vpop.f32.mrf.mxu1  ;;  %vm9542_vm9 = vmmov %vm9538_vm5 }
 0x1d0   : > { %4911 = vmatmul.mubr.msk.f32.gmra.mxu1 %vm7462_vm15, %v7446_v46  ;;  %v3860_v46 = vld [vmem:[%s9338_s7 + $0xe8] sm:$0xff]  ;;  %vm9543_vm13 = vmmov %vm9538_vm5 }
 0x1d1   : > { %3346 = vmatprep.mubr.f32.mxu1 %v7559_v35  ;;  %5346 = vmatprep.subr.mxu1 %v3860_v46  ;;  %v4994_v35 = vpop.f32.mrf.mxu1  ;;  %vm9546_vm12 = vmmov %vm9538_vm5 }
 0x1d2   : > { %5347 = vmatpush3.msra.mxu1 %v3844_v13  ;;  %v7888_v22 = vadd.f32 %v4994_v35, %v4993_v21  ;;  %v3693_v13 = vsel %vm9537_vm10, %v3691_v43, %v3692_v52  ;;  %v8014_v35 = vld [vmem:[%s6261_s19 + $0x18] sm:$0xff]  ;;  %vm9550_vm8 = vmmov %vm9538_vm5  ;;  %vm9586_vm10 = vcmask 1045504  }
 0x1d3   : > { %5348 = vmatprep.subr.mxu1 %v3859_v11  ;;  %v3694_v11 = vrot.slane %v6031_v36, 1  ;;  %vm9554_vm1 = vmmov %vm9538_vm5 }
 0x1d4   : > { %4912 = vmatmul.mubr.msk.f32.gmra.mxu1 %vm9526_vm0, %v7489_v23  ;;  %v3535_v23 = vld [vmem:[%s9336_s5 + $0x60] sm:$0xff]  ;;  %v4996_v59 = vpop.f32.mrf.mxu1  ;;  %v7963_v51 = vpop.f32.mrf.mxu0  ;;  %vm9558_vm2 = vmmov %vm9554_vm1 }
 0x1d5   : > { %3351 = vmatprep.mubr.f32.mxu1 %v7641_v19  ;;  %5349 = vmatpush3.msra.mxu1 %v3843_v3  ;;  %v3857_v19 = vld [vmem:[%s9338_s7 + $0xd0] sm:$0xff]  ;;  %v3523_v3 = vld [vmem:[%s9336_s5] sm:$0xff]  ;;  %v3695_v21 = vsel %vm9538_vm5, %v3692_v52, %v3694_v11  ;;  %v8087_v52 = vld [vmem:[%s6261_s19 + $0x58] sm:$0x3] }
 0x1d6   : > { %5857 = vmatprep.subr.mxu0 %v3535_v23  ;;  %5350 = vmatprep.subr.mxu1 %v3858_v7  ;;  %v7978_v32 = vpop.f32.mrf.mxu0  ;;  %vm9562_vm15 = vmmov %vm9554_vm1 }
 0x1d7   : > { %5858 = vmatpush3.msra.mxu0 %v3535_v23  ;;  %vm9575_vm4 = vmmov %vm9554_vm1 }
 0x1d8   : > { %4913 = vmatmul.mubr.msk.f32.gmra.mxu1 %vm7584_vm3, %v7578_v48  ;;  %v3842_v48 = vld [vmem:[%s9338_s7 + $0x58] sm:$0xff]  ;;  %5859 = vmatprep.subr.mxu0 %v3534_v27  ;;  %vm9571_vm3 = vmmov %vm9554_vm1 }
 0x1d9   : > { %3356 = vmatprep.mubr.f32.mxu1 %v7647_v25  ;;  %v3533_v25 = vld [vmem:[%s9336_s5 + $0x50] sm:$0xff]  ;;  %5351 = vmatpush3.msra.mxu1 %v3842_v48  ;;  %v8005_v14 = vpop.f32.mrf.mxu0  ;;  %v3696_v48 = vrot.slane %v8014_v35, 1  ;;  %vm9578_vm7 = vmmov %vm9554_vm1 }
 0x1da   : > { %5860 = vmatpush3.msra.mxu0 %v3534_v27  ;;  %5352 = vmatprep.subr.mxu1 %v3857_v19  ;;  %v8018_v19 = vld [vmem:[%s6261_s19 + $0x20] sm:$0xff]  ;;  %vm9581_vm11 = vmmov %vm9554_vm1 }
 0x1db   : > { %5861 = vmatprep.subr.mxu0 %v3533_v25  ;;  %5353 = vmatpush3.msra.mxu1 %v3841_v39  ;;  %v8021_v39 = vpop.f32.mrf.mxu0  ;;  %vm9584_vm0 = vmmov %vm9554_vm1 }
 0x1dc   : > { %4914 = vmatmul.mubr.msk.f32.gmra.mxu1 %vm7570_vm14, %v7612_v31  ;;  %v4997_v31 = vpop.f32.mrf.mxu1  ;;  %5862 = vmatpush3.msra.mxu0 %v3533_v25  ;;  %v3697_v25 = vrot.slane %v8018_v19, 1  ;;  %vm9567_vm14 = vmmov %vm9554_vm1 }
 0x1dd   : > { %v7917_v49 = vadd.f32 %v4997_v31, %v4996_v59  ;;  %5354 = vmatprep.subr.mxu1 %v3856_v44  ;;  %5863 = vmatprep.subr.mxu0 %v3532_v2  ;;  %v8031_v31 = vld [vmem:[%s6261_s19 + $0x28] sm:$0x3]  ;;  %vm9589_vm5 = vmmov %vm9586_vm10 }
 0x1de   : > { %v4999_v29 = vpop.f32.mrf.mxu1  ;;  %5355 = vmatpush3.msra.mxu1 %v3840_v20  ;;  %5864 = vmatpush3.msra.mxu0 %v3532_v2  ;;  %v8024_v44 = vsel %vm9540_vm6, %v3696_v48, %v3697_v25  ;;  %v3910_v48 = vld [vmem:[%s9338_s7 + $0x278] sm:$0xff]  ;;  %vm9592_vm6 = vmmov %vm9589_vm5 }
 0x1df   : > { %5356 = vmatprep.subr.mxu1 %v3855_v61  ;;  %5865 = vmatprep.subr.mxu0 %v3531_v57  ;;  %v3699_v61 = vrot.slane %v8031_v31, 1 }
 0x1e0   : > { %v5000_v17 = vpop.f32.mrf.mxu1  ;;  %5357 = vmatpush3.msra.mxu1 %v3839_v6  ;;  %5866 = vmatpush3.msra.mxu0 %v3531_v57  ;;  %v8026_v2 = vpop.f32.mrf.mxu0 }
 0x1e1   : > { %v7937_v53 = vadd.f32 %v5000_v17, %v4999_v29  ;;  %5358 = vmatprep.subr.mxu1 %v3854_v56  ;;  %5867 = vmatprep.subr.mxu0 %v3530_v42  ;;  %v8036_v57 = vsel %vm9542_vm9, %v3697_v25, %v3699_v61  ;;  %v8042_v56 = vld [vmem:[%s6261_s19 + $0x30] sm:$0xff]  ;;  %vm9594_vm9 = vmmov %vm9589_vm5 }
 0x1e2   : > { %5359 = vmatpush3.msra.mxu1 %v3838_v5  ;;  %5868 = vmatpush3.msra.mxu0 %v3530_v42  ;;  %v5002_v45 = vpop.f32.mrf.mxu1  ;;  %v8038_v6 = vpop.f32.mrf.mxu0  ;;  %v3701_v42 = vrot.slane %v8042_v56, 1  ;;  %v8046_v5 = vld [vmem:[%s6261_s19 + $0x38] sm:$0xff]  ;;  %v8126_v25 = vld [vmem:[%s6261_s19 + $0x70] sm:$0x3] }
 0x1e3   : > { %5360 = vmatprep.subr.mxu1 %v3853_v63  ;;  %5869 = vmatprep.subr.mxu0 %v3529_v26  ;;  %v3702_v17 = vrot.slane %v8046_v5, 1 }
 0x1e4   : > { %5361 = vmatpush3.msra.mxu1 %v3837_v0  ;;  %5870 = vmatpush3.msra.mxu0 %v3529_v26  ;;  %v5003_v41 = vpop.f32.mrf.mxu1 }
 0x1e5   : > { %5362 = vmatprep.subr.mxu1 %v3852_v28  ;;  %5871 = vmatprep.subr.mxu0 %v3528_v37  ;;  %v7965_v15 = vadd.f32 %v5003_v41, %v5002_v45  ;;  %v8051_v26 = vsel %vm9543_vm13, %v3701_v42, %v3702_v17  ;;  %v8072_v41 = vld [vmem:[%s6261_s19 + $0x48] sm:$0xff]  ;;  %v3909_v42 = vld [vmem:[%s9338_s7 + $0x270] sm:$0xff]  ;;  %vm9596_vm13 = vmmov %vm9589_vm5 }
 0x1e6   : > { %5363 = vmatpush3.msra.mxu1 %v3836_v54  ;;  %5872 = vmatpush3.msra.mxu0 %v3528_v37  ;;  %v5005_v60 = vpop.f32.mrf.mxu1  ;;  %9544 = vst [vmem:[#allocation22_spill] sm:$0xff] %v8051_v26  ;;  %v8059_v54 = vld [vmem:[%s6261_s19 + $0x40] sm:$0x3] }
 0x1e7   : > { %5364 = vmatprep.subr.mxu1 %v3851_v24  ;;  %5873 = vmatprep.subr.mxu0 %v3527_v18  ;;  %v8053_v0 = vpop.f32.mrf.mxu0  ;;  %v3704_v24 = vrot.slane %v8059_v54, 1 }
 0x1e8   : > { %5365 = vmatpush3.msra.mxu1 %v3835_v16  ;;  %5874 = vmatpush3.msra.mxu0 %v3527_v18  ;;  %v5006_v50 = vpop.f32.mrf.mxu1 }
 0x1e9   : > { %5366 = vmatprep.subr.mxu1 %v3850_v58  ;;  %5875 = vmatprep.subr.mxu0 %v3526_v1  ;;  %v7995_v34 = vadd.f32 %v5006_v50, %v5005_v60  ;;  %v8064_v45 = vsel %vm9546_vm12, %v3702_v17, %v3704_v24  ;;  %v8066_v16 = vpop.f32.mrf.mxu0  ;;  %v3706_v60 = vrot.slane %v8072_v41, 1  ;;  %vm9598_vm12 = vmmov %vm9589_vm5 }
 0x1ea   : > { %5367 = vmatpush3.msra.mxu1 %v3834_v9  ;;  %5876 = vmatpush3.msra.mxu0 %v3526_v1  ;;  %v5008_v46 = vpop.f32.mrf.mxu1  ;;  %9547 = vst [vmem:[#allocation4_spill] sm:$0xff] %v8064_v45  ;;  %9548 = vst [vmem:[#allocation10_spill] sm:$0xff] %v8066_v16  ;;  %v8076_v9 = vld [vmem:[%s6261_s19 + $0x50] sm:$0xff] }
 0x1eb   : > { %5368 = vmatprep.subr.mxu1 %v3849_v10  ;;  %9536 = vst [vmem:[#allocation2_spill] sm:$0xff] %v7995_v34  ;;  %5877 = vmatprep.subr.mxu0 %v3525_v12  ;;  %v3707_v1 = vrot.slane %v8076_v9, 1  ;;  %v3753_v34 = vrot.slane %v8018_v19, 2 }
 0x1ec   : > { %5369 = vmatpush3.msra.mxu1 %v3833_v30  ;;  %5878 = vmatpush3.msra.mxu0 %v3525_v12  ;;  %v5009_v23 = vpop.f32.mrf.mxu1  ;;  %v3709_v30 = vrot.slane %v8087_v52, 1 }
 0x1ed   : > { %5370 = vmatprep.subr.mxu1 %v3848_v8  ;;  %5879 = vmatprep.subr.mxu0 %v3524_v55  ;;  %v8011_v7 = vadd.f32 %v5009_v23, %v5008_v46  ;;  %v8103_v46 = vld [vmem:[%s6261_s19 + $0x60] sm:$0xff] }
 0x1ee   : > { %5371 = vmatpush3.msra.mxu1 %v3832_v40  ;;  %5880 = vmatpush3.msra.mxu0 %v3524_v55  ;;  %v8083_v43 = vpop.f32.mrf.mxu0  ;;  %v8094_v50 = vsel %vm9554_vm1, %v3707_v1, %v3709_v30  ;;  %vm9603_vm1 = vmmov %vm9589_vm5 }
 0x1ef   : > { %5372 = vmatprep.subr.mxu1 %v3847_v38  ;;  %9539 = vst [vmem:[#allocation8_spill] sm:$0xff] %v8011_v7  ;;  %4046 = vmatprep.mubr.f32.mxu1 %v3693_v13  ;;  %v5011_v27 = vpop.f32.mrf.mxu1  ;;  %9552 = vst [vmem:[#allocation11_spill] sm:$0xff] %v8083_v43  ;;  %v3894_v38 = vld [vmem:[%s9338_s7 + $0x1f8] sm:$0xff]  ;;  %v8107_v13 = vld [vmem:[%s6261_s19 + $0x68] sm:$0xff] }
 0x1f0   : > { %5373 = vmatpush3.msra.mxu1 %v3831_v47  ;;  %5881 = vmatprep.subr.mxu0 %v3523_v3  ;;  %9555 = vst [vmem:[#allocation17_spill] sm:$0xff] %v8094_v50  ;;  %v8096_v40 = vpop.f32.mrf.mxu0  ;;  %v3711_v47 = vrot.slane %v8103_v46, 1  ;;  %v3712_v36 = vrot.slane %v8107_v13, 1  ;;  %v8291_v7 = vld [vmem:[%s6261_s19 + $0xb8] sm:$0x3] }
 0x1f1   : > { %4047 = vmatmul.mubr.f32.vlgmr.msra.gmra.mxu1 %v6029_v62  ;;  %5882 = vmatpush3.msra.mxu0 %v3523_v3  ;;  %v5012_v59 = vpop.f32.mrf.mxu1  ;;  %v8081_v62 = vsel %vm9550_vm8, %v3706_v60, %v3707_v1  ;;  %9556 = vst [vmem:[#allocation3_spill] sm:$0xff] %v8096_v40  ;;  %v3926_v3 = vld [vmem:[%s9338_s7 + $0x2f8] sm:$0xff]  ;;  %v3908_v60 = vld [vmem:[%s9338_s7 + $0x268] sm:$0xff]  ;;  %vm9601_vm8 = vmmov %vm9589_vm5 }
 0x1f2   : > { %4051 = vmatprep.mubr.f32.mxu1 %v3695_v21  ;;  %v8028_v20 = vadd.f32 %v5012_v59, %v5011_v27  ;;  %9551 = vst [vmem:[#allocation12_spill] sm:$0xff] %v8081_v62  ;;  %5422 = vmatprep.subr.mxu0 %v3894_v38  ;;  %v8117_v23 = vsel %vm9558_vm2, %v3711_v47, %v3712_v36  ;;  %v8119_v21 = vpop.f32.mrf.mxu0  ;;  %v3714_v59 = vrot.slane %v8126_v25, 1  ;;  %v8151_v1 = vld [vmem:[%s6261_s19 + $0x78] sm:$0xff]  ;;  %v3923_v38 = vld [vmem:[%s9338_s7 + $0x2e0] sm:$0xff]  ;;  %vm9606_vm2 = vmmov %vm9603_vm1 }
 0x1f3   : > { %9559 = vst [vmem:[#allocation7_spill] sm:$0xff] %v8117_v23  ;;  %5502 = vmatprep.subr.mxu1 %v3926_v3  ;;  %9560 = vst [vmem:[#allocation9_spill] sm:$0xff] %v8119_v21  ;;  %v3907_v47 = vld [vmem:[%s9338_s7 + $0x260] sm:$0xff] }
 0x1f4   : > { %9541 = vst [vmem:[#allocation20_spill] sm:$0xff] %v8028_v20  ;;  %5503 = vmatpush3.msra.mxu1 %v3910_v48  ;;  %v8144_v24 = vpop.f32.mrf.mxu0 }
 0x1f5   : > { %4052 = vmatmul.mubr.f32.gmra.mxu1 %v6030_v33  ;;  %9564 = vst [vmem:[#allocation18_spill] sm:$0xff] %v8144_v24 }
 0x1f6   : > { %4056 = vmatprep.mubr.f32.mxu1 %v8024_v44 }
 0x1f8   : > { %v5014_v29 = vpop.f32.mrf.mxu1 }
 0x1f9   : > { %4057 = vmatmul.mubr.f32.gmra.mxu1 %v8014_v35 }
 0x1fa   : > { %4061 = vmatprep.mubr.f32.mxu1 %v8036_v57  ;;  %v5015_v63 = vpop.f32.mrf.mxu1 }
 0x1fb   : > { %v8055_v28 = vadd.f32 %v5015_v63, %v5014_v29  ;;  %v3925_v29 = vld [vmem:[%s9338_s7 + $0x2f0] sm:$0xff]  ;;  %v8139_v63 = vsel %vm9562_vm15, %v3712_v36, %v3714_v59  ;;  %v3906_v59 = vld [vmem:[%s9338_s7 + $0x258] sm:$0xff]  ;;  %vm9610_vm15 = vmmov %vm9603_vm1 }
 0x1fc   : > { %v5017_v37 = vpop.f32.mrf.mxu1  ;;  %5504 = vmatprep.subr.mxu1 %v3925_v29  ;;  %9563 = vst [vmem:[#allocation15_spill] sm:$0xff] %v8139_v63 }
 0x1fd   : > { %9545 = vst [vmem:[#allocation6_spill] sm:$0xff] %v8055_v28  ;;  %4062 = vmatmul.mubr.f32.gmra.mxu1 %v8018_v19 }
 0x1fe   : > { %4066 = vmatprep.mubr.f32.mxu1 %v8051_v26  ;;  %v5018_v18 = vpop.f32.mrf.mxu1  ;;  %5505 = vmatpush3.msra.mxu1 %v3909_v42 }
 0x1ff   : > { %v8068_v58 = vadd.f32 %v5018_v18, %v5017_v37  ;;  %v3924_v37 = vld [vmem:[%s9338_s7 + $0x2e8] sm:$0xff] }
 0x200   : > { %5506 = vmatprep.subr.mxu1 %v3924_v37 }
 0x201   : > { %9549 = vst [vmem:[#allocation14_spill] sm:$0xff] %v8068_v58  ;;  %4067 = vmatmul.mubr.f32.gmra.mxu1 %v8042_v56  ;;  %v8257_v58 = vld [vmem:[%s6261_s19 + $0xa8] sm:$0xff] }
 0x202   : > { %4071 = vmatprep.mubr.f32.mxu1 %v8064_v45  ;;  %v5020_v10 = vpop.f32.mrf.mxu1  ;;  %5507 = vmatpush3.msra.mxu1 %v3908_v60  ;;  %v3905_v60 = vld [vmem:[%s9338_s7 + $0x250] sm:$0xff] }
 0x203   : > { %5508 = vmatprep.subr.mxu1 %v3923_v38  ;;  %v3920_v38 = vld [vmem:[%s9338_s7 + $0x2c8] sm:$0xff] }
 0x204   : > { %v5021_v33 = vpop.f32.mrf.mxu1  ;;  %5509 = vmatpush3.msra.mxu1 %v3907_v47 }
 0x205   : > { %4072 = vmatmul.mubr.f32.gmra.mxu1 %v8046_v5  ;;  %v8090_v12 = vadd.f32 %v5021_v33, %v5020_v10  ;;  %v3716_v10 = vrot.slane %v8151_v1, 1  ;;  %v8155_v33 = vld [vmem:[%s6261_s19 + $0x80] sm:$0xff] }
 0x206   : > { %4076 = vmatprep.mubr.f32.mxu1 %v8081_v62  ;;  %v5023_v8 = vpop.f32.mrf.mxu1  ;;  %v3717_v30 = vrot.slane %v8155_v33, 1 }
 0x207   : > { %9553 = vst [vmem:[#allocation16_spill] sm:$0xff] %v8090_v12  ;;  %v3916_v12 = vld [vmem:[%s9338_s7 + $0x2a8] sm:$0xff] }
 0x208   : > { %v5024_v55 = vpop.f32.mrf.mxu1  ;;  %v8170_v3 = vsel %vm9567_vm14, %v3716_v10, %v3717_v30  ;;  %vm9613_vm14 = vmmov %vm9603_vm1 }
 0x209   : > { %4077 = vmatmul.mubr.f32.gmra.mxu1 %v8072_v41  ;;  %v8110_v11 = vadd.f32 %v5024_v55, %v5023_v8  ;;  %v8158_v8 = vpop.f32.mrf.mxu0  ;;  %9568 = vst [vmem:[#allocation23_spill] sm:$0xff] %v8170_v3 }
 0x20a   : > { %4081 = vmatprep.mubr.f32.mxu1 %v8094_v50  ;;  %9565 = vst [vmem:[#allocation19_spill] sm:$0xff] %v8158_v8  ;;  %v3914_v8 = vld [vmem:[%s9338_s7 + $0x298] sm:$0xff] }
 0x20b   : > { %9557 = vst [vmem:[#allocation5_spill] sm:$0xff] %v8110_v11  ;;  %v8183_v42 = vpop.f32.mrf.mxu0 }
 0x20c   : > { %9569 = vst [vmem:[#allocation24_spill] sm:$0xff] %v8183_v42 }
 0x20d   : > { %4082 = vmatmul.mubr.f32.gmra.mxu1 %v8076_v9 }
 0x20e   : > { %4086 = vmatprep.mubr.f32.mxu1 %v8117_v23 }
 0x20f   : > { %v5026_v27 = vpop.f32.mrf.mxu1 }
 0x211   : > { %v5027_v61 = vpop.f32.mrf.mxu1  ;;  %4087 = vmatmul.mubr.f32.gmra.mxu1 %v8103_v46 }
 0x212   : > { %v8136_v17 = vadd.f32 %v5027_v61, %v5026_v27  ;;  %4091 = vmatprep.mubr.f32.mxu1 %v8139_v63  ;;  %v3922_v27 = vld [vmem:[%s9338_s7 + $0x2d8] sm:$0xff]  ;;  %v8180_v61 = vld [vmem:[%s6261_s19 + $0x88] sm:$0x3] }
 0x213   : > { %v5029_v18 = vpop.f32.mrf.mxu1  ;;  %5510 = vmatprep.subr.mxu1 %v3922_v27  ;;  %v3719_v29 = vrot.slane %v8180_v61, 1  ;;  %v3904_v27 = vld [vmem:[%s9338_s7 + $0x248] sm:$0xff] }
 0x214   : > { %9561 = vst [vmem:[#allocation13_spill] sm:$0xff] %v8136_v17  ;;  %5511 = vmatpush3.msra.mxu1 %v3906_v59  ;;  %v8205_v59 = vld [vmem:[%s6261_s19 + $0x90] sm:$0xff]  ;;  %v3918_v17 = vld [vmem:[%s9338_s7 + $0x2b8] sm:$0xff] }
 0x215   : > { %v5030_v55 = vpop.f32.mrf.mxu1  ;;  %4092 = vmatmul.mubr.f32.gmra.mxu1 %v8107_v13 }
 0x216   : > { %v8167_v36 = vadd.f32 %v5030_v55, %v5029_v18  ;;  %4096 = vmatprep.mubr.f32.mxu1 %v8170_v3  ;;  %v3921_v18 = vld [vmem:[%s9338_s7 + $0x2d0] sm:$0xff]  ;;  %v8195_v55 = vsel %vm9571_vm3, %v3717_v30, %v3719_v29  ;;  %v8212_v29 = vpop.f32.mrf.mxu0  ;;  %vm9616_vm3 = vmmov %vm9603_vm1 }
 0x217   : > { %v5032_v48 = vpop.f32.mrf.mxu1  ;;  %5512 = vmatprep.subr.mxu1 %v3921_v18  ;;  %9572 = vst [vmem:[#allocation26_spill] sm:$0xff] %v8195_v55  ;;  %9573 = vst [vmem:[#allocation27_spill] sm:$0xff] %v8212_v29  ;;  %v3900_v29 = vld [vmem:[%s9338_s7 + $0x228] sm:$0xff] }
 0x218   : > { %9566 = vst [vmem:[#allocation21_spill] sm:$0xff] %v8167_v36  ;;  %5513 = vmatpush3.msra.mxu1 %v3905_v60  ;;  %v3919_v60 = vld [vmem:[%s9338_s7 + $0x2c0] sm:$0xff] }
 0x219   : > { %v5033_v37 = vpop.f32.mrf.mxu1  ;;  %4097 = vmatmul.mubr.f32.gmra.mxu1 %v8151_v1  ;;  %5514 = vmatprep.subr.mxu1 %v3920_v38  ;;  %v3903_v38 = vld [vmem:[%s9338_s7 + $0x240] sm:$0xff] }
 0x21a   : > { %v8192_v10 = vadd.f32 %v5033_v37, %v5032_v48  ;;  %v3721_v48 = vrot.slane %v8205_v59, 1  ;;  %v8209_v37 = vld [vmem:[%s6261_s19 + $0x98] sm:$0xff]  ;;  %4101 = vmatprep.mubr.f32.mxu1 %v8195_v55  ;;  %5515 = vmatpush3.msra.mxu1 %v3904_v27  ;;  %v8236_v27 = vld [vmem:[%s6261_s19 + $0xa0] sm:$0x3] }
 0x21b   : > { %v5035_v47 = vpop.f32.mrf.mxu1  ;;  %v3722_v30 = vrot.slane %v8209_v37, 1  ;;  %5516 = vmatprep.subr.mxu1 %v3919_v60 }
 0x21c   : > { %9570 = vst [vmem:[#allocation25_spill] sm:$0xff] %v8192_v10  ;;  %5517 = vmatpush3.msra.mxu1 %v3903_v38  ;;  %v3901_v38 = vld [vmem:[%s9338_s7 + $0x230] sm:$0xff] }
 0x21d   : > { %v5036_v18 = vpop.f32.mrf.mxu1  ;;  %v8224_v36 = vsel %vm9575_vm4, %v3721_v48, %v3722_v30  ;;  %4102 = vmatmul.mubr.f32.gmra.mxu1 %v8155_v33  ;;  %5518 = vmatprep.subr.mxu1 %v3918_v17  ;;  %v3724_v48 = vrot.slane %v8236_v27, 1  ;;  %v3917_v17 = vld [vmem:[%s9338_s7 + $0x2b0] sm:$0xff]  ;;  %vm9618_vm4 = vmmov %vm9603_vm1 }
 0x21e   : > { %v8221_v10 = vadd.f32 %v5036_v18, %v5035_v47  ;;  %9576 = vst [vmem:[#allocation29_spill] sm:$0xff] %v8224_v36  ;;  %v3902_v47 = vld [vmem:[%s9338_s7 + $0x238] sm:$0xff]  ;;  %v8239_v18 = vpop.f32.mrf.mxu0  ;;  %4106 = vmatprep.mubr.f32.mxu1 %v8224_v36 }
 0x21f   : > { %v8229_v11 = vpop.f32.mrf.mxu1  ;;  %9577 = vst [vmem:[#allocation30_spill] sm:$0xff] %v8239_v18  ;;  %5519 = vmatpush3.msra.mxu1 %v3902_v47  ;;  %v3726_v47 = vrot.slane %v8257_v58, 1 }
 0x220   : > { %9574 = vst [vmem:[#allocation28_spill] sm:$0xff] %v8221_v10  ;;  %5520 = vmatprep.subr.mxu1 %v3917_v17  ;;  %v8251_v10 = vsel %vm9578_vm7, %v3722_v30, %v3724_v48  ;;  %v3915_v30 = vld [vmem:[%s9338_s7 + $0x2a0] sm:$0xff]  ;;  %v8269_v48 = vld [vmem:[%s6261_s19 + $0xb0] sm:$0xff]  ;;  %v8276_v28 = vpop.f32.mrf.mxu0  ;;  %vm9619_vm7 = vmmov %vm9603_vm1 }
 0x221   : > { %v8241_v60 = vpop.f32.mrf.mxu1  ;;  %9579 = vst [vmem:[#allocation31_spill] sm:$0xff] %v8251_v10  ;;  %5521 = vmatpush3.msra.mxu1 %v3901_v38  ;;  %v3727_v17 = vrot.slane %v8269_v48, 1  ;;  %v3899_v38 = vld [vmem:[%s9338_s7 + $0x220] sm:$0xff]  ;;  %9580 = vst [vmem:[#allocation32_spill] sm:$0xff] %v8276_v28  ;;  %v3729_v28 = vrot.slane %v8291_v7, 1 }
 0x222   : > { %4107 = vmatmul.mubr.f32.gmra.mxu1 %v8205_v59  ;;  %5522 = vmatprep.subr.mxu1 %v3916_v12  ;;  %v3898_v12 = vld [vmem:[%s9338_s7 + $0x218] sm:$0xff] }
 0x223   : > { %4111 = vmatprep.mubr.f32.mxu1 %v8251_v10  ;;  %5523 = vmatpush3.msra.mxu1 %v3900_v29  ;;  %v8285_v20 = vsel %vm9581_vm11, %v3726_v47, %v3727_v17  ;;  %v3913_v29 = vld [vmem:[%s9338_s7 + $0x290] sm:$0xff]  ;;  %v8312_v40 = vsel %vm9584_vm0, %v3727_v17, %v3729_v28  ;;  %v3895_v28 = vld [vmem:[%s9338_s7 + $0x200] sm:$0xff]  ;;  %vm9620_vm11 = vmmov %vm9603_vm1 }
 0x224   : > { %v8260_v18 = vpop.f32.mrf.mxu1  ;;  %5524 = vmatprep.subr.mxu1 %v3915_v30  ;;  %9582 = vst [vmem:[#allocation33_spill] sm:$0xff] %v8285_v20  ;;  %v3897_v47 = vld [vmem:[%s9338_s7 + $0x210] sm:$0xff]  ;;  %v8303_v30 = vpop.f32.mrf.mxu0 }
 0x225   : > { %5525 = vmatpush3.msra.mxu1 %v3899_v38  ;;  %9583 = vst [vmem:[#allocation34_spill] sm:$0xff] %v8303_v30  ;;  %v3912_v38 = vld [vmem:[%s9338_s7 + $0x288] sm:$0xff]  ;;  %v3911_v30 = vld [vmem:[%s9338_s7 + $0x280] sm:$0xff] }
 0x226   : > { %v8278_v42 = vpop.f32.mrf.mxu1  ;;  %4112 = vmatmul.mubr.f32.gmra.mxu1 %v8209_v37  ;;  %5526 = vmatprep.subr.mxu1 %v3914_v8  ;;  %v3896_v8 = vld [vmem:[%s9338_s7 + $0x208] sm:$0xff]  ;;  %v8328_v17 = vpop.f32.mrf.mxu0 }
 0x227   : > { %4116 = vmatprep.mubr.f32.mxu1 %v8285_v20  ;;  %5527 = vmatpush3.msra.mxu1 %v3898_v12  ;;  %v3752_v12 = vrot.slane %v8014_v35, 2  ;;  %9585 = vst [vmem:[#allocation35_spill] sm:$0xff] %v8328_v17  ;;  %v3755_v35 = vrot.slane %v8031_v31, 2 }
 0x228   : > { %v8294_v24 = vpop.f32.mrf.mxu1  ;;  %5528 = vmatprep.subr.mxu1 %v3913_v29 }
 0x229   : > { %5529 = vmatpush3.msra.mxu1 %v3897_v47  ;;  %v8334_v47 = vsel %vm9586_vm10, %v3752_v12, %v3753_v34  ;;  %v8346_v17 = vsel %vm9589_vm5, %v3753_v34, %v3755_v35  ;;  %v3760_v34 = vrot.slane %v8059_v54, 2  ;;  %vm9621_vm10 = vmmov %vm9603_vm1 }
 0x22a   : > { %v8305_v21 = vpop.f32.mrf.mxu1  ;;  %4117 = vmatmul.mubr.f32.gmra.mxu1 %v8257_v58  ;;  %5530 = vmatprep.subr.mxu1 %v3912_v38  ;;  %9587 = vst [vmem:[#allocation36_spill] sm:$0xff] %v8334_v47  ;;  %v8340_v38 = vpop.f32.mrf.mxu0  ;;  %9590 = vst [vmem:[#allocation38_spill] sm:$0xff] %v8346_v17 }
 0x22b   : > { %4121 = vmatprep.mubr.f32.mxu1 %v8312_v40  ;;  %5531 = vmatpush3.msra.mxu1 %v3896_v8  ;;  %9588 = vst [vmem:[#allocation37_spill] sm:$0xff] %v8340_v38  ;;  %v3758_v8 = vrot.slane %v8046_v5, 2  ;;  %vm9623_vm5 = vmmov %vm9584_vm0 }
 0x22c   : > { %v8317_v43 = vpop.f32.mrf.mxu1  ;;  %5532 = vmatprep.subr.mxu1 %v3911_v30  ;;  %v3757_v30 = vrot.slane %v8042_v56, 2  ;;  %v8350_v12 = vpop.f32.mrf.mxu0 }
 0x22d   : > { %5533 = vmatpush3.msra.mxu1 %v3895_v28  ;;  %9591 = vst [vmem:[#allocation39_spill] sm:$0xff] %v8350_v12 }
 0x22e   : > { %v8330_v29 = vpop.f32.mrf.mxu1  ;;  %4122 = vmatmul.mubr.f32.gmra.mxu1 %v8269_v48  ;;  %v8359_v38 = vsel %vm9592_vm6, %v3757_v30, %v3758_v8  ;;  %v8362_v35 = vpop.f32.mrf.mxu0  ;;  %v3763_v30 = vrot.slane %v8076_v9, 2  ;;  %vm9664_vm6 = vmmov %vm9603_vm1 }
 0x22f   : > { %4336 = vmatprep.mubr.f32.mxu1 %v8334_v47  ;;  %9593 = vst [vmem:[#allocation40_spill] sm:$0xff] %v8362_v35 }
 0x230   : > { %v8337_v19 = vpop.f32.mrf.mxu1  ;;  %v8375_v47 = vpop.f32.mrf.mxu0 }
 0x231   : > { %9595 = vst [vmem:[#allocation41_spill] sm:$0xff] %v8375_v47  ;;  %v3767_v47 = vrot.slane %v8103_v46, 2 }
 0x232   : > { %v8342_v16 = vpop.f32.mrf.mxu1  ;;  %4337 = vmatmul.mubr.f32.vlgmr.msra.gmra.mxu1 %v8024_v44  ;;  %v8371_v44 = vsel %vm9594_vm9, %v3758_v8, %v3760_v34  ;;  %v3765_v8 = vrot.slane %v8087_v52, 2  ;;  %v8387_v34 = vpop.f32.mrf.mxu0  ;;  %vm9665_vm9 = vmmov %vm9603_vm1 }
 0x233   : > { %4341 = vmatprep.mubr.f32.mxu1 %v8346_v17  ;;  %v3762_v17 = vrot.slane %v8072_v41, 2  ;;  %9597 = vst [vmem:[#allocation42_spill] sm:$0xff] %v8387_v34 }
 0x234   : > { %v8352_v31 = vpop.f32.mrf.mxu1  ;;  %v8400_v12 = vpop.f32.mrf.mxu0 }
 0x235   : > { %9599 = vst [vmem:[#allocation43_spill] sm:$0xff] %v8400_v12  ;;  %v3772_v12 = vrot.slane %v8151_v1, 2 }
 0x236   : > { %v8355_v28 = vpop.f32.mrf.mxu1  ;;  %4342 = vmatmul.mubr.f32.gmra.mxu1 %v8036_v57  ;;  %v8384_v57 = vsel %vm9596_vm13, %v3762_v17, %v3763_v30  ;;  %v3768_v17 = vrot.slane %v8107_v13, 2  ;;  %vm9666_vm13 = vmmov %vm9603_vm1 }
 0x237   : > { %4346 = vmatprep.mubr.f32.mxu1 %v8359_v38 }
 0x238   : > { %v8364_v56 = vpop.f32.mrf.mxu1 }
 0x23a   : > { %v8367_v5 = vpop.f32.mrf.mxu1  ;;  %4347 = vmatmul.mubr.f32.gmra.mxu1 %v8051_v26  ;;  %v8396_v26 = vsel %vm9598_vm12, %v3763_v30, %v3765_v8  ;;  %v3770_v30 = vrot.slane %v8126_v25, 2  ;;  %v8412_v8 = vpop.f32.mrf.mxu0  ;;  %vm9667_vm12 = vmmov %vm9603_vm1 }
 0x23b   : > { %4351 = vmatprep.mubr.f32.mxu1 %v8371_v44  ;;  %9602 = vst [vmem:[#allocation45_spill] sm:$0xff] %v8412_v8  ;;  %v3974_v8 = vld [vmem:[%s9338_s7 + $0x478] sm:$0xff] }
 0x23c   : > { %v8377_v54 = vpop.f32.mrf.mxu1  ;;  %5907 = vmatprep.subr.mxu1 %v3974_v8 }
 0x23d   : > { %5908 = vmatpush3.msra.mxu1 %v3974_v8  ;;  %v3777_v8 = vrot.slane %v8205_v59, 2 }
 0x23e   : > { %v8380_v35 = vpop.f32.mrf.mxu1  ;;  %4352 = vmatmul.mubr.f32.gmra.mxu1 %v8064_v45  ;;  %v8409_v45 = vsel %vm9601_vm8, %v3767_v47, %v3768_v17  ;;  %v3773_v47 = vrot.slane %v8155_v33, 2  ;;  %v3775_v33 = vrot.slane %v8180_v61, 2  ;;  %vm9688_vm8 = vmmov %vm9584_vm0 }
 0x23f   : > { %4356 = vmatprep.mubr.f32.mxu1 %v8384_v57 }
 0x240   : > { %v8389_v41 = vpop.f32.mrf.mxu1  ;;  %v8437_v1 = vsel %vm9606_vm2, %v3772_v12, %v3773_v47  ;;  %v8454_v61 = vsel %vm9610_vm15, %v3773_v47, %v3775_v33  ;;  %v3972_v12 = vld [vmem:[%s9338_s7 + $0x468] sm:$0xff]  ;;  %v3780_v33 = vrot.slane %v8236_v27, 2 }
 0x242   : > { %v8392_v9 = vpop.f32.mrf.mxu1  ;;  %4357 = vmatmul.mubr.f32.gmra.mxu1 %v8081_v62  ;;  %v8421_v62 = vsel %vm9603_vm1, %v3768_v17, %v3770_v30  ;;  %v3973_v17 = vld [vmem:[%s9338_s7 + $0x470] sm:$0xff]  ;;  %vm9689_vm1 = vmmov %vm9584_vm0 }
 0x243   : > { %4361 = vmatprep.mubr.f32.mxu1 %v8396_v26  ;;  %5909 = vmatprep.subr.mxu1 %v3973_v17 }
 0x244   : > { %v8402_v52 = vpop.f32.mrf.mxu1  ;;  %5910 = vmatpush3.msra.mxu1 %v3973_v17 }
 0x245   : > { %5911 = vmatprep.subr.mxu1 %v3972_v12 }
 0x246   : > { %v8405_v34 = vpop.f32.mrf.mxu1  ;;  %4362 = vmatmul.mubr.f32.gmra.mxu1 %v8094_v50 }
 0x247   : > { %9600 = vst [vmem:[#allocation44_spill] sm:$0xff] %v8405_v34  ;;  %4366 = vmatprep.mubr.f32.mxu1 %v8409_v45  ;;  %v8425_v34 = vpop.f32.mrf.mxu0  ;;  %5912 = vmatpush3.msra.mxu1 %v3972_v12  ;;  %v8487_v12 = vld [vmem:[%s9335_s4] ss:$0 sm:$0xff] }
 0x248   : > { %v8414_v46 = vpop.f32.mrf.mxu1  ;;  %9604 = vst [vmem:[#allocation46_spill] sm:$0xff] %v8425_v34 }
 0x249   : > { %v8443_v30 = vpop.f32.mrf.mxu0 }
 0x24a   : > { %v8417_v13 = vpop.f32.mrf.mxu1  ;;  %4367 = vmatmul.mubr.f32.gmra.mxu1 %v8117_v23  ;;  %9607 = vst [vmem:[#allocation48_spill] sm:$0xff] %v8443_v30  ;;  %v3778_v30 = vrot.slane %v8209_v37, 2  ;;  %v3970_v37 = vld [vmem:[%s9338_s7 + $0x458] sm:$0xff] }
 0x24b   : > { %4371 = vmatprep.mubr.f32.mxu1 %v8421_v62  ;;  %v8448_v23 = vpop.f32.mrf.mxu0 }
 0x24c   : > { %v8427_v25 = vpop.f32.mrf.mxu1  ;;  %9609 = vst [vmem:[#allocation50_spill] sm:$0xff] %v8448_v23  ;;  %v8473_v59 = vsel %vm9613_vm14, %v3777_v8, %v3778_v30  ;;  %v5072_v8 = vadd.f32 %v8241_v60, %v8229_v11  ;;  %v2849_v11 = vadd.f32 %v7867_v4, %v8487_v12 }
 0x24d   : > { %v8467_v17 = vpop.f32.mrf.mxu0 }
 0x24e   : > { %v8433_v50 = vpop.f32.mrf.mxu1  ;;  %4372 = vmatmul.mubr.f32.gmra.mxu1 %v8139_v63  ;;  %v3971_v63 = vld [vmem:[%s9338_s7 + $0x460] sm:$0xff]  ;;  %9611 = vst [vmem:[#allocation51_spill] sm:$0xff] %v8467_v17 }
 0x24f   : > { %9605 = vst [vmem:[#allocation47_spill] sm:$0xff] %v8433_v50  ;;  %4376 = vmatprep.mubr.f32.mxu1 %v8437_v1  ;;  %5913 = vmatprep.subr.mxu1 %v3971_v63  ;;  %v8492_v17 = vpop.f32.mrf.mxu0 }
 0x250   : > { %v8445_v34 = vpop.f32.mrf.mxu1  ;;  %5914 = vmatpush3.msra.mxu1 %v3971_v63  ;;  %9615 = vst [vmem:[#allocation54_spill] sm:$0xff] %v8492_v17  ;;  %v8498_v63 = vsel %vm9616_vm3, %v3778_v30, %v3780_v33  ;;  %v3967_v30 = vld [vmem:[%s9338_s7 + $0x440] sm:$0xff]  ;;  %v5075_v33 = vadd.f32 %v8278_v42, %v8260_v18  ;;  %v2854_v42 = vadd.f32 %v7888_v22, %v8487_v12 }
 0x251   : > { %9608 = vst [vmem:[#allocation49_spill] sm:$0xff] %v8445_v34  ;;  %5915 = vmatprep.subr.mxu1 %v3970_v37  ;;  %v5152_v18 = vadd.f32 %v7978_v32, %v7963_v51  ;;  %v2859_v22 = vadd.f32 %v7917_v49, %v8487_v12 }
 0x252   : > { %v8450_v50 = vpop.f32.mrf.mxu1  ;;  %4377 = vmatmul.mubr.f32.gmra.mxu1 %v8170_v3  ;;  %v3969_v3 = vld [vmem:[%s9338_s7 + $0x450] sm:$0xff] }
 0x253   : > { %4381 = vmatprep.mubr.f32.mxu1 %v8454_v61  ;;  %5916 = vmatpush3.msra.mxu1 %v3970_v37  ;;  %v2994_v37 = vadd.f32 %v5072_v8, %v2849_v11  ;;  %v3785_v8 = vrot.slane %v8291_v7, 2  ;;  %v2999_v7 = vadd.f32 %v5075_v33, %v2854_v42  ;;  %v8551_v33 = vld [vmem:[%s6261_s19 + $0xc8] sm:$0xff] }
 0x254   : > { %v8461_v34 = vpop.f32.mrf.mxu1  ;;  %5917 = vmatprep.subr.mxu1 %v3969_v3  ;;  %v3804_v17 = vrot.slane %v8551_v33, 1 }
 0x255   : > { %5918 = vmatpush3.msra.mxu1 %v3969_v3  ;;  %v3966_v3 = vld [vmem:[%s9338_s7 + $0x438] sm:$0xff]  ;;  %v3139_v51 = vadd.f32 %v5152_v18, %v2994_v37  ;;  %v3811_v37 = vrot.slane %v8551_v33, 2 }
 0x256   : > { %v8469_v47 = vpop.f32.mrf.mxu1  ;;  %4382 = vmatmul.mubr.f32.gmra.mxu1 %v8195_v55  ;;  %v3782_v55 = vrot.slane %v8257_v58, 2  ;;  %v8515_v58 = vpop.f32.mrf.mxu0 }
 0x257   : > { %9612 = vst [vmem:[#allocation52_spill] sm:$0xff] %v8469_v47  ;;  %4386 = vmatprep.mubr.f32.mxu1 %v8473_v59  ;;  %v3783_v47 = vrot.slane %v8269_v48, 2  ;;  %9617 = vst [vmem:[#allocation55_spill] sm:$0xff] %v8515_v58 }
 0x258   : > { %v8479_v23 = vpop.f32.mrf.mxu1 }
 0x259   : > { %9614 = vst [vmem:[#allocation53_spill] sm:$0xff] %v8479_v23  ;;  %v3968_v23 = vld [vmem:[%s9338_s7 + $0x448] sm:$0xff]  ;;  %v8521_v4 = vsel %vm9618_vm4, %v3782_v55, %v3783_v47  ;;  %v5078_v55 = vadd.f32 %v8305_v21, %v8294_v24  ;;  %v8541_v58 = vsel %vm9619_vm7, %v3783_v47, %v3785_v8  ;;  %v8547_v24 = vld [vmem:[%s6261_s19 + $0xc0] sm:$0xff]  ;;  %v5158_v8 = vadd.f32 %v8038_v6, %v8026_v2 }
 0x25a   : > { %v8494_v27 = vpop.f32.mrf.mxu1  ;;  %4387 = vmatmul.mubr.f32.gmra.mxu1 %v8224_v36  ;;  %5919 = vmatprep.subr.mxu1 %v3968_v23  ;;  %v5829_v36 = vpop.f32.mrf.mxu0  ;;  %v3964_v21 = vld [vmem:[%s9338_s7 + $0x428] sm:$0xff]  ;;  %v3810_v49 = vrot.slane %v8547_v24, 2  ;;  %v3963_v47 = vld [vmem:[%s9338_s7 + $0x420] sm:$0xff] }
 0x25b   : > { %4391 = vmatprep.mubr.f32.mxu1 %v8498_v63  ;;  %5920 = vmatpush3.msra.mxu1 %v3968_v23  ;;  %v3965_v23 = vld [vmem:[%s9338_s7 + $0x430] sm:$0xff]  ;;  %v3004_v18 = vadd.f32 %v5078_v55, %v2859_v22  ;;  %v3962_v22 = vld [vmem:[%s9338_s7 + $0x418] sm:$0xff] }
 0x25c   : > { %v8507_v60 = vpop.f32.mrf.mxu1  ;;  %5921 = vmatprep.subr.mxu1 %v3967_v30  ;;  %v8568_v55 = vsel %vm9620_vm11, %v3810_v49, %v3811_v37 }
 0x25d   : > { %5922 = vmatpush3.msra.mxu1 %v3967_v30 }
 0x25e   : > { %v8517_v48 = vpop.f32.mrf.mxu1  ;;  %4392 = vmatmul.mubr.f32.gmra.mxu1 %v8251_v10  ;;  %5923 = vmatprep.subr.mxu1 %v3966_v3  ;;  %v5081_v10 = vadd.f32 %v8330_v29, %v8317_v43  ;;  %v6055_v43 = vld [vmem:[%s6261_s19 + $0xd0] sm:$0x3] }
 0x25f   : > { %4396 = vmatprep.mubr.f32.mxu1 %v8521_v4  ;;  %5924 = vmatpush3.msra.mxu1 %v3966_v3  ;;  %v5155_v3 = vadd.f32 %v8021_v39, %v8005_v14  ;;  %v3813_v29 = vrot.slane %v6055_v43, 2 }
 0x260   : > { %v5230_v11 = vpop.f32.mrf.mxu1  ;;  %5925 = vmatprep.subr.mxu1 %v3965_v23 }
 0x261   : > { %5926 = vmatpush3.msra.mxu1 %v3965_v23  ;;  %v3144_v14 = vadd.f32 %v5155_v3, %v2999_v7  ;;  %v3803_v23 = vrot.slane %v8547_v24, 1  ;;  %v2864_v7 = vadd.f32 %v7937_v53, %v8487_v12  ;;  %v3149_v3 = vadd.f32 %v5158_v8, %v3004_v18  ;;  %v3959_v18 = vld [vmem:[%s9338_s7 + $0x400] sm:$0xff] }
 0x262   : > { %v5231_v32 = vpop.f32.mrf.mxu1  ;;  %4397 = vmatmul.mubr.f32.gmra.mxu1 %v8285_v20  ;;  %5927 = vmatprep.subr.mxu1 %v3964_v21  ;;  %v8587_v8 = vsel %vm9621_vm10, %v3811_v37, %v3813_v29 }
 0x263   : > { %v5232_v30 = vadd.f32 %v5231_v32, %v5230_v11  ;;  %v3428_v32 = vpop.f32.mrf.mxu0  ;;  %4401 = vmatprep.mubr.f32.mxu1 %v8541_v58  ;;  %5928 = vmatpush3.msra.mxu1 %v3964_v21  ;;  %v8584_v53 = vsel %vm9584_vm0, %v3803_v23, %v3804_v17 }
 0x264   : > { %v5233_v42 = vpop.f32.mrf.mxu1  ;;  %5929 = vmatprep.subr.mxu1 %v3963_v47 }
 0x265   : > { %v3284_v11 = vadd.f32 %v5232_v30, %v3139_v51  ;;  %5930 = vmatpush3.msra.mxu1 %v3963_v47  ;;  %v3961_v30 = vld [vmem:[%s9338_s7 + $0x410] sm:$0xff]  ;;  %v3806_v47 = vrot.slane %v6055_v43, 1  ;;  %v5087_v43 = vadd.f32 %v8355_v28, %v8352_v31  ;;  %v9624_v31 = vld [vmem:[#allocation2_spill] sm:$0xff] }
 0x266   : > { %v5234_v39 = vpop.f32.mrf.mxu1  ;;  %4402 = vmatmul.mubr.f32.gmra.mxu1 %v8312_v40  ;;  %5931 = vmatprep.subr.mxu1 %v3962_v22  ;;  %v2874_v28 = vadd.f32 %v9624_v31, %v8487_v12 }
 0x267   : > { %v5235_v2 = vadd.f32 %v5234_v39, %v5233_v42  ;;  %v3429_v6 = vadd.f32 %v3428_v32, %v3284_v11  ;;  %v3009_v42 = vadd.f32 %v5081_v10, %v2864_v7  ;;  %v5832_v11 = vpop.f32.mrf.mxu0  ;;  %v5084_v32 = vadd.f32 %v8342_v16, %v8337_v19  ;;  %4406 = vmatprep.mubr.f32.mxu1 %v8568_v55  ;;  %v3960_v10 = vld [vmem:[%s9338_s7 + $0x408] sm:$0xff]  ;;  %v3893_v7 = vld [vmem:[%s9338_s7 + $0x1f0] sm:$0xff] }
 0x268   : > { %v5236_v51 = vpop.f32.mrf.mxu1  ;;  %5932 = vmatpush3.msra.mxu1 %v3962_v22  ;;  %v2869_v16 = vadd.f32 %v7965_v15, %v8487_v12 }
 0x269   : > { %v3289_v21 = vadd.f32 %v5235_v2, %v3144_v14  ;;  %v3507_v49 = vmax.f32 %v3429_v6, 0.0  ;;  %5933 = vmatprep.subr.mxu1 %v3961_v30  ;;  %v3878_v6 = vld [vmem:[%s9338_s7 + $0x178] sm:$0xff]  ;;  %v3438_v22 = vpop.f32.mrf.mxu0 }
 0x26a   : > { %v5237_v39 = vpop.f32.mrf.mxu1  ;;  %5934 = vmatpush3.msra.mxu1 %v3961_v30  ;;  %v3014_v15 = vadd.f32 %v5084_v32, %v2869_v16  ;;  %v3019_v16 = vadd.f32 %v5087_v43, %v2874_v28 }
 0x26b   : > { %v3434_v20 = vadd.f32 %v5829_v36, %v3289_v21  ;;  %v5238_v14 = vadd.f32 %v5237_v39, %v5236_v51  ;;  %5883 = vmatprep.mubr.f32.mxu0 %v3507_v49  ;;  %v9622_v36 = vld [vmem:[#allocation10_spill] sm:$0xff]  ;;  %4407 = vmatmul.mubr.f32.gmra.mxu1 %v8584_v53  ;;  %v3877_v21 = vld [vmem:[%s9338_s7 + $0x170] sm:$0xff]  ;;  %v9626_v49 = vld [vmem:[#allocation3_spill] sm:$0xff] }
 0x26c   : > { %v5239_v19 = vpop.f32.mrf.mxu1  ;;  %v5161_v23 = vadd.f32 %v9622_v36, %v8053_v0  ;;  %5935 = vmatprep.subr.mxu1 %v3960_v10  ;;  %4411 = vmatprep.mubr.f32.mxu1 %v8587_v8 }
 0x26d   : > { %v3508_v2 = vmax.f32 %v3434_v20, 0.0  ;;  %v3294_v37 = vadd.f32 %v5238_v14, %v3149_v3  ;;  %v8610_v20 = vsel %vm9623_vm5, %v3804_v17, %v3806_v47  ;;  %5936 = vmatpush3.msra.mxu1 %v3960_v10  ;;  %v9625_v3 = vld [vmem:[#allocation11_spill] sm:$0xff]  ;;  %v5835_v10 = vpop.f32.mrf.mxu0 }
 0x26e   : > { %v5240_v29 = vpop.f32.mrf.mxu1  ;;  %v3154_v0 = vadd.f32 %v5161_v23, %v3009_v42  ;;  %5937 = vmatprep.subr.mxu1 %v3959_v18  ;;  %v5164_v32 = vadd.f32 %v9626_v49, %v9625_v3  ;;  %v3892_v17 = vld [vmem:[%s9338_s7 + $0x1e8] sm:$0xff]  ;;  %v3891_v23 = vld [vmem:[%s9338_s7 + $0x1e0] sm:$0xff]  ;;  %v3889_v3 = vld [vmem:[%s9338_s7 + $0x1d0] sm:$0xff] }
 0x26f   : > { %v5241_v51 = vadd.f32 %v5240_v29, %v5239_v19  ;;  %5884 = vmatmul.mubr.f32.vlgmr.msra.gmra.mxu0 %v3508_v2  ;;  %v3439_v30 = vadd.f32 %v3438_v22, %v3294_v37  ;;  %5938 = vmatpush3.msra.mxu1 %v3959_v18  ;;  %v3876_v14 = vld [vmem:[%s9338_s7 + $0x168] sm:$0xff]  ;;  %v5090_v18 = vadd.f32 %v8367_v5, %v8364_v56  ;;  %v9627_v22 = vld [vmem:[#allocation9_spill] sm:$0xff] }
 0x270   : > { %v5242_v39 = vpop.f32.mrf.mxu1  ;;  %5423 = vmatpush3.msra.mxu0 %v3878_v6  ;;  %4412 = vmatmul.mubr.f32.gmra.mxu1 %v8610_v20  ;;  %v3159_v19 = vadd.f32 %v5164_v32, %v3014_v15  ;;  %v3875_v6 = vld [vmem:[%s9338_s7 + $0x160] sm:$0xff] }
 0x271   : > { %v3299_v42 = vadd.f32 %v5241_v51, %v3154_v0  ;;  %v3509_v47 = vmax.f32 %v3439_v30, 0.0  ;;  %5424 = vmatprep.subr.mxu0 %v3893_v7  ;;  %5939 = vmatprep.mubr.f32.mxu1 %v8359_v38  ;;  %v9628_v15 = vld [vmem:[#allocation18_spill] sm:$0xff]  ;;  %v3890_v7 = vld [vmem:[%s9338_s7 + $0x1d8] sm:$0xff]  ;;  %v9629_v0 = vld [vmem:[#allocation8_spill] sm:$0xff]  ;;  %v3448_v30 = vpop.f32.mrf.mxu0 }
 0x272   : > { %v5243_v36 = vpop.f32.mrf.mxu1  ;;  %5425 = vmatpush3.msra.mxu0 %v3877_v21  ;;  %v5167_v43 = vadd.f32 %v9628_v15, %v9627_v22  ;;  %v2879_v56 = vadd.f32 %v9629_v0, %v8487_v12  ;;  %v5093_v21 = vadd.f32 %v8380_v35, %v8377_v54  ;;  %v9630_v35 = vld [vmem:[#allocation20_spill] sm:$0xff]  ;;  %v3887_v15 = vld [vmem:[%s9338_s7 + $0x1c0] sm:$0xff] }
 0x273   : > { %v5244_v2 = vadd.f32 %v5243_v36, %v5242_v39  ;;  %5886 = vmatprep.mubr.f32.mxu0 %v3509_v47  ;;  %v3444_v37 = vadd.f32 %v5832_v11, %v3299_v42  ;;  %5426 = vmatprep.subr.mxu0 %v3892_v17  ;;  %v3874_v11 = vld [vmem:[%s9338_s7 + $0x158] sm:$0xff]  ;;  %v3873_v17 = vld [vmem:[%s9338_s7 + $0x150] sm:$0xff]  ;;  %v2884_v54 = vadd.f32 %v9630_v35, %v8487_v12  ;;  %v3888_v47 = vld [vmem:[%s9338_s7 + $0x1c8] sm:$0xff] }
 0x274   : > { %v5245_v29 = vpop.f32.mrf.mxu1  ;;  %5427 = vmatpush3.msra.mxu0 %v3876_v14  ;;  %5940 = vmatmul.mubr.f32.vlgmr.msra.gmra.mxu1 %v8371_v44  ;;  %v3164_v31 = vadd.f32 %v5167_v43, %v3019_v16  ;;  %v3024_v49 = vadd.f32 %v5090_v18, %v2879_v56  ;;  %v9631_v14 = vld [vmem:[#allocation19_spill] sm:$0xff]  ;;  %v9632_v16 = vld [vmem:[#allocation24_spill] sm:$0xff]  ;;  %v3871_v0 = vld [vmem:[%s9338_s7 + $0x140] sm:$0xff] }
 0x275   : > { %v3304_v5 = vadd.f32 %v5244_v2, %v3159_v19  ;;  %v3510_v51 = vmax.f32 %v3444_v37, 0.0  ;;  %5428 = vmatprep.subr.mxu0 %v3891_v23  ;;  %5942 = vmatprep.mubr.f32.mxu1 %v8384_v57  ;;  %v5170_v19 = vadd.f32 %v9632_v16, %v9631_v14  ;;  %v3872_v18 = vld [vmem:[%s9338_s7 + $0x148] sm:$0xff]  ;;  %v5838_v2 = vpop.f32.mrf.mxu0  ;;  %v3029_v37 = vadd.f32 %v5093_v21, %v2884_v54  ;;  %v9633_v56 = vld [vmem:[#allocation6_spill] sm:$0xff]  ;;  %v9637_v14 = vld [vmem:[#allocation32_spill] sm:$0xff] }
 0x276   : > { %v5246_v28 = vpop.f32.mrf.mxu1  ;;  %5429 = vmatpush3.msra.mxu0 %v3875_v6  ;;  %v5096_v6 = vadd.f32 %v8392_v9, %v8389_v41  ;;  %v2889_v41 = vadd.f32 %v9633_v56, %v8487_v12  ;;  %v9634_v9 = vld [vmem:[#allocation27_spill] sm:$0xff]  ;;  %v9638_v16 = vld [vmem:[#allocation34_spill] sm:$0xff] }
 0x277   : > { %v5247_v32 = vadd.f32 %v5246_v28, %v5245_v29  ;;  %5887 = vmatmul.mubr.f32.gmra.mxu0 %v3510_v51  ;;  %v3449_v39 = vadd.f32 %v3448_v30, %v3304_v5  ;;  %5430 = vmatprep.subr.mxu0 %v3890_v7  ;;  %v3169_v43 = vadd.f32 %v5170_v19, %v3024_v49  ;;  %v9635_v5 = vld [vmem:[#allocation30_spill] sm:$0xff]  ;;  %v3886_v30 = vld [vmem:[%s9338_s7 + $0x1b8] sm:$0xff]  ;;  %v3458_v28 = vpop.f32.mrf.mxu0 }
 0x278   : > { %v5248_v42 = vpop.f32.mrf.mxu1  ;;  %5431 = vmatpush3.msra.mxu0 %v3874_v11  ;;  %5943 = vmatmul.mubr.f32.gmra.mxu1 %v8396_v26  ;;  %v5173_v51 = vadd.f32 %v9635_v5, %v9634_v9  ;;  %v5176_v19 = vadd.f32 %v9638_v16, %v9637_v14  ;;  %v3867_v5 = vld [vmem:[%s9338_s7 + $0x120] sm:$0xff]  ;;  %v3865_v14 = vld [vmem:[%s9338_s7 + $0x110] sm:$0xff]  ;;  %v9644_v16 = vld [vmem:[#allocation5_spill] sm:$0xff] }
 0x279   : > { %v3309_v36 = vadd.f32 %v5247_v32, %v3164_v31  ;;  %v3511_v23 = vmax.f32 %v3449_v39, 0.0  ;;  %5432 = vmatprep.subr.mxu0 %v3889_v3  ;;  %5945 = vmatprep.mubr.f32.mxu1 %v8409_v45  ;;  %v3034_v3 = vadd.f32 %v5096_v6, %v2889_v41  ;;  %v3885_v39 = vld [vmem:[%s9338_s7 + $0x1b0] sm:$0xff] }
 0x27a   : > { %v5249_v22 = vpop.f32.mrf.mxu1  ;;  %5433 = vmatpush3.msra.mxu0 %v3873_v17  ;;  %v3174_v49 = vadd.f32 %v5173_v51, %v3029_v37  ;;  %v9636_v17 = vld [vmem:[#allocation44_spill] sm:$0xff] }
 0x27b   : > { %v5250_v29 = vadd.f32 %v5249_v22, %v5248_v42  ;;  %5889 = vmatprep.mubr.f32.mxu0 %v3511_v23  ;;  %v3454_v7 = vadd.f32 %v5835_v10, %v3309_v36  ;;  %5434 = vmatprep.subr.mxu0 %v3888_v47  ;;  %v3870_v10 = vld [vmem:[%s9338_s7 + $0x138] sm:$0xff]  ;;  %v5099_v35 = vadd.f32 %v9636_v17, %v8402_v52  ;;  %v3869_v47 = vld [vmem:[%s9338_s7 + $0x130] sm:$0xff]  ;;  %v3884_v23 = vld [vmem:[%s9338_s7 + $0x1a8] sm:$0xff] }
 0x27c   : > { %v5251_v11 = vpop.f32.mrf.mxu1  ;;  %5435 = vmatpush3.msra.mxu0 %v3872_v18  ;;  %5946 = vmatmul.mubr.f32.gmra.mxu1 %v8421_v62  ;;  %v9639_v18 = vld [vmem:[#allocation14_spill] sm:$0xff]  ;;  %v3868_v22 = vld [vmem:[%s9338_s7 + $0x128] sm:$0xff] }
 0x27d   : > { %v3314_v21 = vadd.f32 %v5250_v29, %v3169_v43  ;;  %v3512_v31 = vmax.f32 %v3454_v7, 0.0  ;;  %5436 = vmatprep.subr.mxu0 %v3887_v15  ;;  %5948 = vmatprep.mubr.f32.mxu1 %v8437_v1  ;;  %v2894_v52 = vadd.f32 %v9639_v18, %v8487_v12  ;;  %v5841_v15 = vpop.f32.mrf.mxu0  ;;  %v5102_v43 = vadd.f32 %v8417_v13, %v8414_v46  ;;  %v9640_v46 = vld [vmem:[#allocation16_spill] sm:$0xff] }
 0x27e   : > { %v5252_v32 = vpop.f32.mrf.mxu1  ;;  %5437 = vmatpush3.msra.mxu0 %v3871_v0  ;;  %v3179_v29 = vadd.f32 %v5176_v19, %v3034_v3  ;;  %v3883_v0 = vld [vmem:[%s9338_s7 + $0x1a0] sm:$0xff]  ;;  %v2899_v13 = vadd.f32 %v9640_v46, %v8487_v12  ;;  %v9645_v19 = vld [vmem:[#allocation39_spill] sm:$0xff] }
 0x27f   : > { %v5253_v54 = vadd.f32 %v5252_v32, %v5251_v11  ;;  %5890 = vmatmul.mubr.f32.gmra.mxu0 %v3512_v31  ;;  %v3459_v42 = vadd.f32 %v3458_v28, %v3314_v21  ;;  %5438 = vmatprep.subr.mxu0 %v3886_v30  ;;  %v3039_v56 = vadd.f32 %v5099_v35, %v2894_v52  ;;  %v3882_v11 = vld [vmem:[%s9338_s7 + $0x198] sm:$0xff]  ;;  %v9641_v30 = vld [vmem:[#allocation35_spill] sm:$0xff]  ;;  %v3468_v3 = vpop.f32.mrf.mxu0  ;;  %v3881_v35 = vld [vmem:[%s9338_s7 + $0x190] sm:$0xff] }
 0x280   : > { %v5254_v36 = vpop.f32.mrf.mxu1  ;;  %5439 = vmatpush3.msra.mxu0 %v3870_v10  ;;  %5949 = vmatmul.mubr.f32.gmra.mxu1 %v8454_v61  ;;  %v9642_v21 = vld [vmem:[#allocation37_spill] sm:$0xff]  ;;  %v9643_v32 = vld [vmem:[#allocation47_spill] sm:$0xff] }
 0x281   : > { %v3319_v37 = vadd.f32 %v5253_v54, %v3174_v49  ;;  %v3513_v6 = vmax.f32 %v3459_v42, 0.0  ;;  %5440 = vmatprep.subr.mxu0 %v3885_v39  ;;  %5951 = vmatprep.mubr.f32.mxu1 %v8473_v59  ;;  %v5179_v31 = vadd.f32 %v9642_v21, %v9641_v30  ;;  %v3044_v49 = vadd.f32 %v5102_v43, %v2899_v13  ;;  %v3880_v52 = vld [vmem:[%s9338_s7 + $0x188] sm:$0xff]  ;;  %v5844_v43 = vpop.f32.mrf.mxu0  ;;  %v3863_v13 = vld [vmem:[%s9338_s7 + $0x100] sm:$0xff] }
 0x282   : > { %v5255_v7 = vpop.f32.mrf.mxu1  ;;  %5441 = vmatpush3.msra.mxu0 %v3869_v47  ;;  %v5105_v39 = vadd.f32 %v9643_v32, %v8427_v25  ;;  %v2904_v25 = vadd.f32 %v9644_v16, %v8487_v12  ;;  %v9654_v16 = vld [vmem:[#allocation45_spill] sm:$0xff] }
 0x283   : > { %v5256_v41 = vadd.f32 %v5255_v7, %v5254_v36  ;;  %5892 = vmatprep.mubr.f32.mxu0 %v3513_v6  ;;  %v3464_v9 = vadd.f32 %v5838_v2, %v3319_v37  ;;  %5442 = vmatprep.subr.mxu0 %v3884_v23  ;;  %v3866_v2 = vld [vmem:[%s9338_s7 + $0x118] sm:$0xff]  ;;  %v3184_v54 = vadd.f32 %v5179_v31, %v3039_v56  ;;  %v9646_v36 = vld [vmem:[#allocation40_spill] sm:$0xff]  ;;  %v3879_v56 = vld [vmem:[%s9338_s7 + $0x180] sm:$0xff] }
 0x284   : > { %v5257_v51 = vpop.f32.mrf.mxu1  ;;  %5443 = vmatpush3.msra.mxu0 %v3868_v22  ;;  %5952 = vmatmul.mubr.f32.gmra.mxu1 %v8498_v63  ;;  %v5182_v23 = vadd.f32 %v9646_v36, %v9645_v19  ;;  %v3864_v22 = vld [vmem:[%s9338_s7 + $0x108] sm:$0xff]  ;;  %v9650_v31 = vld [vmem:[#allocation13_spill] sm:$0xff] }
 0x285   : > { %v3324_v10 = vadd.f32 %v5256_v41, %v3179_v29  ;;  %v3514_v28 = vmax.f32 %v3464_v9, 0.0  ;;  %5444 = vmatprep.subr.mxu0 %v3883_v0  ;;  %5954 = vmatprep.mubr.f32.mxu1 %v8521_v4  ;;  %v3049_v29 = vadd.f32 %v5105_v39, %v2904_v25  ;;  %v9647_v41 = vld [vmem:[#allocation49_spill] sm:$0xff] }
 0x286   : > { %v5258_v17 = vpop.f32.mrf.mxu1  ;;  %5445 = vmatpush3.msra.mxu0 %v3867_v5  ;;  %v3189_v7 = vadd.f32 %v5182_v23, %v3044_v49  ;;  %v5108_v9 = vadd.f32 %v8450_v50, %v9647_v41  ;;  %v2909_v50 = vadd.f32 %v9650_v31, %v8487_v12  ;;  %v9658_v41 = vld [vmem:[#allocation25_spill] sm:$0xff]  ;;  %v9659_v31 = vld [vmem:[#allocation28_spill] sm:$0xff] }
 0x287   : > { %v5259_v42 = vadd.f32 %v5258_v17, %v5257_v51  ;;  %5893 = vmatmul.mubr.f32.gmra.mxu0 %v3514_v28  ;;  %v3469_v47 = vadd.f32 %v3468_v3, %v3324_v10  ;;  %5446 = vmatprep.subr.mxu0 %v3882_v11  ;;  %v9648_v51 = vld [vmem:[#allocation41_spill] sm:$0xff]  ;;  %v9649_v11 = vld [vmem:[#allocation42_spill] sm:$0xff] }
 0x288   : > { %v5260_v18 = vpop.f32.mrf.mxu1  ;;  %5447 = vmatpush3.msra.mxu0 %v3866_v2  ;;  %5955 = vmatmul.mubr.f32.gmra.mxu1 %v8541_v58  ;;  %v5185_v30 = vadd.f32 %v9649_v11, %v9648_v51  ;;  %v9651_v2 = vld [vmem:[#allocation52_spill] sm:$0xff]  ;;  %v3054_v39 = vadd.f32 %v5108_v9, %v2909_v50  ;;  %v2919_v9 = vadd.f32 %v9658_v41, %v8487_v12 }
 0x289   : > { %v3329_v37 = vadd.f32 %v5259_v42, %v3184_v54  ;;  %v3515_v6 = vmax.f32 %v3469_v47, 0.0  ;;  %5448 = vmatprep.subr.mxu0 %v3881_v35  ;;  %5957 = vmatprep.mubr.f32.mxu1 %v8568_v55  ;;  %v3958_v55 = vld [vmem:[%s9338_s7 + $0x3f8] sm:$0xff]  ;;  %v5111_v3 = vadd.f32 %v9651_v2, %v8461_v34  ;;  %v2924_v50 = vadd.f32 %v9659_v31, %v8487_v12  ;;  %v6063_v31 = vld [vmem:[%s6261_s19 + $0x20] sm:$0xff] }
 0x28a   : > { %v5261_v0 = vpop.f32.mrf.mxu1  ;;  %5449 = vmatpush3.msra.mxu0 %v3865_v14  ;;  %v3194_v49 = vadd.f32 %v5185_v30, %v3049_v29  ;;  %v9652_v54 = vld [vmem:[#allocation21_spill] sm:$0xff]  ;;  %v9653_v14 = vld [vmem:[#allocation43_spill] sm:$0xff]  ;;  %v9656_v29 = vld [vmem:[#allocation46_spill] sm:$0xff] }
 0x28b   : > { %v5262_v5 = vadd.f32 %v5261_v0, %v5260_v18  ;;  %5895 = vmatprep.mubr.f32.mxu0 %v3515_v6  ;;  %v3474_v46 = vadd.f32 %v5841_v15, %v3329_v37  ;;  %5450 = vmatprep.subr.mxu0 %v3880_v52  ;;  %v3478_v15 = vpop.f32.mrf.mxu0  ;;  %v2914_v42 = vadd.f32 %v9652_v54, %v8487_v12  ;;  %v9655_v18 = vld [vmem:[#allocation53_spill] sm:$0xff]  ;;  %v9662_v54 = vld [vmem:[#allocation54_spill] sm:$0xff] }
 0x28c   : > { %v5263_v21 = vpop.f32.mrf.mxu1  ;;  %5451 = vmatpush3.msra.mxu0 %v3864_v22  ;;  %5958 = vmatmul.mubr.f32.gmra.mxu1 %v8587_v8  ;;  %v5188_v25 = vadd.f32 %v9654_v16, %v9653_v14  ;;  %v5114_v52 = vadd.f32 %v8494_v27, %v9655_v18  ;;  %v5117_v27 = vadd.f32 %v8517_v48, %v8507_v60 }
 0x28d   : > { %v3334_v10 = vadd.f32 %v5262_v5, %v3189_v7  ;;  %v3516_v28 = vmax.f32 %v3474_v46, 0.0  ;;  %5452 = vmatprep.subr.mxu0 %v3879_v56  ;;  %v3059_v36 = vadd.f32 %v5111_v3, %v2914_v42  ;;  %v5847_v23 = vpop.f32.mrf.mxu0  ;;  %v9657_v7 = vld [vmem:[#allocation48_spill] sm:$0xff]  ;;  %v9663_v42 = vld [vmem:[#allocation55_spill] sm:$0xff] }
 0x28e   : > { %v5264_v32 = vpop.f32.mrf.mxu1  ;;  %5453 = vmatpush3.msra.mxu0 %v3863_v13  ;;  %v3199_v37 = vadd.f32 %v5188_v25, %v3054_v39  ;;  %v5191_v0 = vadd.f32 %v9657_v7, %v9656_v29  ;;  %v3064_v30 = vadd.f32 %v5114_v52, %v2919_v9  ;;  %v3069_v39 = vadd.f32 %v5117_v27, %v2924_v50  ;;  %v6056_v52 = vld [vmem:[%s6261_s19] sm:$0xff]  ;;  %v8786_v29 = vld [vmem:[%s6261_s19 + $0xd8] sm:$0xff] }
 0x28f   : > { %v5265_v17 = vadd.f32 %v5264_v32, %v5263_v21  ;;  %5896 = vmatmul.mubr.f32.gmra.mxu0 %v3516_v28  ;;  %v3479_v35 = vadd.f32 %v3478_v15, %v3334_v10  ;;  %5582 = vmatprep.subr.mxu0 %v3958_v55  ;;  %v3488_v13 = vpop.f32.mrf.mxu0  ;;  %v9660_v10 = vld [vmem:[#allocation50_spill] sm:$0xff]  ;;  %v9661_v28 = vld [vmem:[#allocation51_spill] sm:$0xff]  ;;  %v3824_v7 = vrot.slane %v8786_v29, 2  ;;  %v3942_v27 = vld [vmem:[%s9338_s7 + $0x378] sm:$0xff] }
 0x290   : > { %v5266_v47 = vpop.f32.mrf.mxu1  ;;  %v3204_v51 = vadd.f32 %v5191_v0, %v3059_v36  ;;  %v5194_v15 = vadd.f32 %v9661_v28, %v9660_v10  ;;  %v8790_v0 = vld [vmem:[%s6261_s19 + $0xe0] sm:$0xff]  ;;  %v3956_v10 = vld [vmem:[%s9338_s7 + $0x3e8] sm:$0xff] }
 0x291   : > { %v3339_v8 = vadd.f32 %v5265_v17, %v3194_v49  ;;  %v3517_v19 = vmax.f32 %v3479_v35, 0.0  ;;  %v5850_v49 = vpop.f32.mrf.mxu0  ;;  %v3940_v28 = vld [vmem:[%s9338_s7 + $0x368] sm:$0xff] }
 0x292   : > { %v5267_v34 = vpop.f32.mrf.mxu1  ;;  %v3209_v17 = vadd.f32 %v5194_v15, %v3064_v30  ;;  %v3955_v15 = vld [vmem:[%s9338_s7 + $0x3e0] sm:$0xff] }
 0x293   : > { %v5268_v6 = vadd.f32 %v5267_v34, %v5266_v47  ;;  %5898 = vmatprep.mubr.f32.mxu0 %v3517_v19  ;;  %v3484_v22 = vadd.f32 %v5844_v43, %v3339_v8  ;;  %v5197_v47 = vadd.f32 %v9663_v42, %v9662_v54  ;;  %v3498_v16 = vpop.f32.mrf.mxu0  ;;  %v3936_v54 = vld [vmem:[%s9338_s7 + $0x348] sm:$0xff] }
 0x294   : > { %v5269_v56 = vpop.f32.mrf.mxu1 }
 0x295   : > { %v3344_v5 = vadd.f32 %v5268_v6, %v3199_v37  ;;  %v3518_v46 = vmax.f32 %v3484_v22, 0.0  ;;  %v3214_v8 = vadd.f32 %v5197_v47, %v3069_v39  ;;  %v3747_v37 = vrot.slane %v6056_v52, 2  ;;  %v6057_v6 = vld [vmem:[%s6261_s19 + $0x8] sm:$0xff]  ;;  %v3953_v39 = vld [vmem:[%s9338_s7 + $0x3d0] sm:$0xff]  ;;  %v3951_v47 = vld [vmem:[%s9338_s7 + $0x3c0] sm:$0xff] }
 0x296   : > { %v5270_v11 = vpop.f32.mrf.mxu1  ;;  %v3748_v22 = vrot.slane %v6057_v6, 2  ;;  %v3948_v6 = vld [vmem:[%s9338_s7 + $0x3a8] sm:$0xff] }
 0x297   : > { %v5271_v21 = vadd.f32 %v5270_v11, %v5269_v56  ;;  %5899 = vmatmul.mubr.f32.gmra.mxu0 %v3518_v46  ;;  %v3489_v55 = vadd.f32 %v3488_v13, %v3344_v5  ;;  %v3825_v56 = vrot.slane %v8790_v0, 2  ;;  %v8795_v5 = vld [vmem:[%s6261_s19 + $0xe8] sm:$0x3]  ;;  %v6061_v13 = vld [vmem:[%s6261_s19 + $0x18] sm:$0xff]  ;;  %v6062_v11 = vld [vmem:[%s6261_s19 + $0x10] sm:$0x3] }
 0x298   : > { %v5272_v43 = vpop.f32.mrf.mxu1  ;;  %v3827_v46 = vrot.slane %v8795_v5, 2  ;;  %v3750_v30 = vrot.slane %v6062_v11, 2 }
 0x299   : > { %v3349_v2 = vadd.f32 %v5271_v21, %v3204_v51  ;;  %v3519_v3 = vmax.f32 %v3489_v55, 0.0  ;;  %v3826_v9 = vsel %vm9664_vm6, %v3824_v7, %v3825_v56  ;;  %v3749_v51 = vsel %vm9665_vm9, %v3747_v37, %v3748_v22  ;;  %v3957_v55 = vld [vmem:[%s9338_s7 + $0x3f0] sm:$0xff] }
 0x29a   : > { %v5273_v32 = vpop.f32.mrf.mxu1  ;;  %5960 = vmatprep.mubr.f32.mxu1 %v3826_v9  ;;  %v3828_v21 = vsel %vm9666_vm13, %v3825_v56, %v3827_v46  ;;  %v3751_v50 = vsel %vm9667_vm12, %v3748_v22, %v3750_v30  ;;  %v8879_v37 = vld [vmem:[%s6261_s19 + $0x50] sm:$0xff]  ;;  %v3947_v56 = vld [vmem:[%s9338_s7 + $0x3a0] sm:$0xff] }
 0x29b   : > { %v5274_v35 = vadd.f32 %v5273_v32, %v5272_v43  ;;  %5901 = vmatprep.mubr.f32.mxu0 %v3519_v3  ;;  %v3494_v60 = vadd.f32 %v5847_v23, %v3349_v2  ;;  %5961 = vmatmul.mubr.f32.gmra.mxu1 %v3828_v21  ;;  %v3941_v43 = vld [vmem:[%s9338_s7 + $0x370] sm:$0xff]  ;;  %v3939_v2 = vld [vmem:[%s9338_s7 + $0x360] sm:$0xff]  ;;  %v3938_v32 = vld [vmem:[%s9338_s7 + $0x358] sm:$0xff] }
 0x29c   : > { %v5275_v48 = vpop.f32.mrf.mxu1  ;;  %v8826_v3 = vld [vmem:[%s6261_s19 + $0x30] sm:$0xff]  ;;  %v8898_v46 = vld [vmem:[%s6261_s19 + $0x60] sm:$0xff] }
 0x29d   : > { %v3354_v14 = vadd.f32 %v5274_v35, %v3209_v17  ;;  %v3520_v12 = vmax.f32 %v3494_v60, 0.0  ;;  %v9668_v17 = vld [vmem:[#allocation36_spill] sm:$0xff]  ;;  %v8843_v60 = vld [vmem:[%s6261_s19 + $0x38] sm:$0xff] }
 0x29e   : > { %v5276_v25 = vpop.f32.mrf.mxu1  ;;  %v3937_v35 = vld [vmem:[%s9338_s7 + $0x350] sm:$0xff] }
 0x29f   : > { %v5277_v19 = vadd.f32 %v5276_v25, %v5275_v48  ;;  %5902 = vmatmul.mubr.f32.gmra.mxu0 %v3520_v12  ;;  %v3499_v36 = vadd.f32 %v3498_v16, %v3354_v14  ;;  %v3952_v48 = vld [vmem:[%s9338_s7 + $0x3c8] sm:$0xff]  ;;  %v9669_v14 = vld [vmem:[#allocation38_spill] sm:$0xff]  ;;  %v3945_v30 = vld [vmem:[%s9338_s7 + $0x390] sm:$0xff] }
 0x2a0   : > { %v3935_v12 = vld [vmem:[%s9338_s7 + $0x340] sm:$0xff]  ;;  %v8860_v25 = vld [vmem:[%s6261_s19 + $0x48] sm:$0xff] }
 0x2a1   : > { %v3359_v34 = vadd.f32 %v5277_v19, %v3214_v8  ;;  %v3521_v18 = vmax.f32 %v3499_v36, 0.0  ;;  %v3950_v8 = vld [vmem:[%s9338_s7 + $0x3b8] sm:$0xff] }
 0x2a2   : > { %v3934_v36 = vld [vmem:[%s9338_s7 + $0x338] sm:$0xff] }
 0x2a3   : > { %5904 = vmatprep.mubr.f32.mxu0 %v3521_v18  ;;  %v3504_v23 = vadd.f32 %v5850_v49, %v3359_v34  ;;  %v3954_v49 = vld [vmem:[%s9338_s7 + $0x3d8] sm:$0xff]  ;;  %v3949_v18 = vld [vmem:[%s9338_s7 + $0x3b0] sm:$0xff] }
 0x2a5   : > { %v3522_v41 = vmax.f32 %v3504_v23, 0.0  ;;  %v3933_v23 = vld [vmem:[%s9338_s7 + $0x330] sm:$0xff] }
 0x2a7   : > { %5905 = vmatmul.mubr.f32.gmra.mxu0 %v3522_v41  ;;  %v3931_v41 = vld [vmem:[%s9338_s7 + $0x320] sm:$0xff] }
 0x2a8   : > { %4191 = vmatprep.mubr.f32.mxu0 %v6061_v13  ;;  %v3946_v13 = vld [vmem:[%s9338_s7 + $0x398] sm:$0xff] }
 0x2ab   : > { %4192 = vmatmul.mubr.f32.vlgmr.msra.gmra.mxu0 %v3749_v51 }
 0x2ac   : > { %5583 = vmatpush3.msra.mxu0 %v3942_v27  ;;  %4196 = vmatprep.mubr.f32.mxu0 %v6063_v31  ;;  %v3929_v27 = vld [vmem:[%s9338_s7 + $0x310] sm:$0xff] }
 0x2ad   : > { %5584 = vmatprep.subr.mxu0 %v3957_v55  ;;  %v8917_v55 = vld [vmem:[%s6261_s19 + $0x68] sm:$0xff] }
 0x2ae   : > { %5585 = vmatpush3.msra.mxu0 %v3941_v43  ;;  %v3944_v43 = vld [vmem:[%s9338_s7 + $0x388] sm:$0xff] }
 0x2af   : > { %4197 = vmatmul.mubr.f32.gmra.mxu0 %v3751_v50  ;;  %5586 = vmatprep.subr.mxu0 %v3956_v10  ;;  %v3943_v10 = vld [vmem:[%s9338_s7 + $0x380] sm:$0xff] }
 0x2b0   : > { %4201 = vmatprep.mubr.f32.mxu0 %v8826_v3  ;;  %5587 = vmatpush3.msra.mxu0 %v3940_v28  ;;  %v3927_v28 = vld [vmem:[%s9338_s7 + $0x300] sm:$0xff] }
 0x2b1   : > { %5588 = vmatprep.subr.mxu0 %v3955_v15  ;;  %v5374_v42 = vpop.f32.mrf.mxu1 }
 0x2b2   : > { %5589 = vmatpush3.msra.mxu0 %v3939_v2  ;;  %v8936_v2 = vld [vmem:[%s6261_s19 + $0x78] sm:$0xff] }
 0x2b3   : > { %4202 = vmatmul.mubr.f32.gmra.mxu0 %v9668_v17  ;;  %5590 = vmatprep.subr.mxu0 %v3954_v49  ;;  %v5375_v16 = vpop.f32.mrf.mxu1 }
 0x2b4   : > { %4206 = vmatprep.mubr.f32.mxu0 %v8843_v60  ;;  %5591 = vmatpush3.msra.mxu0 %v3938_v32  ;;  %v8866_v19 = vadd.f32 %v5375_v16, %v5374_v42 }
 0x2b5   : > { %5592 = vmatprep.subr.mxu0 %v3953_v39  ;;  %v5377_v34 = vpop.f32.mrf.mxu1  ;;  %v8943_v39 = vld [vmem:[%s6261_s19 + $0x80] sm:$0xff] }
 0x2b6   : > { %5593 = vmatpush3.msra.mxu0 %v3937_v35 }
 0x2b7   : > { %4207 = vmatmul.mubr.f32.gmra.mxu0 %v9669_v14  ;;  %5594 = vmatprep.subr.mxu0 %v3952_v48  ;;  %v5378_v52 = vpop.f32.mrf.mxu1  ;;  %v6073_v14 = vld [vmem:[%s6261_s19 + $0x98] sm:$0xff] }
 0x2b8   : > { %4211 = vmatprep.mubr.f32.mxu0 %v8860_v25  ;;  %5595 = vmatpush3.msra.mxu0 %v3936_v54  ;;  %v8885_v22 = vadd.f32 %v5378_v52, %v5377_v34  ;;  %v6072_v54 = vld [vmem:[%s6261_s19 + $0x90] sm:$0xff] }
 0x2b9   : > { %5596 = vmatprep.subr.mxu0 %v3951_v47  ;;  %v5380_v7 = vpop.f32.mrf.mxu1 }
 0x2ba   : > { %5597 = vmatpush3.msra.mxu0 %v3935_v12 }
 0x2bb   : > { %4212 = vmatmul.mubr.f32.gmra.mxu0 %v8359_v38  ;;  %5598 = vmatprep.subr.mxu0 %v3950_v8  ;;  %v3932_v38 = vld [vmem:[%s9338_s7 + $0x328] sm:$0xff]  ;;  %v5381_v9 = vpop.f32.mrf.mxu1 }
 0x2bc   : > { %4216 = vmatprep.mubr.f32.mxu0 %v8879_v37  ;;  %5599 = vmatpush3.msra.mxu0 %v3934_v36  ;;  %v8904_v51 = vadd.f32 %v5381_v9, %v5380_v7  ;;  %v6074_v36 = vld [vmem:[%s6261_s19 + $0xa8] sm:$0xff]  ;;  %v9673_v9 = vld [vmem:[#allocation22_spill] sm:$0xff] }
 0x2bd   : > { %5600 = vmatprep.subr.mxu0 %v3949_v18  ;;  %v5383_v11 = vpop.f32.mrf.mxu1 }
 0x2be   : > { %5601 = vmatpush3.msra.mxu0 %v3933_v23  ;;  %v6075_v23 = vld [vmem:[%s6261_s19 + $0xb0] sm:$0xff] }
 0x2bf   : > { %4217 = vmatmul.mubr.f32.gmra.mxu0 %v8371_v44  ;;  %5602 = vmatprep.subr.mxu0 %v3948_v6  ;;  %v3930_v44 = vld [vmem:[%s9338_s7 + $0x318] sm:$0xff]  ;;  %v5384_v21 = vpop.f32.mrf.mxu1 }
 0x2c0   : > { %4221 = vmatprep.mubr.f32.mxu0 %v8898_v46  ;;  %5603 = vmatpush3.msra.mxu0 %v3932_v38  ;;  %v8923_v31 = vadd.f32 %v5384_v21, %v5383_v11  ;;  %v9675_v11 = vld [vmem:[#allocation4_spill] sm:$0xff] }
 0x2c1   : > { %5604 = vmatprep.subr.mxu0 %v3947_v56  ;;  %v5386_v50 = vpop.f32.mrf.mxu1  ;;  %v9677_v21 = vld [vmem:[#allocation12_spill] sm:$0xff] }
 0x2c2   : > { %5605 = vmatpush3.msra.mxu0 %v3931_v41 }
 0x2c3   : > { %4222 = vmatmul.mubr.f32.gmra.mxu0 %v8384_v57  ;;  %5606 = vmatprep.subr.mxu0 %v3946_v13  ;;  %v3928_v57 = vld [vmem:[%s9338_s7 + $0x308] sm:$0xff]  ;;  %v5387_v15 = vpop.f32.mrf.mxu1 }
 0x2c4   : > { %4226 = vmatprep.mubr.f32.mxu0 %v8917_v55  ;;  %5607 = vmatpush3.msra.mxu0 %v3930_v44  ;;  %v8939_v49 = vadd.f32 %v5387_v15, %v5386_v50  ;;  %v9679_v50 = vld [vmem:[#allocation17_spill] sm:$0xff] }
 0x2c5   : > { %5608 = vmatprep.subr.mxu0 %v3945_v30  ;;  %v5389_v32 = vpop.f32.mrf.mxu1  ;;  %v9685_v15 = vld [vmem:[#allocation29_spill] sm:$0xff] }
 0x2c6   : > { %5609 = vmatpush3.msra.mxu0 %v3929_v27 }
 0x2c7   : > { %4227 = vmatmul.mubr.f32.gmra.mxu0 %v8396_v26  ;;  %5610 = vmatprep.subr.mxu0 %v3944_v43  ;;  %v5390_v26 = vpop.f32.mrf.mxu1 }
 0x2c8   : > { %4231 = vmatprep.mubr.f32.mxu0 %v8936_v2  ;;  %5611 = vmatpush3.msra.mxu0 %v3928_v57  ;;  %v8946_v17 = vadd.f32 %v5390_v26, %v5389_v32  ;;  %v9687_v32 = vld [vmem:[#allocation33_spill] sm:$0xff]  ;;  %v3820_v26 = vrot.slane %v8795_v5, 1 }
 0x2c9   : > { %5612 = vmatprep.subr.mxu0 %v3943_v10  ;;  %v5392_v35 = vpop.f32.mrf.mxu1  ;;  %v9681_v10 = vld [vmem:[#allocation7_spill] sm:$0xff] }
 0x2ca   : > { %5613 = vmatpush3.msra.mxu0 %v3927_v28  ;;  %v9683_v28 = vld [vmem:[#allocation23_spill] sm:$0xff] }
 0x2cb   : > { %4232 = vmatmul.mubr.f32.gmra.mxu0 %v8409_v45  ;;  %v5393_v48 = vpop.f32.mrf.mxu1 }
 0x2cc   : > { %4236 = vmatprep.mubr.f32.mxu0 %v8943_v39  ;;  %v8950_v42 = vadd.f32 %v5393_v48, %v5392_v35 }
 0x2cd   : > { %v5395_v47 = vpop.f32.mrf.mxu1 }
 0x2cf   : > { %4237 = vmatmul.mubr.f32.gmra.mxu0 %v8421_v62  ;;  %v5396_v45 = vpop.f32.mrf.mxu1 }
 0x2d0   : > { %4241 = vmatprep.mubr.f32.mxu0 %v6072_v54  ;;  %v8954_v12 = vadd.f32 %v5396_v45, %v5395_v47 }
 0x2d1   : > { %v5398_v16 = vpop.f32.mrf.mxu1 }
 0x2d3   : > { %4242 = vmatmul.mubr.f32.gmra.mxu0 %v8437_v1  ;;  %v5399_v8 = vpop.f32.mrf.mxu1 }
 0x2d4   : > { %4246 = vmatprep.mubr.f32.mxu0 %v6073_v14  ;;  %v8958_v62 = vadd.f32 %v5399_v8, %v5398_v16 }
 0x2d5   : > { %v5401_v34 = vpop.f32.mrf.mxu1 }
 0x2d7   : > { %4247 = vmatmul.mubr.f32.gmra.mxu0 %v8454_v61  ;;  %v5402_v18 = vpop.f32.mrf.mxu1 }
 0x2d8   : > { %4251 = vmatprep.mubr.f32.mxu0 %v6074_v36  ;;  %v8962_v1 = vadd.f32 %v5402_v18, %v5401_v34 }
 0x2d9   : > { %v5404_v52 = vpop.f32.mrf.mxu1 }
 0x2da   : > { %9670 = vst [vmem:[#allocation10_spill] sm:$0xff] %v8962_v1 }
 0x2db   : > { %4252 = vmatmul.mubr.f32.gmra.mxu0 %v8473_v59  ;;  %v5405_v6 = vpop.f32.mrf.mxu1 }
 0x2dc   : > { %4256 = vmatprep.mubr.f32.mxu0 %v6075_v23  ;;  %v8966_v61 = vadd.f32 %v5405_v6, %v5404_v52 }
 0x2dd   : > { %v5407_v38 = vpop.f32.mrf.mxu1 }
 0x2de   : > { %9671 = vst [vmem:[#allocation2_spill] sm:$0xff] %v8966_v61 }
 0x2df   : > { %4257 = vmatmul.mubr.f32.gmra.mxu0 %v8498_v63  ;;  %v5408_v7 = vpop.f32.mrf.mxu1 }
 0x2e0   : > { %4261 = vmatprep.mubr.f32.mxu0 %v8547_v24  ;;  %v8970_v59 = vadd.f32 %v5408_v7, %v5407_v38 }
 0x2e2   : > { %9672 = vst [vmem:[#allocation11_spill] sm:$0xff] %v8970_v59  ;;  %v5410_v56 = vpop.f32.mrf.mxu1 }
 0x2e3   : > { %4262 = vmatmul.mubr.f32.gmra.mxu0 %v8521_v4 }
 0x2e4   : > { %4266 = vmatprep.mubr.f32.mxu0 %v8551_v33  ;;  %v5411_v41 = vpop.f32.mrf.mxu1 }
 0x2e5   : > { %v8974_v63 = vadd.f32 %v5411_v41, %v5410_v56 }
 0x2e6   : > { %v5413_v13 = vpop.f32.mrf.mxu1 }
 0x2e7   : > { %4267 = vmatmul.mubr.f32.gmra.mxu0 %v8541_v58  ;;  %9674 = vst [vmem:[#allocation3_spill] sm:$0xff] %v8974_v63 }
 0x2e8   : > { %4481 = vmatprep.mubr.f32.mxu0 %v9673_v9  ;;  %v5414_v44 = vpop.f32.mrf.mxu1 }
 0x2e9   : > { %v8978_v4 = vadd.f32 %v5414_v44, %v5413_v13 }
 0x2ea   : > { %v5416_v30 = vpop.f32.mrf.mxu1 }
 0x2eb   : > { %4482 = vmatmul.mubr.f32.vlgmr.msra.gmra.mxu0 %v8826_v3  ;;  %9676 = vst [vmem:[#allocation9_spill] sm:$0xff] %v8978_v4 }
 0x2ec   : > { %4486 = vmatprep.mubr.f32.mxu0 %v9675_v11  ;;  %v5417_v27 = vpop.f32.mrf.mxu1 }
 0x2ed   : > { %v8982_v58 = vadd.f32 %v5417_v27, %v5416_v30 }
 0x2ee   : > { %v5419_v43 = vpop.f32.mrf.mxu1 }
 0x2ef   : > { %4487 = vmatmul.mubr.f32.gmra.mxu0 %v8843_v60  ;;  %9678 = vst [vmem:[#allocation18_spill] sm:$0xff] %v8982_v58  ;;  %v9682_v60 = vld [vmem:[#allocation15_spill] sm:$0xff] }
 0x2f0   : > { %4491 = vmatprep.mubr.f32.mxu0 %v9677_v21  ;;  %v5420_v57 = vpop.f32.mrf.mxu1 }
 0x2f1   : > { %v8986_v3 = vadd.f32 %v5420_v57, %v5419_v43 }
 0x2f3   : > { %4492 = vmatmul.mubr.f32.gmra.mxu0 %v8860_v25  ;;  %9680 = vst [vmem:[#allocation8_spill] sm:$0xff] %v8986_v3  ;;  %v9684_v25 = vld [vmem:[#allocation26_spill] sm:$0xff] }
 0x2f4   : > { %4496 = vmatprep.mubr.f32.mxu0 %v9679_v50 }
 0x2f7   : > { %4497 = vmatmul.mubr.f32.gmra.mxu0 %v8879_v37  ;;  %v9686_v37 = vld [vmem:[#allocation31_spill] sm:$0xff] }
 0x2f8   : > { %4501 = vmatprep.mubr.f32.mxu0 %v9681_v10 }
 0x2fb   : > { %4502 = vmatmul.mubr.f32.gmra.mxu0 %v8898_v46  ;;  %v3817_v46 = vrot.slane %v8786_v29, 1 }
 0x2fc   : > { %4506 = vmatprep.mubr.f32.mxu0 %v9682_v60 }
 0x2ff   : > { %4507 = vmatmul.mubr.f32.gmra.mxu0 %v8917_v55  ;;  %v3818_v55 = vrot.slane %v8790_v0, 1 }
 0x300   : > { %4511 = vmatprep.mubr.f32.mxu0 %v9683_v28 }
 0x303   : > { %4512 = vmatmul.mubr.f32.gmra.mxu0 %v8936_v2  ;;  %v3819_v2 = vsel %vm9688_vm8, %v3817_v46, %v3818_v55 }
 0x304   : > { %4516 = vmatprep.mubr.f32.mxu0 %v9684_v25 }
 0x307   : > { %4517 = vmatmul.mubr.f32.gmra.mxu0 %v8943_v39 }
 0x308   : > { %4521 = vmatprep.mubr.f32.mxu0 %v9685_v15 }
 0x30b   : > { %4522 = vmatmul.mubr.f32.gmra.mxu0 %v6072_v54 }
 0x30c   : > { %4526 = vmatprep.mubr.f32.mxu0 %v9686_v37 }
 0x30f   : > { %4527 = vmatmul.mubr.f32.gmra.mxu0 %v6073_v14 }
 0x310   : > { %4531 = vmatprep.mubr.f32.mxu0 %v9687_v32 }
 0x313   : > { %4532 = vmatmul.mubr.f32.gmra.mxu0 %v6074_v36 }
 0x314   : > { %4536 = vmatprep.mubr.f32.mxu0 %v8312_v40  ;;  %v3821_v40 = vsel %vm9689_vm1, %v3818_v55, %v3820_v26 }
 0x317   : > { %4537 = vmatmul.mubr.f32.gmra.mxu0 %v6075_v23 }
 0x318   : > { %4541 = vmatprep.mubr.f32.mxu0 %v8584_v53  ;;  %v9012_v53 = vpop.f32.mrf.mxu1 }
 0x31a   : > { %v9014_v39 = vpop.f32.mrf.mxu1 }
 0x31b   : > { %4542 = vmatmul.mubr.f32.gmra.mxu0 %v8547_v24 }
 0x31c   : > { %4546 = vmatprep.mubr.f32.mxu0 %v8610_v20  ;;  %v9016_v24 = vpop.f32.mrf.mxu1 }
 0x31e   : > { %v9018_v20 = vpop.f32.mrf.mxu1 }
 0x31f   : > { %4547 = vmatmul.mubr.f32.gmra.mxu0 %v8551_v33 }
 0x320   : > { %4551 = vmatprep.mubr.f32.mxu0 %v3819_v2  ;;  %v9022_v5 = vpop.f32.mrf.mxu1 }
 0x322   : > { %v9026_v48 = vpop.f32.mrf.mxu1 }
 0x323   : > { %4552 = vmatmul.mubr.f32.gmra.mxu0 %v8786_v29 }
 0x324   : > { %4556 = vmatprep.mubr.f32.mxu0 %v3821_v40  ;;  %v9030_v54 = vpop.f32.mrf.mxu1 }
 0x326   : > { %v9036_v45 = vpop.f32.mrf.mxu1 }
 0x327   : > { %4557 = vmatmul.mubr.f32.gmra.mxu0 %v8790_v0 }
 0x328   : > { %v9040_v16 = vpop.f32.mrf.mxu1 }
 0x32a   : > { %v9044_v36 = vpop.f32.mrf.mxu1 }
 0x32c   : > { %v9050_v23 = vpop.f32.mrf.mxu1 }
 0x32e   : > { %v9054_v6 = vpop.f32.mrf.mxu1 }
 0x32f   : > { %v9020_v35 = vpop.f32.mrf.mxu0 }
 0x330   : > { %v9058_v7 = vpop.f32.mrf.mxu1 }
 0x331   : > { %v9024_v33 = vpop.f32.mrf.mxu0 }
 0x332   : > { %v9064_v9 = vpop.f32.mrf.mxu1 }
 0x334   : > { %v9068_v44 = vpop.f32.mrf.mxu1 }
 0x336   : > { %v9074_v27 = vpop.f32.mrf.mxu1 }
 0x337   : > { %v9028_v29 = vpop.f32.mrf.mxu0 }
 0x338   : > { %v9076_v57 = vpop.f32.mrf.mxu1 }
 0x339   : > { %v9032_v0 = vpop.f32.mrf.mxu0 }
 0x33a   : > { %v9078_v60 = vpop.f32.mrf.mxu1 }
 0x33c   : > { %v9080_v15 = vpop.f32.mrf.mxu1 }
 0x33d   : > { %9699 = vst [vmem:[#allocation14_spill] sm:$0xff] %v9080_v15 }
 0x33e   : > { %v9086_v46 = vpop.f32.mrf.mxu1 }
 0x33f   : > { %v9034_v47 = vpop.f32.mrf.mxu0  ;;  %9700 = vst [vmem:[#allocation16_spill] sm:$0xff] %v9086_v46 }
 0x340   : > { %v9092_v26 = vpop.f32.mrf.mxu1 }
 0x341   : > { %v9038_v14 = vpop.f32.mrf.mxu0  ;;  %9701 = vst [vmem:[#allocation35_spill] sm:$0xff] %v9092_v26 }
 0x347   : > { %v9042_v8 = vpop.f32.mrf.mxu0 }
 0x348   : > { %9690 = vst [vmem:[#allocation20_spill] sm:$0xff] %v9042_v8 }
 0x349   : > { %v9046_v34 = vpop.f32.mrf.mxu0 }
 0x34f   : > { %v9048_v18 = vpop.f32.mrf.mxu0 }
 0x350   : > { %9691 = vst [vmem:[#allocation19_spill] sm:$0xff] %v9048_v18 }
 0x351   : > { %v9052_v52 = vpop.f32.mrf.mxu0 }
 0x352   : > { %9692 = vst [vmem:[#allocation24_spill] sm:$0xff] %v9052_v52 }
 0x357   : > { %v9056_v38 = vpop.f32.mrf.mxu0 }
 0x358   : > { %9693 = vst [vmem:[#allocation6_spill] sm:$0xff] %v9056_v38 }
 0x359   : > { %v9060_v56 = vpop.f32.mrf.mxu0 }
 0x35a   : > { %9694 = vst [vmem:[#allocation27_spill] sm:$0xff] %v9060_v56 }
 0x35f   : > { %v9062_v41 = vpop.f32.mrf.mxu0 }
 0x360   : > { %9695 = vst [vmem:[#allocation30_spill] sm:$0xff] %v9062_v41 }
 0x361   : > { %v9066_v13 = vpop.f32.mrf.mxu0 }
 0x362   : > { %9696 = vst [vmem:[#allocation44_spill] sm:$0xff] %v9066_v13 }
 0x367   : > { %v9070_v11 = vpop.f32.mrf.mxu0 }
 0x368   : > { %9697 = vst [vmem:[#allocation32_spill] sm:$0xff] %v9070_v11 }
 0x369   : > { %v9072_v30 = vpop.f32.mrf.mxu0 }
 0x36a   : > { %9698 = vst [vmem:[#allocation34_spill] sm:$0xff] %v9072_v30  ;;  %v9098_v30 = vpop.f32.mrf.mxu1 }
 0x36b   : > { %v5454_v21 = vpop.f32.mrf.mxu0  ;;  %9702 = vst [vmem:[#allocation37_spill] sm:$0xff] %v9098_v30 }
 0x36c   : > { %v9104_v13 = vpop.f32.mrf.mxu1 }
 0x36d   : > { %v5455_v43 = vpop.f32.mrf.mxu0  ;;  %9703 = vst [vmem:[#allocation47_spill] sm:$0xff] %v9104_v13 }
 0x36e   : > { %v9110_v4 = vpop.f32.mrf.mxu1 }
 0x36f   : > { %v5457_v50 = vpop.f32.mrf.mxu0  ;;  %9704 = vst [vmem:[#allocation5_spill] sm:$0xff] %v9110_v4 }
 0x370   : > { %v9116_v18 = vpop.f32.mrf.mxu1 }
 0x371   : > { %v5458_v10 = vpop.f32.mrf.mxu0  ;;  %9705 = vst [vmem:[#allocation39_spill] sm:$0xff] %v9116_v18 }
 0x372   : > { %v9122_v26 = vpop.f32.mrf.mxu1 }
 0x373   : > { %v5460_v28 = vpop.f32.mrf.mxu0  ;;  %9708 = vst [vmem:[#allocation41_spill] sm:$0xff] %v9122_v26 }
 0x374   : > { %v9128_v61 = vpop.f32.mrf.mxu1 }
 0x375   : > { %v5461_v25 = vpop.f32.mrf.mxu0  ;;  %9711 = vst [vmem:[#allocation52_spill] sm:$0xff] %v9128_v61 }
 0x376   : > { %v9134_v15 = vpop.f32.mrf.mxu1 }
 0x377   : > { %v9082_v37 = vpop.f32.mrf.mxu0  ;;  %9714 = vst [vmem:[#allocation45_spill] sm:$0xff] %v9134_v15  ;;  %v9154_v15 = vld [vmem:[%s9339_s8] ss:$0 sm:$0xff] }
 0x378   : > { %v9140_v1 = vpop.f32.mrf.mxu1 }
 0x379   : > { %v9084_v32 = vpop.f32.mrf.mxu0  ;;  %9717 = vst [vmem:[#allocation48_spill] sm:$0xff] %v9140_v1  ;;  %v5456_v1 = vadd.f32 %v5455_v43, %v5454_v21  ;;  %v4054_v21 = vadd.f32 %v8885_v22, %v9154_v15  ;;  %v5462_v43 = vadd.f32 %v5461_v25, %v5460_v28 }
 0x37b   : > { %v9088_v55 = vpop.f32.mrf.mxu0 }
 0x37d   : > { %v9090_v2 = vpop.f32.mrf.mxu0 }
 0x37f   : > { %v9094_v40 = vpop.f32.mrf.mxu0 }
 0x381   : > { %v9096_v11 = vpop.f32.mrf.mxu0 }
 0x383   : > { %v9100_v41 = vpop.f32.mrf.mxu0 }
 0x385   : > { %v9102_v3 = vpop.f32.mrf.mxu0 }
 0x387   : > { %v9106_v58 = vpop.f32.mrf.mxu0 }
 0x389   : > { %v9108_v38 = vpop.f32.mrf.mxu0 }
 0x38b   : > { %v9112_v56 = vpop.f32.mrf.mxu0 }
 0x38d   : > { %v9114_v63 = vpop.f32.mrf.mxu0 }
 0x38f   : > { %v9118_v59 = vpop.f32.mrf.mxu0 }
 0x390   : > { %9706 = vst [vmem:[#allocation40_spill] sm:$0xff] %v9118_v59 }
 0x391   : > { %v9120_v30 = vpop.f32.mrf.mxu0 }
 0x392   : > { %9707 = vst [vmem:[#allocation49_spill] sm:$0xff] %v9120_v30  ;;  %v5459_v30 = vadd.f32 %v5458_v10, %v5457_v50 }
 0x393   : > { %v9124_v13 = vpop.f32.mrf.mxu0 }
 0x394   : > { %9709 = vst [vmem:[#allocation42_spill] sm:$0xff] %v9124_v13 }
 0x395   : > { %v9126_v52 = vpop.f32.mrf.mxu0 }
 0x396   : > { %9710 = vst [vmem:[#allocation13_spill] sm:$0xff] %v9126_v52  ;;  %v9146_v52 = vpop.f32.mrf.mxu1 }
 0x397   : > { %v9130_v4 = vpop.f32.mrf.mxu0  ;;  %9720 = vst [vmem:[#allocation50_spill] sm:$0xff] %v9146_v52  ;;  %v4049_v52 = vadd.f32 %v8866_v19, %v9154_v15  ;;  %v4199_v19 = vadd.f32 %v5459_v30, %v4054_v21 }
 0x398   : > { %9712 = vst [vmem:[#allocation21_spill] sm:$0xff] %v9130_v4  ;;  %v5536_v4 = vadd.f32 %v9014_v39, %v9012_v53 }
 0x399   : > { %v9132_v46 = vpop.f32.mrf.mxu0 }
 0x39a   : > { %9713 = vst [vmem:[#allocation43_spill] sm:$0xff] %v9132_v46 }
 0x39b   : > { %v9136_v18 = vpop.f32.mrf.mxu0 }
 0x39c   : > { %9715 = vst [vmem:[#allocation53_spill] sm:$0xff] %v9136_v18 }
 0x39d   : > { %v9138_v8 = vpop.f32.mrf.mxu0 }
 0x39e   : > { %9716 = vst [vmem:[#allocation46_spill] sm:$0xff] %v9138_v8  ;;  %v9158_v8 = vpop.f32.mrf.mxu1 }
 0x39f   : > { %v9142_v26 = vpop.f32.mrf.mxu0  ;;  %9723 = vst [vmem:[#allocation55_spill] sm:$0xff] %v9158_v8 }
 0x3a0   : > { %9718 = vst [vmem:[#allocation25_spill] sm:$0xff] %v9142_v26  ;;  %v4194_v26 = vadd.f32 %v5456_v1, %v4049_v52  ;;  %v4059_v1 = vadd.f32 %v8904_v51, %v9154_v15  ;;  %v9181_v52 = vld [vmem:[%s9337_s6] ss:$0 sm:$0xff]  ;;  %v5465_v51 = vadd.f32 %v9084_v32, %v9082_v37 }
 0x3a1   : > { %v9144_v13 = vpop.f32.mrf.mxu0 }
 0x3a2   : > { %9719 = vst [vmem:[#allocation28_spill] sm:$0xff] %v9144_v13  ;;  %v4204_v30 = vadd.f32 %v5462_v43, %v4059_v1  ;;  %v4069_v43 = vadd.f32 %v8939_v49, %v9154_v15 }
 0x3a3   : > { %v9148_v61 = vpop.f32.mrf.mxu0 }
 0x3a4   : > { %9721 = vst [vmem:[#allocation51_spill] sm:$0xff] %v9148_v61  ;;  %v9167_v61 = vpop.f32.mrf.mxu1 }
 0x3a5   : > { %v9156_v18 = vpop.f32.mrf.mxu0  ;;  %9726 = vst [vmem:[#allocation22_spill] sm:$0xff] %v9167_v61 }
 0x3a6   : > { %9722 = vst [vmem:[#allocation54_spill] sm:$0xff] %v9156_v18  ;;  %v5941_v18 = vpop.f32.mrf.mxu1 }
 0x3a7   : > { %v9160_v46 = vpop.f32.mrf.mxu0 }
 0x3a8   : > { %9724 = vst [vmem:[#allocation36_spill] sm:$0xff] %v9160_v46  ;;  %v4339_v46 = vadd.f32 %v5536_v4, %v4194_v26  ;;  %v4628_v39 = vpop.f32.mrf.mxu1  ;;  %v3613_v4 = vadd.f32 %v9181_v52, %v9024_v33 }
 0x3a9   : > { %v9165_v13 = vpop.f32.mrf.mxu0 }
 0x3aa   : > { %9725 = vst [vmem:[#allocation38_spill] sm:$0xff] %v9165_v13  ;;  %v5539_v13 = vadd.f32 %v9018_v20, %v9016_v24  ;;  %v5542_v24 = vadd.f32 %v9026_v48, %v9022_v5  ;;  %v5944_v28 = vpop.f32.mrf.mxu1  ;;  %v3618_v5 = vadd.f32 %v9020_v35, %v9181_v52  ;;  %v5545_v48 = vadd.f32 %v9036_v45, %v9030_v54 }
 0x3ab   : > { %v5614_v59 = vpop.f32.mrf.mxu0  ;;  %v3623_v54 = vadd.f32 %v9181_v52, %v9032_v0 }
 0x3ac   : > { %v4344_v20 = vadd.f32 %v5539_v13, %v4199_v19  ;;  %v4349_v33 = vadd.f32 %v5542_v24, %v4204_v30  ;;  %v5468_v13 = vadd.f32 %v9090_v2, %v9088_v55  ;;  %v4638_v1 = vpop.f32.mrf.mxu1  ;;  %v5548_v55 = vadd.f32 %v9044_v36, %v9040_v16 }
 0x3ad   : > { %v5615_v8 = vpop.f32.mrf.mxu0  ;;  %v4074_v30 = vadd.f32 %v8946_v17, %v9154_v15  ;;  %v3628_v16 = vadd.f32 %v9028_v29, %v9181_v52 }
 0x3ae   : > { %v5616_v61 = vadd.f32 %v5615_v8, %v5614_v59  ;;  %v4214_v45 = vadd.f32 %v5468_v13, %v4069_v43 }
 0x3af   : > { %v5617_v53 = vpop.f32.mrf.mxu0 }
 0x3b0   : > { %v4484_v22 = vadd.f32 %v5616_v61, %v4339_v46  ;;  %v4064_v61 = vadd.f32 %v8923_v31, %v9154_v15  ;;  %v4359_v36 = vadd.f32 %v5548_v55, %v4214_v45 }
 0x3b1   : > { %v5618_v59 = vpop.f32.mrf.mxu0 }
 0x3b2   : > { %v5619_v8 = vadd.f32 %v5618_v59, %v5617_v53  ;;  %v4629_v50 = vadd.f32 %v4628_v39, %v4484_v22  ;;  %v4209_v31 = vadd.f32 %v5465_v51, %v4064_v61  ;;  %v5947_v59 = vpop.f32.mrf.mxu1 }
 0x3b3   : > { %v5620_v10 = vpop.f32.mrf.mxu0 }
 0x3b4   : > { %v4489_v25 = vadd.f32 %v5619_v8, %v4344_v20  ;;  %v4707_v46 = vadd.f32 %v4629_v50, %v3613_v4  ;;  %v4354_v39 = vadd.f32 %v5545_v48, %v4209_v31  ;;  %v5474_v8 = vadd.f32 %v9102_v3, %v9100_v41 }
 0x3b5   : > { %v5621_v37 = vpop.f32.mrf.mxu0  ;;  %v5477_v3 = vadd.f32 %v9108_v38, %v9106_v58  ;;  %v5557_v58 = vadd.f32 %v9074_v27, %v9068_v44  ;;  %v5480_v38 = vadd.f32 %v9114_v63, %v9112_v56  ;;  %v3643_v44 = vadd.f32 %v9181_v52, %v9046_v34 }
 0x3b6   : > { %v4634_v32 = vadd.f32 %v5941_v18, %v4489_v25  ;;  %v4723_v26 = vmax.f32 %v4707_v46, 0.0  ;;  %v5622_v21 = vadd.f32 %v5621_v37, %v5620_v10  ;;  %v5471_v18 = vadd.f32 %v9096_v11, %v9094_v40  ;;  %v4648_v25 = vpop.f32.mrf.mxu1 }
 0x3b7   : > { %v5623_v19 = vpop.f32.mrf.mxu0  ;;  %v5551_v11 = vadd.f32 %v9054_v6, %v9050_v23  ;;  %v4079_v46 = vadd.f32 %v8950_v42, %v9154_v15  ;;  %v5554_v6 = vadd.f32 %v9064_v9, %v9058_v7  ;;  %v4084_v42 = vadd.f32 %v8954_v12, %v9154_v15 }
 0x3b8   : > { %v4708_v53 = vadd.f32 %v4634_v32, %v3618_v5  ;;  %4739 = vst [vmem:[%s9194_s27] sm:$0xff] %v4723_v26  ;;  %v4494_v35 = vadd.f32 %v5622_v21, %v4349_v33  ;;  %v4219_v51 = vadd.f32 %v5471_v18, %v4074_v30  ;;  %v3633_v33 = vadd.f32 %v9181_v52, %v9038_v14  ;;  %v5950_v32 = vpop.f32.mrf.mxu1  ;;  %v9727_v18 = vld [vmem:[#allocation40_spill] sm:$0xff] }
 0x3b9   : > { %v5624_v2 = vpop.f32.mrf.mxu0  ;;  %v3638_v7 = vadd.f32 %v9034_v47, %v9181_v52  ;;  %v4229_v9 = vadd.f32 %v5477_v3, %v4084_v42  ;;  %v5560_v63 = vadd.f32 %v9078_v60, %v9076_v57  ;;  %v9731_v60 = vld [vmem:[#allocation14_spill] sm:$0xff]  ;;  %v9736_v3 = vld [vmem:[#allocation24_spill] sm:$0xff]  ;;  %v9739_v42 = vld [vmem:[#allocation21_spill] sm:$0xff] }
 0x3ba   : > { %v4724_v22 = vmax.f32 %v4708_v53, 0.0  ;;  %v5625_v49 = vadd.f32 %v5624_v2, %v5623_v19  ;;  %v4639_v4 = vadd.f32 %v4638_v1, %v4494_v35  ;;  %v4364_v23 = vadd.f32 %v5551_v11, %v4219_v51  ;;  %v9728_v2 = vld [vmem:[#allocation49_spill] sm:$0xff]  ;;  %v9733_v11 = vld [vmem:[#allocation42_spill] sm:$0xff] }
 0x3bb   : > { %v5626_v24 = vpop.f32.mrf.mxu0  ;;  %v4089_v53 = vadd.f32 %v8958_v62, %v9154_v15  ;;  %v4374_v27 = vadd.f32 %v5557_v58, %v4229_v9 }
 0x3bc   : > { %4740 = vst [vmem:[%s9194_s27 + $0x8] sm:$0xff] %v4724_v22  ;;  %v4499_v0 = vadd.f32 %v5625_v49, %v4354_v39  ;;  %v4709_v20 = vadd.f32 %v4639_v4, %v3623_v54  ;;  %v4658_v54 = vpop.f32.mrf.mxu1  ;;  %v5483_v39 = vadd.f32 %v9728_v2, %v9727_v18 }
 0x3bd   : > { %v5627_v40 = vpop.f32.mrf.mxu0  ;;  %v4234_v55 = vadd.f32 %v5480_v38, %v4089_v53  ;;  %v9741_v38 = vld [vmem:[#allocation11_spill] sm:$0xff] }
 0x3be   : > { %v4644_v50 = vadd.f32 %v5944_v28, %v4499_v0  ;;  %v4725_v17 = vmax.f32 %v4709_v20, 0.0  ;;  %v5628_v10 = vadd.f32 %v5627_v40, %v5626_v24  ;;  %v4224_v28 = vadd.f32 %v5474_v8, %v4079_v46  ;;  %v5953_v30 = vpop.f32.mrf.mxu1  ;;  %v9729_v24 = vld [vmem:[#allocation10_spill] sm:$0xff]  ;;  %v9730_v20 = vld [vmem:[#allocation20_spill] sm:$0xff]  ;;  %v9734_v40 = vld [vmem:[#allocation13_spill] sm:$0xff] }
 0x3bf   : > { %v5629_v61 = vpop.f32.mrf.mxu0  ;;  %v4379_v57 = vadd.f32 %v5560_v63, %v4234_v55  ;;  %v5486_v8 = vadd.f32 %v9734_v40, %v9733_v11  ;;  %v9735_v46 = vld [vmem:[#allocation2_spill] sm:$0xff]  ;;  %v9742_v53 = vld [vmem:[#allocation19_spill] sm:$0xff]  ;;  %v9745_v63 = vld [vmem:[#allocation53_spill] sm:$0xff] }
 0x3c0   : > { %v4710_v5 = vadd.f32 %v4644_v50, %v3628_v16  ;;  %4741 = vst [vmem:[%s9194_s27 + $0x10] sm:$0xff] %v4725_v17  ;;  %v4504_v29 = vadd.f32 %v5628_v10, %v4359_v36  ;;  %v4369_v43 = vadd.f32 %v5554_v6, %v4224_v28  ;;  %v3648_v16 = vadd.f32 %v9730_v20, %v9181_v52  ;;  %v9732_v36 = vld [vmem:[#allocation16_spill] sm:$0xff] }
 0x3c1   : > { %v5630_v41 = vpop.f32.mrf.mxu0  ;;  %v5563_v51 = vadd.f32 %v9732_v36, %v9731_v60  ;;  %v9750_v60 = vld [vmem:[#allocation41_spill] sm:$0xff] }
 0x3c2   : > { %v4726_v48 = vmax.f32 %v4710_v5, 0.0  ;;  %v5631_v13 = vadd.f32 %v5630_v41, %v5629_v61  ;;  %v4649_v37 = vadd.f32 %v4648_v25, %v4504_v29  ;;  %v4099_v5 = vadd.f32 %v9735_v46, %v9154_v15 }
 0x3c3   : > { %v5632_v31 = vpop.f32.mrf.mxu0  ;;  %v3653_v41 = vadd.f32 %v9181_v52, %v9736_v3 }
 0x3c4   : > { %4742 = vst [vmem:[%s9194_s27 + $0x18] sm:$0xff] %v4726_v48  ;;  %v4509_v14 = vadd.f32 %v5631_v13, %v4364_v23  ;;  %v4711_v26 = vadd.f32 %v4649_v37, %v3633_v33  ;;  %v4668_v33 = vpop.f32.mrf.mxu1  ;;  %v4244_v28 = vadd.f32 %v5486_v8, %v4099_v5  ;;  %v9737_v48 = vld [vmem:[#allocation35_spill] sm:$0xff]  ;;  %v9738_v13 = vld [vmem:[#allocation37_spill] sm:$0xff] }
 0x3c5   : > { %v5633_v21 = vpop.f32.mrf.mxu0  ;;  %v5566_v37 = vadd.f32 %v9738_v13, %v9737_v48  ;;  %v9757_v13 = vld [vmem:[#allocation51_spill] sm:$0xff] }
 0x3c6   : > { %v4654_v19 = vadd.f32 %v5947_v59, %v4509_v14  ;;  %v4727_v12 = vmax.f32 %v4711_v26, 0.0  ;;  %v5634_v1 = vadd.f32 %v5633_v21, %v5632_v31  ;;  %v4094_v59 = vadd.f32 %v9729_v24, %v9154_v15  ;;  %v9740_v31 = vld [vmem:[#allocation43_spill] sm:$0xff] }
 0x3c7   : > { %v5635_v35 = vpop.f32.mrf.mxu0  ;;  %v4104_v21 = vadd.f32 %v9741_v38, %v9154_v15 }
 0x3c8   : > { %v4712_v45 = vadd.f32 %v4654_v19, %v3638_v7  ;;  %4743 = vst [vmem:[%s9194_s27 + $0x20] sm:$0xff] %v4727_v12  ;;  %v4514_v47 = vadd.f32 %v5634_v1, %v4369_v43  ;;  %v4239_v17 = vadd.f32 %v5483_v39, %v4094_v59  ;;  %v5956_v19 = vpop.f32.mrf.mxu1 }
 0x3c9   : > { %v5636_v56 = vpop.f32.mrf.mxu0 }
 0x3ca   : > { %v4728_v22 = vmax.f32 %v4712_v45, 0.0  ;;  %v5637_v62 = vadd.f32 %v5636_v56, %v5635_v35  ;;  %v4659_v49 = vadd.f32 %v4658_v54, %v4514_v47  ;;  %v4384_v26 = vadd.f32 %v5563_v51, %v4239_v17  ;;  %v9743_v47 = vld [vmem:[#allocation47_spill] sm:$0xff]  ;;  %v9746_v56 = vld [vmem:[#allocation46_spill] sm:$0xff]  ;;  %v9751_v51 = vld [vmem:[#allocation25_spill] sm:$0xff] }
 0x3cb   : > { %v5638_v4 = vpop.f32.mrf.mxu0  ;;  %v3658_v35 = vadd.f32 %v9742_v53, %v9181_v52  ;;  %v4389_v54 = vadd.f32 %v5566_v37, %v4244_v28  ;;  %v5492_v18 = vadd.f32 %v9746_v56, %v9745_v63  ;;  %v9756_v28 = vld [vmem:[#allocation45_spill] sm:$0xff]  ;;  %v9758_v37 = vld [vmem:[#allocation54_spill] sm:$0xff] }
 0x3cc   : > { %4744 = vst [vmem:[%s9194_s27 + $0x28] sm:$0xff] %v4728_v22  ;;  %v4519_v34 = vadd.f32 %v5637_v62, %v4374_v27  ;;  %v4713_v0 = vadd.f32 %v4659_v49, %v3643_v44  ;;  %v9744_v44 = vld [vmem:[#allocation5_spill] sm:$0xff]  ;;  %v4678_v49 = vpop.f32.mrf.mxu1 }
 0x3cd   : > { %v5639_v50 = vpop.f32.mrf.mxu0  ;;  %v5569_v27 = vadd.f32 %v9744_v44, %v9743_v47  ;;  %v9762_v47 = vld [vmem:[#allocation50_spill] sm:$0xff] }
 0x3ce   : > { %v4664_v10 = vadd.f32 %v5950_v32, %v4519_v34  ;;  %v4729_v61 = vmax.f32 %v4713_v0, 0.0  ;;  %v5640_v25 = vadd.f32 %v5639_v50, %v5638_v4  ;;  %v5489_v32 = vadd.f32 %v9740_v31, %v9739_v42  ;;  %v9747_v4 = vld [vmem:[#allocation3_spill] sm:$0xff]  ;;  %v5959_v5 = vpop.f32.mrf.mxu1 }
 0x3cf   : > { %v5641_v29 = vpop.f32.mrf.mxu0  ;;  %v4109_v24 = vadd.f32 %v9747_v4, %v9154_v15  ;;  %v9748_v0 = vld [vmem:[#allocation27_spill] sm:$0xff]  ;;  %v5498_v42 = vadd.f32 %v9758_v37, %v9757_v13 }
 0x3d0   : > { %v4714_v23 = vadd.f32 %v4664_v10, %v3648_v16  ;;  %4745 = vst [vmem:[%s9194_s27 + $0x30] sm:$0xff] %v4729_v61  ;;  %v4524_v6 = vadd.f32 %v5640_v25, %v4379_v57  ;;  %v4249_v45 = vadd.f32 %v5489_v32, %v4104_v21  ;;  %v3663_v20 = vadd.f32 %v9181_v52, %v9748_v0  ;;  %v9749_v57 = vld [vmem:[#allocation39_spill] sm:$0xff]  ;;  %v9753_v61 = vld [vmem:[#allocation9_spill] sm:$0xff]  ;;  %v4688_v21 = vpop.f32.mrf.mxu1 }
 0x3d1   : > { %v5642_v14 = vpop.f32.mrf.mxu0  ;;  %v5572_v36 = vadd.f32 %v9750_v60, %v9749_v57  ;;  %v4254_v8 = vadd.f32 %v5492_v18, %v4109_v24  ;;  %v4114_v25 = vadd.f32 %v9753_v61, %v9154_v15 }
 0x3d2   : > { %v4730_v7 = vmax.f32 %v4714_v23, 0.0  ;;  %v5643_v9 = vadd.f32 %v5642_v14, %v5641_v29  ;;  %v4669_v58 = vadd.f32 %v4668_v33, %v4524_v6  ;;  %v4394_v16 = vadd.f32 %v5569_v27, %v4249_v45  ;;  %v9754_v23 = vld [vmem:[#allocation6_spill] sm:$0xff]  ;;  %v9761_v45 = vld [vmem:[#allocation48_spill] sm:$0xff] }
 0x3d3   : > { %v5644_v43 = vpop.f32.mrf.mxu0  ;;  %v3668_v6 = vadd.f32 %v9754_v23, %v9181_v52  ;;  %v4399_v32 = vadd.f32 %v5572_v36, %v4254_v8  ;;  %v5578_v44 = vadd.f32 %v9762_v47, %v9761_v45  ;;  %v9763_v27 = vld [vmem:[#allocation36_spill] sm:$0xff] }
 0x3d4   : > { %4746 = vst [vmem:[%s9194_s27 + $0x38] sm:$0xff] %v4730_v7  ;;  %v4529_v12 = vadd.f32 %v5643_v9, %v4384_v26  ;;  %v4715_v1 = vadd.f32 %v4669_v58, %v3653_v41  ;;  %v9755_v41 = vld [vmem:[#allocation52_spill] sm:$0xff]  ;;  %v9759_v9 = vld [vmem:[#allocation18_spill] sm:$0xff] }
 0x3d5   : > { %v5645_v55 = vpop.f32.mrf.mxu0  ;;  %v5575_v48 = vadd.f32 %v9756_v28, %v9755_v41  ;;  %v4119_v58 = vadd.f32 %v9759_v9, %v9154_v15 }
 0x3d6   : > { %v4674_v2 = vadd.f32 %v5953_v30, %v4529_v12  ;;  %v4731_v39 = vmax.f32 %v4715_v1, 0.0  ;;  %v5646_v22 = vadd.f32 %v5645_v55, %v5644_v43  ;;  %v9752_v30 = vld [vmem:[#allocation28_spill] sm:$0xff]  ;;  %v9764_v55 = vld [vmem:[#allocation38_spill] sm:$0xff] }
 0x3d7   : > { %v5647_v62 = vpop.f32.mrf.mxu0  ;;  %v5495_v11 = vadd.f32 %v9752_v30, %v9751_v51  ;;  %v9760_v1 = vld [vmem:[#allocation44_spill] sm:$0xff]  ;;  %v5501_v63 = vadd.f32 %v9764_v55, %v9763_v27 }
 0x3d8   : > { %v4716_v59 = vadd.f32 %v4674_v2, %v3658_v35  ;;  %4747 = vst [vmem:[%s9194_s27 + $0x40] sm:$0xff] %v4731_v39  ;;  %v4534_v34 = vadd.f32 %v5646_v22, %v4389_v54  ;;  %v3673_v53 = vadd.f32 %v9181_v52, %v9760_v1  ;;  %v4264_v54 = vadd.f32 %v5498_v42, %v4119_v58  ;;  %v5962_v22 = vpop.f32.mrf.mxu1 }
 0x3d9   : > { %v5648_v40 = vpop.f32.mrf.mxu0  ;;  %v4259_v3 = vadd.f32 %v5495_v11, %v4114_v25 }
 0x3da   : > { %v4732_v50 = vmax.f32 %v4716_v59, 0.0  ;;  %v5649_v17 = vadd.f32 %v5648_v40, %v5647_v62  ;;  %v4679_v10 = vadd.f32 %v4678_v49, %v4534_v34  ;;  %v9765_v62 = vld [vmem:[#allocation8_spill] sm:$0xff]  ;;  %v9766_v59 = vld [vmem:[#allocation30_spill] sm:$0xff]  ;;  %v4409_v0 = vadd.f32 %v5578_v44, %v4264_v54  ;;  %v4698_v8 = vpop.f32.mrf.mxu1 }
 0x3db   : > { %v5650_v46 = vpop.f32.mrf.mxu0  ;;  %v4404_v35 = vadd.f32 %v5575_v48, %v4259_v3  ;;  %v4124_v49 = vadd.f32 %v9765_v62, %v9154_v15  ;;  %v3678_v34 = vadd.f32 %v9766_v59, %v9181_v52 }
 0x3dc   : > { %4748 = vst [vmem:[%s9194_s27 + $0x48] sm:$0xff] %v4732_v50  ;;  %v4539_v29 = vadd.f32 %v5649_v17, %v4394_v16  ;;  %v4717_v33 = vadd.f32 %v4679_v10, %v3663_v20  ;;  %v9767_v20 = vld [vmem:[#allocation55_spill] sm:$0xff]  ;;  %v9768_v16 = vld [vmem:[#allocation22_spill] sm:$0xff] }
 0x3dd   : > { %v5651_v31 = vpop.f32.mrf.mxu0  ;;  %v5581_v57 = vadd.f32 %v9768_v16, %v9767_v20  ;;  %v4269_v36 = vadd.f32 %v5501_v63, %v4124_v49  ;;  %v9769_v17 = vld [vmem:[#allocation34_spill] sm:$0xff] }
 0x3de   : > { %v4684_v14 = vadd.f32 %v5956_v19, %v4539_v29  ;;  %v4733_v26 = vmax.f32 %v4717_v33, 0.0  ;;  %v5652_v7 = vadd.f32 %v5651_v31, %v5650_v46  ;;  %v3683_v10 = vadd.f32 %v9181_v52, %v9769_v17 }
 0x3df   : > { %v5653_v38 = vpop.f32.mrf.mxu0  ;;  %v4414_v25 = vadd.f32 %v5581_v57, %v4269_v36 }
 0x3e0   : > { %v4718_v43 = vadd.f32 %v4684_v14, %v3668_v6  ;;  %4749 = vst [vmem:[%s9194_s27 + $0x50] sm:$0xff] %v4733_v26  ;;  %v4544_v12 = vadd.f32 %v5652_v7, %v4399_v32  ;;  %v9770_v6 = vld [vmem:[#allocation32_spill] sm:$0xff] }
 0x3e1   : > { %v5654_v19 = vpop.f32.mrf.mxu0  ;;  %v3688_v3 = vadd.f32 %v9770_v6, %v9181_v52 }
 0x3e2   : > { %v4734_v56 = vmax.f32 %v4718_v43, 0.0  ;;  %v5655_v18 = vadd.f32 %v5654_v19, %v5653_v38  ;;  %v4689_v2 = vadd.f32 %v4688_v21, %v4544_v12 }
 0x3e3   : > { %v5656_v39 = vpop.f32.mrf.mxu0 }
 0x3e4   : > { %4750 = vst [vmem:[%s9194_s27 + $0x58] sm:$0xff] %v4734_v56  ;;  %v4549_v4 = vadd.f32 %v5655_v18, %v4404_v35  ;;  %v4719_v24 = vadd.f32 %v4689_v2, %v3673_v53 }
 0x3e5   : > { %v5657_v60 = vpop.f32.mrf.mxu0 }
 0x3e6   : > { %v4694_v51 = vadd.f32 %v5959_v5, %v4549_v4  ;;  %v4735_v30 = vmax.f32 %v4719_v24, 0.0  ;;  %v5658_v11 = vadd.f32 %v5657_v60, %v5656_v39 }
 0x3e7   : > { %v5659_v40 = vpop.f32.mrf.mxu0 }
 0x3e8   : > { %v4720_v50 = vadd.f32 %v4694_v51, %v3678_v34  ;;  %4751 = vst [vmem:[%s9194_s27 + $0x60] sm:$0xff] %v4735_v30  ;;  %v4554_v15 = vadd.f32 %v5658_v11, %v4409_v0 }
 0x3e9   : > { %v5660_v61 = vpop.f32.mrf.mxu0 }
 0x3ea   : > { %v4736_v46 = vmax.f32 %v4720_v50, 0.0  ;;  %v5661_v29 = vadd.f32 %v5660_v61, %v5659_v40  ;;  %v4699_v33 = vadd.f32 %v4698_v8, %v4554_v15 }
 0x3ec   : > { %4752 = vst [vmem:[%s9194_s27 + $0x68] sm:$0xff] %v4736_v46  ;;  %v4559_v23 = vadd.f32 %v5661_v29, %v4414_v25  ;;  %v4721_v5 = vadd.f32 %v4699_v33, %v3683_v10 }
 0x3ee   : > { %v4704_v41 = vadd.f32 %v5962_v22, %v4559_v23  ;;  %v4737_v28 = vmax.f32 %v4721_v5, 0.0 }
 0x3f0   : > { %v4722_v48 = vadd.f32 %v4704_v41, %v3688_v3  ;;  %4753 = vst [vmem:[%s9194_s27 + $0x70] sm:$0xff] %v4737_v28 }
 0x3f2   : > { %v4738_v13 = vmax.f32 %v4722_v48, 0.0 }
 0x3f4   : > { %4754 = vst [vmem:[%s9194_s27 + $0x78] sm:$0xff] %v4738_v13 }
 0x3f5 PF: > { %s19_s13 = sadd.s32 1, %s6124_s13   ;;  %s9771_s30 = smov %s6116_s11 }
 0x3f6   : > { %p16_p8 = scmp.ge.s32.totalorder %s19_s13, 6   ;;  %s9772_s10 = smov %s6120_s12 }
 0x3f7   : > { %s9773_s11 = smov %s9776_s14  ;;  %s9774_s12 = smov %s9780_s15 }
 0x3f8   :  { %18 = sbr.rel (!%p16_p8) target bundleno = 3 (0x3), region = 86 }

</bundles_post_ra>
